<compile_context>
chip_gen: v5e
topology: v5e:2x2
jax: 0.10.0
libtpu: 0.0.40
codegen_flags: <defaults>
</compile_context>

<pallas_src>
import jax
import jax.numpy as jnp
from jax.experimental import pallas as pl
from jax.experimental.pallas import tpu as pltpu

hidden_dim = 512
input_dim = 784
latent_dim = 10
num_classes = 5
LATENT_FLAT = latent_dim * num_classes   # 50  (true mu/logvar width)
Z_PAD = 64                               # padded latent width (lane-aligned half vreg)
ML_PAD = 2 * Z_PAD                       # fused, padded mu|logvar width = 128


def _vae_kernel(x_ref, eps_ref,
                w_enc_ref, b_enc_ref,
                w_ml_ref, b_ml_ref,
                w_d1_ref, b_d1_ref,
                w_d2_ref, b_d2_ref,
                xhat_ref, mulv_ref):
    x = x_ref[...]                                               # [TB, 784] bf16 (pre-cast)

    # encoder: Linear(784 -> 512) + ReLU  (bf16 operands, f32 accumulate)
    h = jnp.dot(x, w_enc_ref[...],
                preferred_element_type=jnp.float32) + b_enc_ref[...]
    h = jnp.maximum(h, 0.0)                                      # [TB, 512] f32

    # fused fc_mu | fc_logvar: Linear(512 -> 128 padded); pad columns of w/b are zero
    ml = jnp.dot(h.astype(jnp.bfloat16), w_ml_ref[...],
                 preferred_element_type=jnp.float32) + b_ml_ref[...]   # [TB, 128]
    mu = ml[:, :Z_PAD]                                           # lanes 0..63  (data 0..49)
    logvar = ml[:, Z_PAD:]                                       # lanes 64..127 (data 64..113)

    # reparameterize: z = mu + eps * exp(0.5 * logvar)   (f32 elementwise)
    # pad lanes: mu=0, logvar=0 -> std=1, eps=0 -> z pad lanes = 0
    std = jnp.exp(0.5 * logvar)
    z = mu + eps_ref[...] * std                                  # [TB, 64] f32

    # decoder: Linear(64-padded -> 512) + ReLU, Linear(512 -> 784) + Sigmoid
    d1 = jnp.dot(z.astype(jnp.bfloat16), w_d1_ref[...],
                 preferred_element_type=jnp.float32) + b_d1_ref[...]
    d1 = jnp.maximum(d1, 0.0)                                    # [TB, 512] f32
    logits = jnp.dot(d1.astype(jnp.bfloat16), w_d2_ref[...],
                     preferred_element_type=jnp.float32) + b_d2_ref[...]
    xhat_ref[...] = jax.nn.sigmoid(logits).astype(xhat_ref.dtype)  # [TB, 784] bf16 store

    mulv_ref[...] = ml                                           # [TB, 128] f32


def _pick_tb(B):
    """Batch tile: big for MXU/DMA efficiency, >= 2 grid steps for v7x's two TCs."""
    if B >= 1024:
        return 512
    if B >= 16:
        return max(8, ((B + 15) // 16) * 8)   # ~ceil(B/2) rounded to 8-sublane grain
    return ((max(B, 1) + 7) // 8) * 8


def vae_forward(x, eps, params, tb=None):
    """x: [B, input_dim] f32 (or bf16), eps: [B, LATENT_FLAT] f32.

    Returns (x_hat [B,784] bf16, mu [B,10,5] f32, logvar [B,10,5] f32)."""
    B = x.shape[0]
    if tb is None:
        tb = _pick_tb(B)
    Bp = ((B + tb - 1) // tb) * tb

    # Cast x to bf16 in the wrapper: halves the x HBM stream and removes the in-kernel cast.
    x = x.astype(jnp.bfloat16)
    if Bp != B:
        x = jnp.pad(x, ((0, Bp - B), (0, 0)))
        eps = jnp.pad(eps, ((0, Bp - B), (0, 0)))
    # pad eps lanes 50..63 with zeros (lane-aligned latent width)
    eps = jnp.pad(eps.astype(jnp.float32), ((0, 0), (0, Z_PAD - LATENT_FLAT)))

    grid = (Bp // tb,)

    def act_spec(cols):
        return pl.BlockSpec((tb, cols), lambda i: (i, 0))

    def pinned_spec(shape):
        # weights/biases: same block for every grid step -> fetched once, resident in VMEM
        return pl.BlockSpec(shape, lambda i: (0, 0))

    inputs = (
        x, eps,
        params["w_enc"], params["b_enc"],
        params["w_ml"], params["b_ml"],
        params["w_d1"], params["b_d1"],
        params["w_d2"], params["b_d2"],
    )

    in_specs = [
        act_spec(input_dim),          # x (bf16)
        act_spec(Z_PAD),              # eps (f32, padded to 64 lanes)
        pinned_spec(params["w_enc"].shape), pinned_spec(params["b_enc"].shape),
        pinned_spec(params["w_ml"].shape), pinned_spec(params["b_ml"].shape),
        pinned_spec(params["w_d1"].shape), pinned_spec(params["b_d1"].shape),
        pinned_spec(params["w_d2"].shape), pinned_spec(params["b_d2"].shape),
    ]

    out_specs = (
        act_spec(input_dim),          # x_hat (bf16)
        act_spec(ML_PAD),             # mu|logvar fused (f32, 128 lanes -> unmasked stores)
    )

    # advisory cost hint for XLA scheduling around the custom call
    matmul_macs = (input_dim * hidden_dim + hidden_dim * ML_PAD
                   + Z_PAD * hidden_dim + hidden_dim * input_dim)
    weight_bytes = 2 * matmul_macs                                      # bf16 weights
    bias_bytes = 4 * (hidden_dim + ML_PAD + hidden_dim + input_dim)
    act_bytes = Bp * (2 * input_dim          # x bf16
                      + 4 * Z_PAD            # eps f32
                      + 2 * input_dim        # x_hat bf16
                      + 4 * ML_PAD)          # mulv f32
    cost = pl.CostEstimate(
        flops=2 * Bp * matmul_macs,
        transcendentals=Bp * (Z_PAD + input_dim),                       # exp + sigmoid
        bytes_accessed=weight_bytes + bias_bytes + act_bytes,
    )

    x_hat, mulv = pl.pallas_call(
        _vae_kernel,
        out_shape=(
            jax.ShapeDtypeStruct((Bp, input_dim), jnp.bfloat16),        # x_hat
            jax.ShapeDtypeStruct((Bp, ML_PAD), jnp.float32),            # mu|logvar (padded)
        ),
        grid=grid,
        in_specs=in_specs,
        out_specs=out_specs,
        compiler_params=pltpu.CompilerParams(
            dimension_semantics=("parallel",),
            vmem_limit_bytes=32 << 20,
        ),
        cost_estimate=cost,
    )(*inputs)

    x_hat = x_hat[:B]
    # glue: torch's .view(-1, latent_dim, num_classes); slice the real lanes out of the pads
    mu = mulv[:B, :LATENT_FLAT].reshape(B, latent_dim, num_classes)
    logvar = mulv[:B, Z_PAD:Z_PAD + LATENT_FLAT].reshape(B, latent_dim, num_classes)
    return x_hat, mu, logvar


def init_params(key):
    """Deterministic init matching nn.Linear shapes, stored as [in, out].
    Weights kept in bf16 (MXU operands / halved weight DMA); biases in f32.
    fc_mu|fc_logvar fused and lane-padded to 128 (mu: lanes 0..49, logvar: 64..113)."""
    ks = jax.random.split(key, 10)

    def linear(kw, kb, fan_in, fan_out):
        bound = 1.0 / jnp.sqrt(fan_in)
        w = jax.random.uniform(kw, (fan_in, fan_out), jnp.float32, -bound, bound)
        b = jax.random.uniform(kb, (1, fan_out), jnp.float32, -bound, bound)
        return w.astype(jnp.bfloat16), b

    w_enc, b_enc = linear(ks[0], ks[1], input_dim, hidden_dim)
    w_mu, b_mu = linear(ks[2], ks[3], hidden_dim, LATENT_FLAT)
    w_lv, b_lv = linear(ks[4], ks[5], hidden_dim, LATENT_FLAT)
    w_d1_raw, b_d1 = linear(ks[6], ks[7], LATENT_FLAT, hidden_dim)
    w_d2, b_d2 = linear(ks[8], ks[9], hidden_dim, input_dim)

    # fuse fc_mu | fc_logvar into one [512, 128] projection; pad columns are zero
    w_ml = jnp.zeros((hidden_dim, ML_PAD), jnp.bfloat16)
    w_ml = w_ml.at[:, :LATENT_FLAT].set(w_mu)
    w_ml = w_ml.at[:, Z_PAD:Z_PAD + LATENT_FLAT].set(w_lv)
    b_ml = jnp.zeros((1, ML_PAD), jnp.float32)
    b_ml = b_ml.at[:, :LATENT_FLAT].set(b_mu[0])
    b_ml = b_ml.at[:, Z_PAD:Z_PAD + LATENT_FLAT].set(b_lv[0])

    # decoder first layer: pad latent input dim 50 -> 64 with zero rows
    w_d1 = jnp.zeros((Z_PAD, hidden_dim), jnp.bfloat16)
    w_d1 = w_d1.at[:LATENT_FLAT, :].set(w_d1_raw)

    return dict(w_enc=w_enc, b_enc=b_enc, w_ml=w_ml, b_ml=b_ml,
                w_d1=w_d1, b_d1=b_d1, w_d2=w_d2, b_d2=b_d2)


def vae_forward_ref(x, eps, p):
    """Pure-JAX reference with the same bf16-operand / f32-accumulate matmuls."""
    def mm(a, w):
        return jnp.dot(a.astype(jnp.bfloat16), w, preferred_element_type=jnp.float32)

    h = jnp.maximum(mm(x, p["w_enc"]) + p["b_enc"], 0.0)
    ml = mm(h, p["w_ml"]) + p["b_ml"]
    mu = ml[:, :LATENT_FLAT]
    logvar = ml[:, Z_PAD:Z_PAD + LATENT_FLAT]
    z = mu + eps * jnp.exp(0.5 * logvar)
    z_pad = jnp.pad(z, ((0, 0), (0, Z_PAD - LATENT_FLAT)))
    d1 = jnp.maximum(mm(z_pad, p["w_d1"]) + p["b_d1"], 0.0)
    x_hat = jax.nn.sigmoid(mm(d1, p["w_d2"]) + p["b_d2"])
    B = x.shape[0]
    return (x_hat,
            mu.reshape(B, latent_dim, num_classes),
            logvar.reshape(B, latent_dim, num_classes))


if __name__ == "__main__":
    key = jax.random.PRNGKey(0)
    k_param, k_x, k_eps = jax.random.split(key, 3)

    B = 8
    params = init_params(k_param)
    x = jax.random.uniform(k_x, (B, input_dim), jnp.float32)          # MNIST-like input
    eps = jax.random.normal(k_eps, (B, LATENT_FLAT), jnp.float32)     # torch.randn_like(std)

    x_hat, mu, logvar = vae_forward(x, eps, params)
    jax.block_until_ready((x_hat, mu, logvar))

    # sanity check against pure-JAX reference (same bf16 matmul operands)
    x_hat_r, mu_r, logvar_r = vae_forward_ref(x, eps, params)
    assert x_hat.shape == (B, input_dim)
    assert mu.shape == (B, latent_dim, num_classes)
    assert logvar.shape == (B, latent_dim, num_classes)
    assert jnp.allclose(x_hat.astype(jnp.float32), x_hat_r, atol=2e-2)   # bf16 x_hat store
    assert jnp.allclose(mu, mu_r, atol=1e-2)
    assert jnp.allclose(logvar, logvar_r, atol=1e-2)

    print("KERNEL_OK")
</pallas_src>

<mosaic_0001>
module attributes {stable_mosaic.version = 11 : i64} {
  func.func @_vae_kernel(%arg0: i32, %arg1: memref<8x784xbf16, #tpu.memory_space<vmem>>, %arg2: memref<8x64xf32, #tpu.memory_space<vmem>>, %arg3: memref<784x512xbf16, #tpu.memory_space<vmem>>, %arg4: memref<1x512xf32, #tpu.memory_space<vmem>>, %arg5: memref<512x128xbf16, #tpu.memory_space<vmem>>, %arg6: memref<1x128xf32, #tpu.memory_space<vmem>>, %arg7: memref<64x512xbf16, #tpu.memory_space<vmem>>, %arg8: memref<1x512xf32, #tpu.memory_space<vmem>>, %arg9: memref<512x784xbf16, #tpu.memory_space<vmem>>, %arg10: memref<1x784xf32, #tpu.memory_space<vmem>>, %arg11: memref<8x784xbf16, #tpu.memory_space<vmem>>, %arg12: memref<8x128xf32, #tpu.memory_space<vmem>>) attributes {dimension_semantics = [#tpu.dimension_semantics<parallel>], iteration_bounds = array<i64: 1>, scalar_prefetch = 0 : i64, scratch_operands = 0 : i64, tpu.core_type = #tpu.core_type<tc>, window_params = [{transform_indices = @transform_0, window_bounds = array<i64: 8, 784>}, {transform_indices = @transform_1, window_bounds = array<i64: 8, 64>}, {pipeline_mode = #tpu.pipeline_mode<synchronous>, transform_indices = @transform_2, window_bounds = array<i64: 784, 512>}, {pipeline_mode = #tpu.pipeline_mode<synchronous>, transform_indices = @transform_3, window_bounds = array<i64: 1, 512>}, {pipeline_mode = #tpu.pipeline_mode<synchronous>, transform_indices = @transform_4, window_bounds = array<i64: 512, 128>}, {pipeline_mode = #tpu.pipeline_mode<synchronous>, transform_indices = @transform_5, window_bounds = array<i64: 1, 128>}, {pipeline_mode = #tpu.pipeline_mode<synchronous>, transform_indices = @transform_6, window_bounds = array<i64: 64, 512>}, {pipeline_mode = #tpu.pipeline_mode<synchronous>, transform_indices = @transform_7, window_bounds = array<i64: 1, 512>}, {pipeline_mode = #tpu.pipeline_mode<synchronous>, transform_indices = @transform_8, window_bounds = array<i64: 512, 784>}, {pipeline_mode = #tpu.pipeline_mode<synchronous>, transform_indices = @transform_9, window_bounds = array<i64: 1, 784>}, {transform_indices = @transform_10, window_bounds = array<i64: 8, 784>}, {transform_indices = @transform_11, window_bounds = array<i64: 8, 128>}]} {
    %c0 = arith.constant 0 : index
    %c0_0 = arith.constant 0 : index
    %0 = vector.load %arg1[%c0, %c0_0] : memref<8x784xbf16, #tpu.memory_space<vmem>>, vector<8x784xbf16>
    %c0_1 = arith.constant 0 : index
    %c0_2 = arith.constant 0 : index
    %1 = vector.load %arg3[%c0_1, %c0_2] : memref<784x512xbf16, #tpu.memory_space<vmem>>, vector<784x512xbf16>
    %cst = arith.constant dense<0.000000e+00> : vector<8x512xf32>
    %2 = tpu.matmul %0, %1, %cst {dimension_numbers = #tpu.dot_dimension_numbers<[1], [0], [0], [1], [0, 0, 1, 1], [], []>} : vector<8x784xbf16>, vector<784x512xbf16>, vector<8x512xf32> -> vector<8x512xf32>
    %c0_3 = arith.constant 0 : index
    %c0_4 = arith.constant 0 : index
    %3 = vector.load %arg4[%c0_3, %c0_4] : memref<1x512xf32, #tpu.memory_space<vmem>>, vector<1x512xf32>
    %4 = vector.broadcast %3 : vector<1x512xf32> to vector<8x512xf32>
    %5 = arith.addf %2, %4 : vector<8x512xf32>
    %cst_5 = arith.constant 0.000000e+00 : f32
    %6 = vector.broadcast %cst_5 : f32 to vector<8x512xf32>
    %7 = arith.maximumf %5, %6 : vector<8x512xf32>
    %8 = arith.truncf %7 : vector<8x512xf32> to vector<8x512xbf16>
    %c0_6 = arith.constant 0 : index
    %c0_7 = arith.constant 0 : index
    %9 = vector.load %arg5[%c0_6, %c0_7] : memref<512x128xbf16, #tpu.memory_space<vmem>>, vector<512x128xbf16>
    %cst_8 = arith.constant dense<0.000000e+00> : vector<8x128xf32>
    %10 = tpu.matmul %8, %9, %cst_8 {dimension_numbers = #tpu.dot_dimension_numbers<[1], [0], [0], [1], [0, 0, 1, 1], [], []>} : vector<8x512xbf16>, vector<512x128xbf16>, vector<8x128xf32> -> vector<8x128xf32>
    %c0_9 = arith.constant 0 : index
    %c0_10 = arith.constant 0 : index
    %11 = vector.load %arg6[%c0_9, %c0_10] : memref<1x128xf32, #tpu.memory_space<vmem>>, vector<1x128xf32>
    %12 = vector.broadcast %11 : vector<1x128xf32> to vector<8x128xf32>
    %13 = arith.addf %10, %12 : vector<8x128xf32>
    %14 = vector.extract_strided_slice %13 {offsets = [0, 0], sizes = [8, 64], strides = [1, 1]} : vector<8x128xf32> to vector<8x64xf32>
    %15 = vector.extract_strided_slice %13 {offsets = [0, 64], sizes = [8, 64], strides = [1, 1]} : vector<8x128xf32> to vector<8x64xf32>
    %cst_11 = arith.constant 5.000000e-01 : f32
    %16 = vector.broadcast %cst_11 : f32 to vector<8x64xf32>
    %17 = arith.mulf %16, %15 : vector<8x64xf32>
    %18 = math.exp %17 : vector<8x64xf32>
    %c0_12 = arith.constant 0 : index
    %c0_13 = arith.constant 0 : index
    %19 = vector.load %arg2[%c0_12, %c0_13] : memref<8x64xf32, #tpu.memory_space<vmem>>, vector<8x64xf32>
    %20 = arith.mulf %19, %18 : vector<8x64xf32>
    %21 = arith.addf %14, %20 : vector<8x64xf32>
    %22 = arith.truncf %21 : vector<8x64xf32> to vector<8x64xbf16>
    %c0_14 = arith.constant 0 : index
    %c0_15 = arith.constant 0 : index
    %23 = vector.load %arg7[%c0_14, %c0_15] : memref<64x512xbf16, #tpu.memory_space<vmem>>, vector<64x512xbf16>
    %cst_16 = arith.constant dense<0.000000e+00> : vector<8x512xf32>
    %24 = tpu.matmul %22, %23, %cst_16 {dimension_numbers = #tpu.dot_dimension_numbers<[1], [0], [0], [1], [0, 0, 1, 1], [], []>} : vector<8x64xbf16>, vector<64x512xbf16>, vector<8x512xf32> -> vector<8x512xf32>
    %c0_17 = arith.constant 0 : index
    %c0_18 = arith.constant 0 : index
    %25 = vector.load %arg8[%c0_17, %c0_18] : memref<1x512xf32, #tpu.memory_space<vmem>>, vector<1x512xf32>
    %26 = vector.broadcast %25 : vector<1x512xf32> to vector<8x512xf32>
    %27 = arith.addf %24, %26 : vector<8x512xf32>
    %cst_19 = arith.constant 0.000000e+00 : f32
    %28 = vector.broadcast %cst_19 : f32 to vector<8x512xf32>
    %29 = arith.maximumf %27, %28 : vector<8x512xf32>
    %30 = arith.truncf %29 : vector<8x512xf32> to vector<8x512xbf16>
    %c0_20 = arith.constant 0 : index
    %c0_21 = arith.constant 0 : index
    %31 = vector.load %arg9[%c0_20, %c0_21] : memref<512x784xbf16, #tpu.memory_space<vmem>>, vector<512x784xbf16>
    %cst_22 = arith.constant dense<0.000000e+00> : vector<8x784xf32>
    %32 = tpu.matmul %30, %31, %cst_22 {dimension_numbers = #tpu.dot_dimension_numbers<[1], [0], [0], [1], [0, 0, 1, 1], [], []>} : vector<8x512xbf16>, vector<512x784xbf16>, vector<8x784xf32> -> vector<8x784xf32>
    %c0_23 = arith.constant 0 : index
    %c0_24 = arith.constant 0 : index
    %33 = vector.load %arg10[%c0_23, %c0_24] : memref<1x784xf32, #tpu.memory_space<vmem>>, vector<1x784xf32>
    %34 = vector.broadcast %33 : vector<1x784xf32> to vector<8x784xf32>
    %35 = arith.addf %32, %34 : vector<8x784xf32>
    %36 = arith.negf %35 : vector<8x784xf32>
    %37 = math.exp %36 : vector<8x784xf32>
    %cst_25 = arith.constant 1.000000e+00 : f32
    %38 = vector.broadcast %cst_25 : f32 to vector<8x784xf32>
    %39 = arith.addf %38, %37 : vector<8x784xf32>
    %40 = arith.divf %38, %39 : vector<8x784xf32>
    %41 = arith.truncf %40 : vector<8x784xf32> to vector<8x784xbf16>
    %c0_26 = arith.constant 0 : index
    %c0_27 = arith.constant 0 : index
    %42 = vector.load %arg11[%c0_26, %c0_27] : memref<8x784xbf16, #tpu.memory_space<vmem>>, vector<8x784xbf16>
    tpu.vector_store %arg11[%c0_26, %c0_27], %41 {strides = array<i32>} : memref<8x784xbf16, #tpu.memory_space<vmem>>, vector<8x784xbf16>,
    %c0_28 = arith.constant 0 : index
    %c0_29 = arith.constant 0 : index
    %43 = vector.load %arg12[%c0_28, %c0_29] : memref<8x128xf32, #tpu.memory_space<vmem>>, vector<8x128xf32>
    tpu.vector_store %arg12[%c0_28, %c0_29], %13 {strides = array<i32>} : memref<8x128xf32, #tpu.memory_space<vmem>>, vector<8x128xf32>,
    return
  }
  func.func @transform_0(%arg0: i32) -> (i32, i32) {
    %c0_i32 = arith.constant 0 : i32
    %c0_i32_0 = arith.constant 0 : i32
    return %arg0, %c0_i32 : i32, i32
  }
  func.func @transform_1(%arg0: i32) -> (i32, i32) {
    %c0_i32 = arith.constant 0 : i32
    %c0_i32_0 = arith.constant 0 : i32
    return %arg0, %c0_i32 : i32, i32
  }
  func.func @transform_2(%arg0: i32) -> (i32, i32) {
    %c0_i32 = arith.constant 0 : i32
    %c0_i32_0 = arith.constant 0 : i32
    %c0_i32_1 = arith.constant 0 : i32
    return %c0_i32, %c0_i32_0 : i32, i32
  }
  func.func @transform_3(%arg0: i32) -> (i32, i32) {
    %c0_i32 = arith.constant 0 : i32
    %c0_i32_0 = arith.constant 0 : i32
    %c0_i32_1 = arith.constant 0 : i32
    return %c0_i32, %c0_i32_0 : i32, i32
  }
  func.func @transform_4(%arg0: i32) -> (i32, i32) {
    %c0_i32 = arith.constant 0 : i32
    %c0_i32_0 = arith.constant 0 : i32
    %c0_i32_1 = arith.constant 0 : i32
    return %c0_i32, %c0_i32_0 : i32, i32
  }
  func.func @transform_5(%arg0: i32) -> (i32, i32) {
    %c0_i32 = arith.constant 0 : i32
    %c0_i32_0 = arith.constant 0 : i32
    %c0_i32_1 = arith.constant 0 : i32
    return %c0_i32, %c0_i32_0 : i32, i32
  }
  func.func @transform_6(%arg0: i32) -> (i32, i32) {
    %c0_i32 = arith.constant 0 : i32
    %c0_i32_0 = arith.constant 0 : i32
    %c0_i32_1 = arith.constant 0 : i32
    return %c0_i32, %c0_i32_0 : i32, i32
  }
  func.func @transform_7(%arg0: i32) -> (i32, i32) {
    %c0_i32 = arith.constant 0 : i32
    %c0_i32_0 = arith.constant 0 : i32
    %c0_i32_1 = arith.constant 0 : i32
    return %c0_i32, %c0_i32_0 : i32, i32
  }
  func.func @transform_8(%arg0: i32) -> (i32, i32) {
    %c0_i32 = arith.constant 0 : i32
    %c0_i32_0 = arith.constant 0 : i32
    %c0_i32_1 = arith.constant 0 : i32
    return %c0_i32, %c0_i32_0 : i32, i32
  }
  func.func @transform_9(%arg0: i32) -> (i32, i32) {
    %c0_i32 = arith.constant 0 : i32
    %c0_i32_0 = arith.constant 0 : i32
    %c0_i32_1 = arith.constant 0 : i32
    return %c0_i32, %c0_i32_0 : i32, i32
  }
  func.func @transform_10(%arg0: i32) -> (i32, i32) {
    %c0_i32 = arith.constant 0 : i32
    %c0_i32_0 = arith.constant 0 : i32
    return %arg0, %c0_i32 : i32, i32
  }
  func.func @transform_11(%arg0: i32) -> (i32, i32) {
    %c0_i32 = arith.constant 0 : i32
    %c0_i32_0 = arith.constant 0 : i32
    return %arg0, %c0_i32 : i32, i32
  }
}

</mosaic_0001>

<bundles_post_ra>
// kernel: tpu_custom_call.1
= control target key start
LH: loop header
LB: loop body
LE: loop exit
PB: predicated region body
PF: predicated region fallthrough
CT: control target
= control target key end

     0   :  { %17 = vsyncpa [#allocation3], 0  ;;  %vm1254_vm0 = vcmask 130048   ;;  %s9474_s0 = inlined_call_operand.vmem [shape: bf16[8,784], index: 0, kind: input, shape index: {}]   ;;  %s9475_s1 = inlined_call_operand.vmem [shape: f32[8,64], index: 1, kind: input, shape index: {}]   ;;  %s9476_s2 = inlined_call_operand.vmem [shape: bf16[784,512], index: 2, kind: input, shape index: {}]   ;;  %s9477_s3 = inlined_call_operand.vmem [shape: f32[1,512], index: 3, kind: input, shape index: {}]   ;;  %s9478_s4 = inlined_call_operand.vmem [shape: bf16[512,128], index: 4, kind: input, shape index: {}]   ;;  %s9479_s5 = inlined_call_operand.vmem [shape: f32[1,128], index: 5, kind: input, shape index: {}]   ;;  %s9480_s6 = inlined_call_operand.vmem [shape: bf16[64,512], index: 6, kind: input, shape index: {}]   ;;  %s9481_s7 = inlined_call_operand.vmem [shape: f32[1,512], index: 7, kind: input, shape index: {}]   ;;  %s9482_s8 = inlined_call_operand.vmem [shape: bf16[512,784], index: 8, kind: input, shape index: {}]   ;;  %s9483_s9 = inlined_call_operand.vmem [shape: f32[1,784], index: 9, kind: input, shape index: {}]   ;;  %s9484_s10 = inlined_call_operand.hbm [shape: bf16[8,784], index: 10, kind: output, shape index: {0}]   ;;  %s9485_s11 = inlined_call_operand.hbm [shape: f32[8,128], index: 11, kind: output, shape index: {1}]  }
   0x1   :  { %v4200_v0 = vld [vmem:[%s9476_s2 + $0xe0] sm:$0xf]  ;;  %v6003_v1 = vld [vmem:[%s9476_s2 + $0xec] sm:$0xf0] }
   0x2   :  { %v4328_v2 = vld [vmem:[%s9476_s2 + $0x1e0] sm:$0xf]  ;;  %v4201_v3 = vor.u32 %v6003_v1, %v4200_v0  ;;  %v6035_v4 = vld [vmem:[%s9476_s2 + $0x1ec] sm:$0xf0] }
   0x3   :  { %v4456_v5 = vld [vmem:[%s9476_s2 + $0x2e0] sm:$0xf]  ;;  %v6067_v6 = vld [vmem:[%s9476_s2 + $0x2ec] sm:$0xf0]  ;;  %v4329_v7 = vor.u32 %v6035_v4, %v4328_v2 }
   0x4   :  { %v4457_v8 = vor.u32 %v6067_v6, %v4456_v5  ;;  %v4584_v9 = vld [vmem:[%s9476_s2 + $0x3e0] sm:$0xf]  ;;  %v6099_v10 = vld [vmem:[%s9476_s2 + $0x3ec] sm:$0xf0]  ;;  %1258 = vmatpush.bf16.msra.mxu0 %v4201_v3 }
   0x5   :  { %v4184_v11 = vld [vmem:[%s9476_s2 + $0xc0] sm:$0xf]  ;;  %v4585_v12 = vor.u32 %v6099_v10, %v4584_v9  ;;  %v5999_v13 = vld [vmem:[%s9476_s2 + $0xcc] sm:$0xf0]  ;;  %1271 = vmatpush.bf16.msra.mxu1 %v4329_v7 }
   0x6   :  { %v4312_v14 = vld [vmem:[%s9476_s2 + $0x1c0] sm:$0xf]  ;;  %v6031_v15 = vld [vmem:[%s9476_s2 + $0x1cc] sm:$0xf0]  ;;  %1284 = vmatpush.bf16.msra.mxu2 %v4457_v8  ;;  %v4185_v16 = vor.u32 %v5999_v13, %v4184_v11 }
   0x7   :  { %v4313_v17 = vor.u32 %v6031_v15, %v4312_v14  ;;  %v4440_v18 = vld [vmem:[%s9476_s2 + $0x2c0] sm:$0xf]  ;;  %v6063_v19 = vld [vmem:[%s9476_s2 + $0x2cc] sm:$0xf0]  ;;  %1297 = vmatpush.bf16.msra.mxu3 %v4585_v12 }
   0x8   :  { %v4568_v20 = vld [vmem:[%s9476_s2 + $0x3c0] sm:$0xf]  ;;  %v4441_v21 = vor.u32 %v6063_v19, %v4440_v18  ;;  %v6095_v22 = vld [vmem:[%s9476_s2 + $0x3cc] sm:$0xf0]  ;;  %1259 = vmatpush.bf16.msra.mxu0 %v4185_v16 }
   0x9   :  { %v4168_v23 = vld [vmem:[%s9476_s2 + $0xa0] sm:$0xf]  ;;  %v5995_v24 = vld [vmem:[%s9476_s2 + $0xac] sm:$0xf0]  ;;  %v4569_v25 = vor.u32 %v6095_v22, %v4568_v20  ;;  %1272 = vmatpush.bf16.msra.mxu1 %v4313_v17 }
   0xa   :  { %v4296_v26 = vld [vmem:[%s9476_s2 + $0x1a0] sm:$0xf]  ;;  %v6027_v27 = vld [vmem:[%s9476_s2 + $0x1ac] sm:$0xf0]  ;;  %v4169_v29 = vor.u32 %v5995_v24, %v4168_v23  ;;  %1285 = vmatpush.bf16.msra.mxu2 %v4441_v21 }
   0xb   :  { %v4424_v28 = vld [vmem:[%s9476_s2 + $0x2a0] sm:$0xf]  ;;  %v6059_v30 = vld [vmem:[%s9476_s2 + $0x2ac] sm:$0xf0]  ;;  %v4297_v33 = vor.u32 %v6027_v27, %v4296_v26  ;;  %1298 = vmatpush.bf16.msra.mxu3 %v4569_v25  ;;  %v41_v25 = vld [vmem:[%s9474_s0 + $0x8] sm:$0xff] }
   0xc   :  { %v4552_v31 = vld [vmem:[%s9476_s2 + $0x3a0] sm:$0xf]  ;;  %v6091_v32 = vld [vmem:[%s9476_s2 + $0x3ac] sm:$0xf0]  ;;  %v4425_v34 = vor.u32 %v6059_v30, %v4424_v28  ;;  %1260 = vmatpush.bf16.msra.mxu0 %v4169_v29 }
   0xd   :  { %v4152_v35 = vld [vmem:[%s9476_s2 + $0x80] sm:$0xf]  ;;  %v5991_v36 = vld [vmem:[%s9476_s2 + $0x8c] sm:$0xf0]  ;;  %v4553_v38 = vor.u32 %v6091_v32, %v4552_v31  ;;  %1273 = vmatpush.bf16.msra.mxu1 %v4297_v33 }
   0xe   :  { %v4280_v37 = vld [vmem:[%s9476_s2 + $0x180] sm:$0xf]  ;;  %v6023_v39 = vld [vmem:[%s9476_s2 + $0x18c] sm:$0xf0]  ;;  %v4153_v44 = vor.u32 %v5991_v36, %v4152_v35  ;;  %1286 = vmatpush.bf16.msra.mxu2 %v4425_v34  ;;  %v6001_v34 = vld [vmem:[%s9476_s2 + $0xe4] sm:$0xf]  ;;  %v256_v36 = vunpack.c.l.b16 %v41_v25 }
   0xf   :  { %v4408_v40 = vld [vmem:[%s9476_s2 + $0x280] sm:$0xf]  ;;  %v6055_v41 = vld [vmem:[%s9476_s2 + $0x28c] sm:$0xf0]  ;;  %v4281_v45 = vor.u32 %v6023_v39, %v4280_v37  ;;  %1299 = vmatpush.bf16.msra.mxu3 %v4553_v38  ;;  %v4202_v35 = vld [vmem:[%s9476_s2 + $0xf0] sm:$0xf0] }
  0x10   :  { %v4536_v42 = vld [vmem:[%s9476_s2 + $0x380] sm:$0xf]  ;;  %v6087_v43 = vld [vmem:[%s9476_s2 + $0x38c] sm:$0xf0]  ;;  %v4409_v46 = vor.u32 %v6055_v41, %v4408_v40  ;;  %1261 = vmatpush.bf16.msra.mxu0 %v4153_v44 }
  0x11   :  { %v4136_v47 = vld [vmem:[%s9476_s2 + $0x60] sm:$0xf]  ;;  %v5987_v48 = vld [vmem:[%s9476_s2 + $0x6c] sm:$0xf0]  ;;  %v4537_v50 = vor.u32 %v6087_v43, %v4536_v42  ;;  %1274 = vmatpush.bf16.msra.mxu1 %v4281_v45  ;;  %v257_v42 = vunpack.c.h.b16 %v41_v25  ;;  %v6021_v25 = vld [vmem:[%s9476_s2 + $0x184] sm:$0xf] }
  0x12   :  { %v4264_v49 = vld [vmem:[%s9476_s2 + $0x160] sm:$0xf]  ;;  %v6019_v51 = vld [vmem:[%s9476_s2 + $0x16c] sm:$0xf0]  ;;  %v4137_v56 = vor.u32 %v5987_v48, %v4136_v47  ;;  %1287 = vmatpush.bf16.msra.mxu2 %v4409_v46  ;;  %v6033_v46 = vld [vmem:[%s9476_s2 + $0x1e4] sm:$0xf] }
  0x13   :  { %v4392_v52 = vld [vmem:[%s9476_s2 + $0x260] sm:$0xf]  ;;  %v6051_v53 = vld [vmem:[%s9476_s2 + $0x26c] sm:$0xf0]  ;;  %v4265_v57 = vor.u32 %v6019_v51, %v4264_v49  ;;  %1300 = vmatpush.bf16.msra.mxu3 %v4537_v50  ;;  %v4330_v47 = vld [vmem:[%s9476_s2 + $0x1f0] sm:$0xf0]  ;;  %v4205_v49 = vor.u32 %v6001_v34, %v4202_v35 }
  0x14   :  { %v4520_v54 = vld [vmem:[%s9476_s2 + $0x360] sm:$0xf]  ;;  %v6083_v55 = vld [vmem:[%s9476_s2 + $0x36c] sm:$0xf0]  ;;  %v4393_v58 = vor.u32 %v6051_v53, %v4392_v52  ;;  %1262 = vmatpush.bf16.msra.mxu0 %v4137_v56  ;;  %v6827_v53 = vpack.c.b16 %v256_v36, %v256_v36  ;;  %v4186_v56 = vld [vmem:[%s9476_s2 + $0xd0] sm:$0xf0] }
  0x15   :  { %v4120_v59 = vld [vmem:[%s9476_s2 + $0x40] sm:$0xf]  ;;  %v5983_v60 = vld [vmem:[%s9476_s2 + $0x4c] sm:$0xf0]  ;;  %v4521_v62 = vor.u32 %v6083_v55, %v4520_v54  ;;  %1275 = vmatpush.bf16.msra.mxu1 %v4265_v57  ;;  %v5997_v55 = vld [vmem:[%s9476_s2 + $0xc4] sm:$0xf] }
  0x16   :  { %v4248_v61 = vld [vmem:[%s9476_s2 + $0x140] sm:$0xf]  ;;  %v6015_v63 = vld [vmem:[%s9476_s2 + $0x14c] sm:$0xf0]  ;;  %v4121_v4 = vor.u32 %v5983_v60, %v4120_v59  ;;  %1288 = vmatpush.bf16.msra.mxu2 %v4393_v58  ;;  %v6840_v60 = vpack.c.b16 %v257_v42, %v257_v42  ;;  %v4138_v34 = vld [vmem:[%s9476_s2 + $0x70] sm:$0xf0] }
  0x17   :  { %v4376_v0 = vld [vmem:[%s9476_s2 + $0x240] sm:$0xf]  ;;  %v6047_v1 = vld [vmem:[%s9476_s2 + $0x24c] sm:$0xf0]  ;;  %v4249_v5 = vor.u32 %v6015_v63, %v4248_v61  ;;  %1301 = vmatpush.bf16.msra.mxu3 %v4521_v62  ;;  %v4333_v61 = vor.u32 %v6033_v46, %v4330_v47  ;;  %v6029_v63 = vld [vmem:[%s9476_s2 + $0x1c4] sm:$0xf] }
  0x18   :  { %v4504_v2 = vld [vmem:[%s9476_s2 + $0x340] sm:$0xf]  ;;  %v6079_v3 = vld [vmem:[%s9476_s2 + $0x34c] sm:$0xf0]  ;;  %v4377_v6 = vor.u32 %v6047_v1, %v4376_v0  ;;  %1263 = vmatpush.bf16.msra.mxu0 %v4121_v4  ;;  %v4314_v0 = vld [vmem:[%s9476_s2 + $0x1d0] sm:$0xf0] }
  0x19   :  { %v4104_v7 = vld [vmem:[%s9476_s2 + $0x20] sm:$0xf]  ;;  %v5979_v8 = vld [vmem:[%s9476_s2 + $0x2c] sm:$0xf0]  ;;  %v4505_v10 = vor.u32 %v6079_v3, %v4504_v2  ;;  %1276 = vmatpush.bf16.msra.mxu1 %v4249_v5  ;;  %v4189_v2 = vor.u32 %v5997_v55, %v4186_v56  ;;  %v5981_v46 = vld [vmem:[%s9476_s2 + $0x44] sm:$0xf] }
  0x1a   :  { %v4232_v9 = vld [vmem:[%s9476_s2 + $0x120] sm:$0xf]  ;;  %v6011_v11 = vld [vmem:[%s9476_s2 + $0x12c] sm:$0xf0]  ;;  %v4105_v17 = vor.u32 %v5979_v8, %v4104_v7  ;;  %1289 = vmatpush.bf16.msra.mxu2 %v4377_v6  ;;  %v5993_v7 = vld [vmem:[%s9476_s2 + $0xa4] sm:$0xf] }
  0x1b   :  { %v4360_v12 = vld [vmem:[%s9476_s2 + $0x220] sm:$0xf]  ;;  %v6043_v13 = vld [vmem:[%s9476_s2 + $0x22c] sm:$0xf0]  ;;  %v4233_v21 = vor.u32 %v6011_v11, %v4232_v9  ;;  %1302 = vmatpush.bf16.msra.mxu3 %v4505_v10  ;;  %v4170_v8 = vld [vmem:[%s9476_s2 + $0xb0] sm:$0xf0]  ;;  %v4317_v10 = vor.u32 %v6029_v63, %v4314_v0 }
  0x1c   :  { %v4488_v14 = vld [vmem:[%s9476_s2 + $0x320] sm:$0xf]  ;;  %v6075_v15 = vld [vmem:[%s9476_s2 + $0x32c] sm:$0xf0]  ;;  %v4361_v22 = vor.u32 %v6043_v13, %v4360_v12  ;;  %1264 = vmatpush.bf16.msra.mxu0 %v4105_v17  ;;  %v6025_v12 = vld [vmem:[%s9476_s2 + $0x1a4] sm:$0xf] }
  0x1d   :  { %v4088_v16 = vld [vmem:[%s9476_s2] sm:$0xf]  ;;  %v5975_v18 = vld [vmem:[%s9476_s2 + $0xc] sm:$0xf0]  ;;  %v4489_v26 = vor.u32 %v6075_v15, %v4488_v14  ;;  %1277 = vmatpush.bf16.msra.mxu1 %v4233_v21  ;;  %v4298_v13 = vld [vmem:[%s9476_s2 + $0x1b0] sm:$0xf0]  ;;  %v4173_v15 = vor.u32 %v5993_v7, %v4170_v8 }
  0x1e   :  { %v4216_v19 = vld [vmem:[%s9476_s2 + $0x100] sm:$0xf]  ;;  %v6007_v20 = vld [vmem:[%s9476_s2 + $0x10c] sm:$0xf0]  ;;  %v4089_v33 = vor.u32 %v5975_v18, %v4088_v16  ;;  %1290 = vmatpush.bf16.msra.mxu2 %v4361_v22  ;;  %v4154_v21 = vld [vmem:[%s9476_s2 + $0x90] sm:$0xf0] }
  0x1f   :  { %v4344_v23 = vld [vmem:[%s9476_s2 + $0x200] sm:$0xf]  ;;  %v6039_v24 = vld [vmem:[%s9476_s2 + $0x20c] sm:$0xf0]  ;;  %v4217_v38 = vor.u32 %v6007_v20, %v4216_v19  ;;  %1303 = vmatpush.bf16.msra.mxu3 %v4489_v26  ;;  %v5989_v20 = vld [vmem:[%s9476_s2 + $0x84] sm:$0xf] }
  0x20   :  { %v4472_v27 = vld [vmem:[%s9476_s2 + $0x300] sm:$0xf]  ;;  %v6071_v28 = vld [vmem:[%s9476_s2 + $0x30c] sm:$0xf0]  ;;  %v4345_v39 = vor.u32 %v6039_v24, %v4344_v23  ;;  %1265 = vmatpush.bf16.msra.mxu0 %v4089_v33  ;;  %v43_v22 = vld [vmem:[%s9474_s0 + $0x18] sm:$0xf]  ;;  %v4301_v23 = vor.u32 %v6025_v12, %v4298_v13 }
  0x21   :  { %v4712_v29 = vld [vmem:[%s9476_s2 + $0x4e0] sm:$0xf]  ;;  %v6131_v30 = vld [vmem:[%s9476_s2 + $0x4ec] sm:$0xf0]  ;;  %v4473_v43 = vor.u32 %v6071_v28, %v4472_v27  ;;  %1278 = vmatpush.bf16.msra.mxu1 %v4217_v38  ;;  %v4282_v26 = vld [vmem:[%s9476_s2 + $0x190] sm:$0xf0]  ;;  %v4157_v28 = vor.u32 %v5989_v20, %v4154_v21  ;;  %v260_v35 = vunpack.c.l.b16 %v43_v22 }
  0x22   :  { %v4840_v31 = vld [vmem:[%s9476_s2 + $0x5e0] sm:$0xf]  ;;  %v6163_v32 = vld [vmem:[%s9476_s2 + $0x5ec] sm:$0xf0]  ;;  %v4713_v44 = vor.u32 %v6131_v30, %v4712_v29  ;;  %1291 = vmatpush.bf16.msra.mxu2 %v4345_v39  ;;  %v5985_v33 = vld [vmem:[%s9476_s2 + $0x64] sm:$0xf]  ;;  %v4285_v36 = vor.u32 %v6021_v25, %v4282_v26 }
  0x23   :  { %v40_v37 = vld [vmem:[%s9474_s0] sm:$0xff]  ;;  %v6167_v45 = vld [vmem:[%s9476_s2 + $0x60c] sm:$0xf0]  ;;  %v4841_v48 = vor.u32 %v6163_v32, %v4840_v31  ;;  %1304 = vmatpush.bf16.msra.mxu3 %v4473_v43  ;;  %v4266_v39 = vld [vmem:[%s9476_s2 + $0x170] sm:$0xf0] }
  0x24   :  { %v4856_v40 = vld [vmem:[%s9476_s2 + $0x600] sm:$0xf]  ;;  %v254_v41 = vunpack.c.l.b16 %v40_v37  ;;  %v6127_v51 = vld [vmem:[%s9476_s2 + $0x4cc] sm:$0xf0]  ;;  %v255_v58 = vunpack.c.h.b16 %v40_v37  ;;  %1310 = vmatpush.bf16.msrb.mxu0 %v4713_v44  ;;  %v6017_v38 = vld [vmem:[%s9476_s2 + $0x164] sm:$0xf] }
  0x25   :  { %v4696_v50 = vld [vmem:[%s9476_s2 + $0x4c0] sm:$0xf]  ;;  %v6159_v54 = vld [vmem:[%s9476_s2 + $0x5cc] sm:$0xf0]  ;;  %v4857_v59 = vor.u32 %v6167_v45, %v4856_v40  ;;  %1323 = vmatpush.bf16.msrb.mxu1 %v4841_v48  ;;  %1292 = vmatmul.bf16.vlgmr.msra.gmra.mxu2 %v6827_v53  ;;  %v4122_v47 = vld [vmem:[%s9476_s2 + $0x50] sm:$0xf0]  ;;  %v6947_v48 = vpack.c.b16 %v260_v35, %v260_v35 }
  0x26   :  { %v4824_v52 = vld [vmem:[%s9476_s2 + $0x5c0] sm:$0xf]  ;;  %v6838_v57 = vpack.c.b16 %v254_v41, %v254_v41  ;;  %v4697_v62 = vor.u32 %v6127_v51, %v4696_v50  ;;  %v6123_v4 = vld [vmem:[%s9476_s2 + $0x4ac] sm:$0xf0]  ;;  %v6868_v9 = vpack.c.b16 %v255_v58, %v255_v58  ;;  %1305 = vmatmul.bf16.vlgmr.msra.gmra.mxu3 %v6840_v60  ;;  %v4141_v41 = vor.u32 %v5985_v33, %v4138_v34  ;;  %v6013_v51 = vld [vmem:[%s9476_s2 + $0x144] sm:$0xf] }
  0x27   :  { %1349 = vmatpush.bf16.msrb.mxu3 %v4205_v49  ;;  %v4825_v1 = vor.u32 %v6159_v54, %v4824_v52  ;;  %v4680_v3 = vld [vmem:[%s9476_s2 + $0x4a0] sm:$0xf]  ;;  %v6155_v6 = vld [vmem:[%s9476_s2 + $0x5ac] sm:$0xf0]  ;;  %1343 = vmatpush.bf16.msrb.mxu2 %v4857_v59  ;;  %v4269_v49 = vor.u32 %v6017_v38, %v4266_v39  ;;  %v4250_v52 = vld [vmem:[%s9476_s2 + $0x150] sm:$0xf0]  ;;  %v4125_v55 = vor.u32 %v5981_v46, %v4122_v47 }
  0x28   :  { %v4808_v5 = vld [vmem:[%s9476_s2 + $0x5a0] sm:$0xf]  ;;  %1266 = vmatmul.bf16.vlgmr.msra.gmra.mxu0 %v6838_v57  ;;  %v4681_v11 = vor.u32 %v6123_v4, %v4680_v3  ;;  %v6119_v17 = vld [vmem:[%s9476_s2 + $0x48c] sm:$0xf0]  ;;  %1279 = vmatmul.bf16.vlgmr.msra.gmra.mxu1 %v6868_v9  ;;  %v4106_v63 = vld [vmem:[%s9476_s2 + $0x30] sm:$0xf0] }
  0x29   :  { %1311 = vmatpush.bf16.msrb.mxu0 %v4697_v62  ;;  %1324 = vmatpush.bf16.msrb.mxu1 %v4825_v1  ;;  %v4809_v14 = vor.u32 %v6155_v6, %v4808_v5  ;;  %v4664_v16 = vld [vmem:[%s9476_s2 + $0x480] sm:$0xf]  ;;  %v6151_v19 = vld [vmem:[%s9476_s2 + $0x58c] sm:$0xf0]  ;;  %v5977_v62 = vld [vmem:[%s9476_s2 + $0x24] sm:$0xf]  ;;  %v4253_v1 = vor.u32 %v6013_v51, %v4250_v52 }
  0x2a   :  { %v4792_v18 = vld [vmem:[%s9476_s2 + $0x580] sm:$0xf]  ;;  %v4665_v24 = vor.u32 %v6119_v17, %v4664_v16  ;;  %v6115_v30 = vld [vmem:[%s9476_s2 + $0x46c] sm:$0xf0]  ;;  %v6009_v0 = vld [vmem:[%s9476_s2 + $0x124] sm:$0xf]  ;;  %v4109_v7 = vor.u32 %v5977_v62, %v4106_v63 }
  0x2b   :  { %1362 = vmatpush.bf16.msra.mxu2 %v4333_v61  ;;  %1350 = vmatpush.bf16.msrb.mxu3 %v4189_v2  ;;  %v4793_v27 = vor.u32 %v6151_v19, %v4792_v18  ;;  %v4648_v29 = vld [vmem:[%s9476_s2 + $0x460] sm:$0xf]  ;;  %v6147_v32 = vld [vmem:[%s9476_s2 + $0x56c] sm:$0xf0]  ;;  %v4234_v3 = vld [vmem:[%s9476_s2 + $0x130] sm:$0xf0] }
  0x2c   :  { %v4776_v31 = vld [vmem:[%s9476_s2 + $0x560] sm:$0xf]  ;;  %v4649_v37 = vor.u32 %v6115_v30, %v4648_v29  ;;  %v6111_v43 = vld [vmem:[%s9476_s2 + $0x44c] sm:$0xf0]  ;;  %v5973_v12 = vld [vmem:[%s9476_s2 + $0x4] sm:$0xf]  ;;  %v4237_v19 = vor.u32 %v6009_v0, %v4234_v3 }
  0x2d   :  { %1312 = vmatpush.bf16.msrb.mxu0 %v4681_v11  ;;  %1325 = vmatpush.bf16.msrb.mxu1 %v4809_v14  ;;  %v4777_v40 = vor.u32 %v6147_v32, %v4776_v31  ;;  %v4632_v42 = vld [vmem:[%s9476_s2 + $0x440] sm:$0xf]  ;;  %v6143_v45 = vld [vmem:[%s9476_s2 + $0x54c] sm:$0xf0]  ;;  %v4090_v13 = vld [vmem:[%s9476_s2 + $0x10] sm:$0xf0] }
  0x2e   :  { %v4760_v44 = vld [vmem:[%s9476_s2 + $0x540] sm:$0xf]  ;;  %v4633_v50 = vor.u32 %v6111_v43, %v4632_v42  ;;  %v6107_v58 = vld [vmem:[%s9476_s2 + $0x42c] sm:$0xf0]  ;;  %v6065_v14 = vld [vmem:[%s9476_s2 + $0x2e4] sm:$0xf]  ;;  %v4093_v25 = vor.u32 %v5973_v12, %v4090_v13 }
  0x2f   :  { %1363 = vmatpush.bf16.msra.mxu2 %v4317_v10  ;;  %1351 = vmatpush.bf16.msrb.mxu3 %v4173_v15  ;;  %v4761_v54 = vor.u32 %v6143_v45, %v4760_v44  ;;  %v4616_v56 = vld [vmem:[%s9476_s2 + $0x420] sm:$0xf]  ;;  %v6139_v61 = vld [vmem:[%s9476_s2 + $0x52c] sm:$0xf0]  ;;  %v4458_v15 = vld [vmem:[%s9476_s2 + $0x2f0] sm:$0xf0] }
  0x30   :  { %v4744_v59 = vld [vmem:[%s9476_s2 + $0x520] sm:$0xf]  ;;  %v4617_v2 = vor.u32 %v6107_v58, %v4616_v56  ;;  %v42_v5 = vld [vmem:[%s9474_s0 + $0x10] sm:$0xff]  ;;  %v6097_v16 = vld [vmem:[%s9476_s2 + $0x3e4] sm:$0xf] }
  0x31   :  { %1313 = vmatpush.bf16.msrb.mxu0 %v4665_v24  ;;  %1326 = vmatpush.bf16.msrb.mxu1 %v4793_v27  ;;  %v4600_v4 = vld [vmem:[%s9476_s2 + $0x400] sm:$0xf]  ;;  %v4745_v6 = vor.u32 %v6139_v61, %v4744_v59  ;;  %v6103_v8 = vld [vmem:[%s9476_s2 + $0x40c] sm:$0xf0]  ;;  %v4586_v17 = vld [vmem:[%s9476_s2 + $0x3f0] sm:$0xf0]  ;;  %v258_v18 = vunpack.c.l.b16 %v42_v5 }
  0x32   :  { %v4728_v10 = vld [vmem:[%s9476_s2 + $0x500] sm:$0xf]  ;;  %v6135_v11 = vld [vmem:[%s9476_s2 + $0x50c] sm:$0xf0]  ;;  %v4601_v20 = vor.u32 %v6103_v8, %v4600_v4  ;;  %v6129_v21 = vld [vmem:[%s9476_s2 + $0x4e4] sm:$0xf]  ;;  %v4589_v29 = vor.u32 %v6097_v16, %v4586_v17 }
  0x33   :  { %1364 = vmatpush.bf16.msra.mxu2 %v4301_v23  ;;  %1352 = vmatpush.bf16.msrb.mxu3 %v4157_v28  ;;  %v4714_v22 = vld [vmem:[%s9476_s2 + $0x4f0] sm:$0xf0]  ;;  %v259_v23 = vunpack.c.h.b16 %v42_v5  ;;  %v4729_v24 = vor.u32 %v6135_v11, %v4728_v10  ;;  %v6005_v26 = vld [vmem:[%s9476_s2 + $0x104] sm:$0xf]  ;;  %v4461_v28 = vor.u32 %v6065_v14, %v4458_v15  ;;  %v7035_v34 = vpack.c.b16 %v258_v18, %v258_v18 }
  0x34   :  { %v4218_v27 = vld [vmem:[%s9476_s2 + $0x110] sm:$0xf0]  ;;  %v6161_v30 = vld [vmem:[%s9476_s2 + $0x5e4] sm:$0xf]  ;;  %v4717_v33 = vor.u32 %v6129_v21, %v4714_v22 }
  0x35   :  { %1314 = vmatpush.bf16.msrb.mxu0 %v4649_v37  ;;  %1327 = vmatpush.bf16.msrb.mxu1 %v4777_v40  ;;  %v4842_v31 = vld [vmem:[%s9476_s2 + $0x5f0] sm:$0xf0]  ;;  %v6061_v32 = vld [vmem:[%s9476_s2 + $0x2c4] sm:$0xf]  ;;  %v4221_v38 = vor.u32 %v6005_v26, %v4218_v27  ;;  %v7046_v39 = vpack.c.b16 %v259_v23, %v259_v23 }
  0x36   :  { %4870 = vmatmul.msk.bf16.vlgmr.msrb.gmra.mxu2 %vm1254_vm0, %v6947_v48  ;;  %v4442_v35 = vld [vmem:[%s9476_s2 + $0x2d0] sm:$0xf0]  ;;  %v6125_v40 = vld [vmem:[%s9476_s2 + $0x4c4] sm:$0xf]  ;;  %v4845_v42 = vor.u32 %v6161_v30, %v4842_v31 }
  0x37   :  { %1365 = vmatpush.bf16.msra.mxu2 %v4285_v36  ;;  %1353 = vmatpush.bf16.msrb.mxu3 %v4141_v41  ;;  %v6093_v36 = vld [vmem:[%s9476_s2 + $0x3c4] sm:$0xf]  ;;  %v4570_v37 = vld [vmem:[%s9476_s2 + $0x3d0] sm:$0xf0]  ;;  %v4445_v43 = vor.u32 %v6061_v32, %v4442_v35 }
  0x38   :  { %v4698_v41 = vld [vmem:[%s9476_s2 + $0x4d0] sm:$0xf0]  ;;  %v4573_v44 = vor.u32 %v6093_v36, %v4570_v37  ;;  %v6157_v45 = vld [vmem:[%s9476_s2 + $0x5c4] sm:$0xf] }
  0x39   :  { %1315 = vmatpush.bf16.msrb.mxu0 %v4633_v50  ;;  %1328 = vmatpush.bf16.msrb.mxu1 %v4761_v54  ;;  %v4826_v46 = vld [vmem:[%s9476_s2 + $0x5d0] sm:$0xf0]  ;;  %v6057_v47 = vld [vmem:[%s9476_s2 + $0x2a4] sm:$0xf] }
  0x3a   :  { %v4426_v50 = vld [vmem:[%s9476_s2 + $0x2b0] sm:$0xf0]  ;;  %v6089_v51 = vld [vmem:[%s9476_s2 + $0x3a4] sm:$0xf]  ;;  %v4829_v56 = vor.u32 %v6157_v45, %v4826_v46 }
  0x3b   :  { %1366 = vmatpush.bf16.msra.mxu2 %v4269_v49  ;;  %1354 = vmatpush.bf16.msrb.mxu3 %v4125_v55  ;;  %v4701_v49 = vor.u32 %v6125_v40, %v4698_v41  ;;  %v4554_v52 = vld [vmem:[%s9476_s2 + $0x3b0] sm:$0xf0]  ;;  %v6121_v54 = vld [vmem:[%s9476_s2 + $0x4a4] sm:$0xf]  ;;  %v4429_v58 = vor.u32 %v6057_v47, %v4426_v50 }
  0x3c   :  { %v4682_v55 = vld [vmem:[%s9476_s2 + $0x4b0] sm:$0xf0]  ;;  %v4557_v59 = vor.u32 %v6089_v51, %v4554_v52  ;;  %v6153_v61 = vld [vmem:[%s9476_s2 + $0x5a4] sm:$0xf] }
  0x3d   :  { %1316 = vmatpush.bf16.msrb.mxu0 %v4617_v2  ;;  %1329 = vmatpush.bf16.msrb.mxu1 %v4745_v6  ;;  %v4810_v62 = vld [vmem:[%s9476_s2 + $0x5b0] sm:$0xf0]  ;;  %v6053_v63 = vld [vmem:[%s9476_s2 + $0x284] sm:$0xf]  ;;  %v4685_v0 = vor.u32 %v6121_v54, %v4682_v55 }
  0x3e   :  { %v6085_v2 = vld [vmem:[%s9476_s2 + $0x384] sm:$0xf]  ;;  %v4538_v3 = vld [vmem:[%s9476_s2 + $0x390] sm:$0xf0]  ;;  %v4813_v6 = vor.u32 %v6153_v61, %v4810_v62 }
  0x3f   :  { %1367 = vmatpush.bf16.msra.mxu2 %v4253_v1  ;;  %1355 = vmatpush.bf16.msrb.mxu3 %v4109_v7  ;;  %v4410_v1 = vld [vmem:[%s9476_s2 + $0x290] sm:$0xf0]  ;;  %v6117_v4 = vld [vmem:[%s9476_s2 + $0x484] sm:$0xf]  ;;  %v4541_v8 = vor.u32 %v6085_v2, %v4538_v3 }
  0x40   :  { %v4666_v5 = vld [vmem:[%s9476_s2 + $0x490] sm:$0xf0]  ;;  %v4413_v7 = vor.u32 %v6053_v63, %v4410_v1  ;;  %v6149_v10 = vld [vmem:[%s9476_s2 + $0x584] sm:$0xf] }
  0x41   :  { %1317 = vmatpush.bf16.msrb.mxu0 %v4601_v20  ;;  %1330 = vmatpush.bf16.msrb.mxu1 %v4729_v24  ;;  %v4794_v11 = vld [vmem:[%s9476_s2 + $0x590] sm:$0xf0]  ;;  %v6049_v12 = vld [vmem:[%s9476_s2 + $0x264] sm:$0xf]  ;;  %v4669_v13 = vor.u32 %v6117_v4, %v4666_v5 }
  0x42   :  { %v4394_v14 = vld [vmem:[%s9476_s2 + $0x270] sm:$0xf0]  ;;  %v6081_v15 = vld [vmem:[%s9476_s2 + $0x364] sm:$0xf] }
  0x43   :  { %1368 = vmatpush.bf16.msra.mxu2 %v4237_v19  ;;  %1356 = vmatpush.bf16.msrb.mxu3 %v4093_v25  ;;  %v4522_v16 = vld [vmem:[%s9476_s2 + $0x370] sm:$0xf0]  ;;  %v6113_v17 = vld [vmem:[%s9476_s2 + $0x464] sm:$0xf]  ;;  %v4797_v19 = vor.u32 %v6149_v10, %v4794_v11  ;;  %v4397_v20 = vor.u32 %v6049_v12, %v4394_v14 }
  0x44   :  { %1318 = vmatmul.bf16.vlgmr.msrb.gmra.mxu0 %v7035_v34  ;;  %1331 = vmatmul.bf16.vlgmr.msrb.gmra.mxu1 %v7046_v39  ;;  %v4650_v18 = vld [vmem:[%s9476_s2 + $0x470] sm:$0xf0]  ;;  %v4525_v21 = vor.u32 %v6081_v15, %v4522_v16  ;;  %v6145_v22 = vld [vmem:[%s9476_s2 + $0x564] sm:$0xf] }
  0x45   :  { %1375 = vmatpush.bf16.msra.mxu0 %v4461_v28  ;;  %1388 = vmatpush.bf16.msra.mxu1 %v4589_v29  ;;  %v4778_v23 = vld [vmem:[%s9476_s2 + $0x570] sm:$0xf0]  ;;  %v6045_v24 = vld [vmem:[%s9476_s2 + $0x244] sm:$0xf]  ;;  %v4653_v25 = vor.u32 %v6113_v17, %v4650_v18 }
  0x46   :  { %1357 = vmatmul.bf16.vlgmr.msrb.gmra.mxu3 %v6838_v57  ;;  %v4378_v26 = vld [vmem:[%s9476_s2 + $0x250] sm:$0xf0]  ;;  %v6077_v27 = vld [vmem:[%s9476_s2 + $0x344] sm:$0xf]  ;;  %v4781_v31 = vor.u32 %v6145_v22, %v4778_v23 }
  0x47   :  { %1401 = vmatpush.bf16.msra.mxu3 %v4717_v33  ;;  %1369 = vmatpush.bf16.msra.mxu2 %v4221_v38  ;;  %v4506_v28 = vld [vmem:[%s9476_s2 + $0x350] sm:$0xf0]  ;;  %v6109_v29 = vld [vmem:[%s9476_s2 + $0x444] sm:$0xf]  ;;  %v4381_v32 = vor.u32 %v6045_v24, %v4378_v26 }
  0x48   :  { %v4634_v30 = vld [vmem:[%s9476_s2 + $0x450] sm:$0xf0]  ;;  %v4509_v33 = vor.u32 %v6077_v27, %v4506_v28  ;;  %v6141_v35 = vld [vmem:[%s9476_s2 + $0x544] sm:$0xf] }
  0x49   :  { %1376 = vmatpush.bf16.msra.mxu0 %v4445_v43  ;;  %1389 = vmatpush.bf16.msra.mxu1 %v4573_v44  ;;  %v4762_v36 = vld [vmem:[%s9476_s2 + $0x550] sm:$0xf0]  ;;  %v6041_v37 = vld [vmem:[%s9476_s2 + $0x224] sm:$0xf]  ;;  %v4637_v38 = vor.u32 %v6109_v29, %v4634_v30 }
  0x4a   :  { %1370 = vmatmul.bf16.vlgmr.msra.gmra.mxu2 %v6868_v9  ;;  %v4362_v40 = vld [vmem:[%s9476_s2 + $0x230] sm:$0xf0]  ;;  %v6073_v41 = vld [vmem:[%s9476_s2 + $0x324] sm:$0xf]  ;;  %v4765_v46 = vor.u32 %v6141_v35, %v4762_v36 }
  0x4b   :  { %1414 = vmatpush.bf16.msrb.mxu2 %v4845_v42  ;;  %1402 = vmatpush.bf16.msra.mxu3 %v4701_v49  ;;  %v4490_v42 = vld [vmem:[%s9476_s2 + $0x330] sm:$0xf0]  ;;  %v6105_v43 = vld [vmem:[%s9476_s2 + $0x424] sm:$0xf]  ;;  %v4365_v51 = vor.u32 %v6041_v37, %v4362_v40 }
  0x4c   :  { %v4618_v44 = vld [vmem:[%s9476_s2 + $0x430] sm:$0xf0]  ;;  %v6137_v45 = vld [vmem:[%s9476_s2 + $0x524] sm:$0xf]  ;;  %v4493_v52 = vor.u32 %v6073_v41, %v4490_v42 }
  0x4d   :  { %1377 = vmatpush.bf16.msra.mxu0 %v4429_v58  ;;  %1390 = vmatpush.bf16.msra.mxu1 %v4557_v59  ;;  %v4746_v47 = vld [vmem:[%s9476_s2 + $0x530] sm:$0xf0]  ;;  %v6037_v49 = vld [vmem:[%s9476_s2 + $0x204] sm:$0xf]  ;;  %v4621_v58 = vor.u32 %v6105_v43, %v4618_v44 }
  0x4e   :  { %v4346_v50 = vld [vmem:[%s9476_s2 + $0x210] sm:$0xf0]  ;;  %v6069_v54 = vld [vmem:[%s9476_s2 + $0x304] sm:$0xf] }
  0x4f   :  { %1415 = vmatpush.bf16.msrb.mxu2 %v4829_v56  ;;  %1403 = vmatpush.bf16.msra.mxu3 %v4685_v0  ;;  %v4474_v55 = vld [vmem:[%s9476_s2 + $0x310] sm:$0xf0]  ;;  %v6101_v56 = vld [vmem:[%s9476_s2 + $0x404] sm:$0xf] }
  0x50   :  { %v4602_v59 = vld [vmem:[%s9476_s2 + $0x410] sm:$0xf0] }
  0x51   :  { %1378 = vmatpush.bf16.msra.mxu0 %v4413_v7  ;;  %1391 = vmatpush.bf16.msra.mxu1 %v4541_v8 }
  0x53   :  { %1416 = vmatpush.bf16.msrb.mxu2 %v4813_v6  ;;  %1404 = vmatpush.bf16.msra.mxu3 %v4669_v13 }
  0x55   :  { %1379 = vmatpush.bf16.msra.mxu0 %v4397_v20  ;;  %1392 = vmatpush.bf16.msra.mxu1 %v4525_v21 }
  0x57   :  { %1417 = vmatpush.bf16.msrb.mxu2 %v4797_v19  ;;  %1405 = vmatpush.bf16.msra.mxu3 %v4653_v25 }
  0x59   :  { %1380 = vmatpush.bf16.msra.mxu0 %v4381_v32  ;;  %1393 = vmatpush.bf16.msra.mxu1 %v4509_v33 }
  0x5b   :  { %1418 = vmatpush.bf16.msrb.mxu2 %v4781_v31  ;;  %1406 = vmatpush.bf16.msra.mxu3 %v4637_v38 }
  0x5c   :  { %18 = vsyncpa [#allocation5], 0  ;;  %v4208_v61 = vld [vmem:[%s9476_s2 + $0xe8] sm:$0xf]  ;;  %v6004_v62 = vld [vmem:[%s9476_s2 + $0xf4] sm:$0xf0]  ;;  %v4749_v0 = vor.u32 %v6137_v45, %v4746_v47  ;;  %v4349_v4 = vor.u32 %v6037_v49, %v4346_v50  ;;  %v4477_v5 = vor.u32 %v6069_v54, %v4474_v55  ;;  %v4605_v10 = vor.u32 %v6101_v56, %v4602_v59 }
  0x5d   :  { %v4336_v63 = vld [vmem:[%s9476_s2 + $0x1e8] sm:$0xf]  ;;  %v6036_v1 = vld [vmem:[%s9476_s2 + $0x1f4] sm:$0xf0]  ;;  %v6165_v2 = vld [vmem:[%s9476_s2 + $0x604] sm:$0xf]  ;;  %1381 = vmatpush.bf16.msra.mxu0 %v4365_v51  ;;  %1394 = vmatpush.bf16.msra.mxu1 %v4493_v52  ;;  %v4209_v11 = vor.u32 %v6004_v62, %v4208_v61 }
  0x5e   :  { %v4858_v3 = vld [vmem:[%s9476_s2 + $0x610] sm:$0xf0]  ;;  %v6133_v6 = vld [vmem:[%s9476_s2 + $0x504] sm:$0xf]  ;;  %v4464_v8 = vld [vmem:[%s9476_s2 + $0x2e8] sm:$0xf]  ;;  %v4337_v15 = vor.u32 %v6036_v1, %v4336_v63 }
  0x5f   :  { %1419 = vmatpush.bf16.msrb.mxu2 %v4765_v46  ;;  %v4730_v7 = vld [vmem:[%s9476_s2 + $0x510] sm:$0xf0]  ;;  %1407 = vmatpush.bf16.msra.mxu3 %v4621_v58  ;;  %v6068_v12 = vld [vmem:[%s9476_s2 + $0x2f4] sm:$0xf0]  ;;  %v4592_v13 = vld [vmem:[%s9476_s2 + $0x3e8] sm:$0xf]  ;;  %v4861_v16 = vor.u32 %v6165_v2, %v4858_v3 }
  0x60   :  { %v6100_v14 = vld [vmem:[%s9476_s2 + $0x3f4] sm:$0xf0]  ;;  %v4192_v17 = vld [vmem:[%s9476_s2 + $0xc8] sm:$0xf]  ;;  %v4733_v19 = vor.u32 %v6133_v6, %v4730_v7  ;;  %v4465_v22 = vor.u32 %v6068_v12, %v4464_v8  ;;  %s6527_s22 = smov 64   ;;  %vm2059_vm1 = vcmask 523264  }
  0x61   :  { %v6000_v18 = vld [vmem:[%s9476_s2 + $0xd4] sm:$0xf0]  ;;  %v4320_v20 = vld [vmem:[%s9476_s2 + $0x1c8] sm:$0xf]  ;;  %1382 = vmatpush.bf16.msra.mxu0 %v4349_v4  ;;  %1395 = vmatpush.bf16.msra.mxu1 %v4477_v5  ;;  %v4593_v23 = vor.u32 %v6100_v14, %v4592_v13  ;;  %s4072_s0 = sshll.u32 %s9485_s11, 4  ;;  %s6529_s11 = smov [#allocation2]   ;;  %s4073_s0 = int_to_ptr.hbm [resolvable:$true] %s4072_s0 }
  0x62   :  { %v6032_v21 = vld [vmem:[%s9476_s2 + $0x1d4] sm:$0xf0]  ;;  %v4448_v24 = vld [vmem:[%s9476_s2 + $0x2c8] sm:$0xf]  ;;  %v4193_v25 = vor.u32 %v6000_v18, %v4192_v17  ;;  %s4059_s13 = sshll.u32 %s6529_s11, 4  ;;  %s4061_s15 = sshll.u32 %s9484_s10, 4  ;;  %s4060_s13 = int_to_ptr.vmem [resolvable:$true] %s4059_s13  ;;  %s4062_s15 = int_to_ptr.hbm [resolvable:$true] %s4061_s15 }
  0x63   :  { %1420 = vmatpush.bf16.msrb.mxu2 %v4749_v0  ;;  %1408 = vmatpush.bf16.msra.mxu3 %v4605_v10  ;;  %v6064_v26 = vld [vmem:[%s9476_s2 + $0x2d4] sm:$0xf0]  ;;  %v4576_v27 = vld [vmem:[%s9476_s2 + $0x3c8] sm:$0xf]  ;;  %v4321_v29 = vor.u32 %v6032_v21, %v4320_v20 }
  0x64   :  { %v6096_v28 = vld [vmem:[%s9476_s2 + $0x3d4] sm:$0xf0]  ;;  %v4176_v30 = vld [vmem:[%s9476_s2 + $0xa8] sm:$0xf]  ;;  %1383 = vmatmul.bf16.vlgmr.msra.gmra.mxu0 %v6827_v53  ;;  %v4449_v35 = vor.u32 %v6064_v26, %v4448_v24  ;;  %1396 = vmatmul.bf16.vlgmr.msra.gmra.mxu1 %v6840_v60 }
  0x65   :  { %1440 = vmatpush.bf16.msrb.mxu1 %v4209_v11  ;;  %1434 = vmatpush.bf16.msrb.mxu0 %v4861_v16  ;;  %v5996_v31 = vld [vmem:[%s9476_s2 + $0xb4] sm:$0xf0]  ;;  %v4304_v32 = vld [vmem:[%s9476_s2 + $0x1a8] sm:$0xf]  ;;  %v4577_v36 = vor.u32 %v6096_v28, %v4576_v27 }
  0x66   :  { %v6028_v33 = vld [vmem:[%s9476_s2 + $0x1b4] sm:$0xf0]  ;;  %v4432_v37 = vld [vmem:[%s9476_s2 + $0x2a8] sm:$0xf]  ;;  %1409 = vmatmul.bf16.vlgmr.msra.gmra.mxu3 %v7035_v34  ;;  %v4177_v38 = vor.u32 %v5996_v31, %v4176_v30 }
  0x67   :  { %1453 = vmatpush.bf16.msrb.mxu3 %v4337_v15  ;;  %1421 = vmatpush.bf16.msrb.mxu2 %v4733_v19  ;;  %v6060_v40 = vld [vmem:[%s9476_s2 + $0x2b4] sm:$0xf0]  ;;  %v4560_v41 = vld [vmem:[%s9476_s2 + $0x3a8] sm:$0xf]  ;;  %v4305_v43 = vor.u32 %v6028_v33, %v4304_v32 }
  0x68   :  { %v6092_v42 = vld [vmem:[%s9476_s2 + $0x3b4] sm:$0xf0]  ;;  %v4160_v44 = vld [vmem:[%s9476_s2 + $0x88] sm:$0xf]  ;;  %v4433_v49 = vor.u32 %v6060_v40, %v4432_v37 }
  0x69   :  { %1466 = vmatpush.bf16.msra.mxu0 %v4465_v22  ;;  %1441 = vmatpush.bf16.msrb.mxu1 %v4193_v25  ;;  %v5992_v45 = vld [vmem:[%s9476_s2 + $0x94] sm:$0xf0]  ;;  %v4288_v46 = vld [vmem:[%s9476_s2 + $0x188] sm:$0xf]  ;;  %v4561_v50 = vor.u32 %v6092_v42, %v4560_v41 }
  0x6a   :  { %1422 = vmatmul.bf16.vlgmr.msrb.gmra.mxu2 %v7046_v39  ;;  %v6024_v47 = vld [vmem:[%s9476_s2 + $0x194] sm:$0xf0]  ;;  %v4416_v51 = vld [vmem:[%s9476_s2 + $0x288] sm:$0xf]  ;;  %v4161_v52 = vor.u32 %v5992_v45, %v4160_v44 }
  0x6b   :  { %1479 = vmatpush.bf16.msra.mxu2 %v4593_v23  ;;  %1454 = vmatpush.bf16.msrb.mxu3 %v4321_v29  ;;  %v6056_v54 = vld [vmem:[%s9476_s2 + $0x294] sm:$0xf0]  ;;  %v4544_v55 = vld [vmem:[%s9476_s2 + $0x388] sm:$0xf]  ;;  %v4289_v58 = vor.u32 %v6024_v47, %v4288_v46 }
  0x6c   :  { %v6088_v56 = vld [vmem:[%s9476_s2 + $0x394] sm:$0xf0]  ;;  %v4144_v59 = vld [vmem:[%s9476_s2 + $0x68] sm:$0xf]  ;;  %v4417_v0 = vor.u32 %v6056_v54, %v4416_v51  ;;  %v6002_v51 = vld [vmem:[%s9476_s2 + $0xec] sm:$0xf] }
  0x6d   :  { %1467 = vmatpush.bf16.msra.mxu0 %v4449_v35  ;;  %1442 = vmatpush.bf16.msrb.mxu1 %v4177_v38  ;;  %v5988_v61 = vld [vmem:[%s9476_s2 + $0x74] sm:$0xf0]  ;;  %v4272_v62 = vld [vmem:[%s9476_s2 + $0x168] sm:$0xf]  ;;  %v4545_v1 = vor.u32 %v6088_v56, %v4544_v55  ;;  %v4210_v55 = vld [vmem:[%s9476_s2 + $0xf8] sm:$0xf0] }
  0x6e   :  { %v6020_v63 = vld [vmem:[%s9476_s2 + $0x174] sm:$0xf0]  ;;  %v4400_v2 = vld [vmem:[%s9476_s2 + $0x268] sm:$0xf]  ;;  %v4145_v3 = vor.u32 %v5988_v61, %v4144_v59 }
  0x6f   :  { %1480 = vmatpush.bf16.msra.mxu2 %v4577_v36  ;;  %1455 = vmatpush.bf16.msrb.mxu3 %v4305_v43  ;;  %v6052_v4 = vld [vmem:[%s9476_s2 + $0x274] sm:$0xf0]  ;;  %v4528_v5 = vld [vmem:[%s9476_s2 + $0x368] sm:$0xf]  ;;  %v4273_v7 = vor.u32 %v6020_v63, %v4272_v62 }
  0x70   :  { %v6084_v6 = vld [vmem:[%s9476_s2 + $0x374] sm:$0xf0]  ;;  %v4128_v8 = vld [vmem:[%s9476_s2 + $0x48] sm:$0xf]  ;;  %v4401_v13 = vor.u32 %v6052_v4, %v4400_v2 }
  0x71   :  { %1468 = vmatpush.bf16.msra.mxu0 %v4433_v49  ;;  %1443 = vmatpush.bf16.msrb.mxu1 %v4161_v52  ;;  %v5984_v10 = vld [vmem:[%s9476_s2 + $0x54] sm:$0xf0]  ;;  %v4256_v11 = vld [vmem:[%s9476_s2 + $0x148] sm:$0xf]  ;;  %v4529_v14 = vor.u32 %v6084_v6, %v4528_v5  ;;  %v6034_v5 = vld [vmem:[%s9476_s2 + $0x1ec] sm:$0xf] }
  0x72   :  { %v6016_v12 = vld [vmem:[%s9476_s2 + $0x154] sm:$0xf0]  ;;  %v4384_v15 = vld [vmem:[%s9476_s2 + $0x248] sm:$0xf]  ;;  %v4129_v16 = vor.u32 %v5984_v10, %v4128_v8  ;;  %v4338_v6 = vld [vmem:[%s9476_s2 + $0x1f8] sm:$0xf0] }
  0x73   :  { %1481 = vmatpush.bf16.msra.mxu2 %v4561_v50  ;;  %1456 = vmatpush.bf16.msrb.mxu3 %v4289_v58  ;;  %v6048_v17 = vld [vmem:[%s9476_s2 + $0x254] sm:$0xf0]  ;;  %v4512_v18 = vld [vmem:[%s9476_s2 + $0x348] sm:$0xf]  ;;  %v4257_v20 = vor.u32 %v6016_v12, %v4256_v11  ;;  %v5998_v8 = vld [vmem:[%s9476_s2 + $0xcc] sm:$0xf] }
  0x74   :  { %v6080_v19 = vld [vmem:[%s9476_s2 + $0x354] sm:$0xf0]  ;;  %v4112_v21 = vld [vmem:[%s9476_s2 + $0x28] sm:$0xf]  ;;  %4871 = vmatmul.msk.bf16.vlgmr.msrb.gmra.mxu0 %vm1254_vm0, %v6947_v48  ;;  %v4385_v25 = vor.u32 %v6048_v17, %v4384_v15  ;;  %v4194_v10 = vld [vmem:[%s9476_s2 + $0xd8] sm:$0xf0] }
  0x75   :  { %1469 = vmatpush.bf16.msra.mxu0 %v4417_v0  ;;  %1444 = vmatpush.bf16.msrb.mxu1 %v4145_v3  ;;  %v5980_v22 = vld [vmem:[%s9476_s2 + $0x34] sm:$0xf0]  ;;  %v4240_v23 = vld [vmem:[%s9476_s2 + $0x128] sm:$0xf]  ;;  %v4513_v26 = vor.u32 %v6080_v19, %v4512_v18  ;;  %v4213_v3 = vor.u32 %v6002_v51, %v4210_v55  ;;  %v4197_v17 = vor.u32 %v5998_v8, %v4194_v10  ;;  %v6030_v18 = vld [vmem:[%s9476_s2 + $0x1cc] sm:$0xf] }
  0x76   :  { %v6012_v24 = vld [vmem:[%s9476_s2 + $0x134] sm:$0xf0]  ;;  %v4368_v27 = vld [vmem:[%s9476_s2 + $0x228] sm:$0xf]  ;;  %v4113_v29 = vor.u32 %v5980_v22, %v4112_v21  ;;  %v4322_v19 = vld [vmem:[%s9476_s2 + $0x1d8] sm:$0xf0] }
  0x77   :  { %1482 = vmatpush.bf16.msra.mxu2 %v4545_v1  ;;  %1457 = vmatpush.bf16.msrb.mxu3 %v4273_v7  ;;  %v6044_v28 = vld [vmem:[%s9476_s2 + $0x234] sm:$0xf0]  ;;  %v4496_v30 = vld [vmem:[%s9476_s2 + $0x328] sm:$0xf]  ;;  %v4241_v33 = vor.u32 %v6012_v24, %v4240_v23  ;;  %v5994_v21 = vld [vmem:[%s9476_s2 + $0xac] sm:$0xf] }
  0x78   :  { %v6076_v31 = vld [vmem:[%s9476_s2 + $0x334] sm:$0xf0]  ;;  %v4096_v32 = vld [vmem:[%s9476_s2 + $0x8] sm:$0xf]  ;;  %v4369_v42 = vor.u32 %v6044_v28, %v4368_v27  ;;  %v4178_v22 = vld [vmem:[%s9476_s2 + $0xb8] sm:$0xf0] }
  0x79   :  { %1470 = vmatpush.bf16.msra.mxu0 %v4401_v13  ;;  %1445 = vmatpush.bf16.msrb.mxu1 %v4129_v16  ;;  %v5976_v35 = vld [vmem:[%s9476_s2 + $0x14] sm:$0xf0]  ;;  %v4224_v36 = vld [vmem:[%s9476_s2 + $0x108] sm:$0xf]  ;;  %v4497_v43 = vor.u32 %v6076_v31, %v4496_v30  ;;  %v6026_v30 = vld [vmem:[%s9476_s2 + $0x1ac] sm:$0xf] }
  0x7a   :  { %v6008_v37 = vld [vmem:[%s9476_s2 + $0x114] sm:$0xf0]  ;;  %v4720_v38 = vld [vmem:[%s9476_s2 + $0x4e8] sm:$0xf]  ;;  %v4097_v47 = vor.u32 %v5976_v35, %v4096_v32  ;;  %v4306_v31 = vld [vmem:[%s9476_s2 + $0x1b8] sm:$0xf0] }
  0x7b   :  { %1483 = vmatpush.bf16.msra.mxu2 %v4529_v14  ;;  %1458 = vmatpush.bf16.msrb.mxu3 %v4257_v20  ;;  %v6132_v40 = vld [vmem:[%s9476_s2 + $0x4f4] sm:$0xf0]  ;;  %v4848_v41 = vld [vmem:[%s9476_s2 + $0x5e8] sm:$0xf]  ;;  %v4225_v52 = vor.u32 %v6008_v37, %v4224_v36  ;;  %v4341_v14 = vor.u32 %v6034_v5, %v4338_v6  ;;  %v4162_v35 = vld [vmem:[%s9476_s2 + $0x98] sm:$0xf0] }
  0x7c   :  { %v6164_v44 = vld [vmem:[%s9476_s2 + $0x5f4] sm:$0xf0]  ;;  %v4352_v45 = vld [vmem:[%s9476_s2 + $0x208] sm:$0xf]  ;;  %v4721_v54 = vor.u32 %v6132_v40, %v4720_v38  ;;  %v4309_v40 = vor.u32 %v6026_v30, %v4306_v31  ;;  %v6014_v8 = vld [vmem:[%s9476_s2 + $0x14c] sm:$0xf] }
  0x7d   :  { %1471 = vmatpush.bf16.msra.mxu0 %v4385_v25  ;;  %v6040_v46 = vld [vmem:[%s9476_s2 + $0x214] sm:$0xf0]  ;;  %1446 = vmatpush.bf16.msrb.mxu1 %v4113_v29  ;;  %v4480_v49 = vld [vmem:[%s9476_s2 + $0x308] sm:$0xf]  ;;  %v4849_v59 = vor.u32 %v6164_v44, %v4848_v41  ;;  %v4181_v29 = vor.u32 %v5994_v21, %v4178_v22  ;;  %v6022_v44 = vld [vmem:[%s9476_s2 + $0x18c] sm:$0xf] }
  0x7e   :  { %v6072_v50 = vld [vmem:[%s9476_s2 + $0x314] sm:$0xf0]  ;;  %v4864_v56 = vld [vmem:[%s9476_s2 + $0x608] sm:$0xf]  ;;  %v4353_v63 = vor.u32 %v6040_v46, %v4352_v45  ;;  %v4290_v45 = vld [vmem:[%s9476_s2 + $0x198] sm:$0xf0] }
  0x7f   :  { %1484 = vmatpush.bf16.msra.mxu2 %v4513_v26  ;;  %1459 = vmatpush.bf16.msrb.mxu3 %v4241_v33  ;;  %v6168_v58 = vld [vmem:[%s9476_s2 + $0x614] sm:$0xf0]  ;;  %v4704_v61 = vld [vmem:[%s9476_s2 + $0x4c8] sm:$0xf]  ;;  %v4481_v0 = vor.u32 %v6072_v50, %v4480_v49  ;;  %v4325_v26 = vor.u32 %v6030_v18, %v4322_v19  ;;  %v5990_v33 = vld [vmem:[%s9476_s2 + $0x8c] sm:$0xf] }
  0x80   :  { %v6128_v62 = vld [vmem:[%s9476_s2 + $0x4d4] sm:$0xf0]  ;;  %v4832_v1 = vld [vmem:[%s9476_s2 + $0x5c8] sm:$0xf]  ;;  %v4865_v4 = vor.u32 %v6168_v58, %v4864_v56  ;;  %v4146_v49 = vld [vmem:[%s9476_s2 + $0x78] sm:$0xf0] }
  0x81   :  { %1472 = vmatpush.bf16.msra.mxu0 %v4369_v42  ;;  %v6160_v2 = vld [vmem:[%s9476_s2 + $0x5d4] sm:$0xf0]  ;;  %1447 = vmatpush.bf16.msrb.mxu1 %v4097_v47  ;;  %v4705_v7 = vor.u32 %v6128_v62, %v4704_v61  ;;  %v4688_v12 = vld [vmem:[%s9476_s2 + $0x4a8] sm:$0xf]  ;;  %v5986_v47 = vld [vmem:[%s9476_s2 + $0x6c] sm:$0xf] }
  0x82   :  { %v4833_v11 = vor.u32 %v6160_v2, %v4832_v1  ;;  %v6124_v13 = vld [vmem:[%s9476_s2 + $0x4b4] sm:$0xf0]  ;;  %v4816_v15 = vld [vmem:[%s9476_s2 + $0x5a8] sm:$0xf]  ;;  %v4149_v58 = vor.u32 %v5986_v47, %v4146_v49  ;;  %v4274_v61 = vld [vmem:[%s9476_s2 + $0x178] sm:$0xf0] }
  0x83   :  { %1485 = vmatpush.bf16.msra.mxu2 %v4497_v43  ;;  %1460 = vmatpush.bf16.msrb.mxu3 %v4225_v52  ;;  %v6156_v16 = vld [vmem:[%s9476_s2 + $0x5b4] sm:$0xf0]  ;;  %v4689_v20 = vor.u32 %v6124_v13, %v4688_v12  ;;  %v4672_v24 = vld [vmem:[%s9476_s2 + $0x488] sm:$0xf]  ;;  %v4165_v43 = vor.u32 %v5990_v33, %v4162_v35  ;;  %v4258_v10 = vld [vmem:[%s9476_s2 + $0x158] sm:$0xf0] }
  0x84   :  { %v4817_v23 = vor.u32 %v6156_v16, %v4816_v15  ;;  %v6120_v25 = vld [vmem:[%s9476_s2 + $0x494] sm:$0xf0]  ;;  %1448 = vmatmul.bf16.vlgmr.msrb.gmra.mxu1 %v6838_v57  ;;  %v4800_v27 = vld [vmem:[%s9476_s2 + $0x588] sm:$0xf]  ;;  %v5978_v12 = vld [vmem:[%s9476_s2 + $0x2c] sm:$0xf]  ;;  %v4261_v19 = vor.u32 %v6014_v8, %v4258_v10 }
  0x85   :  { %1492 = vmatpush.bf16.msra.mxu1 %v4721_v54  ;;  %1473 = vmatpush.bf16.msra.mxu0 %v4353_v63  ;;  %v6152_v28 = vld [vmem:[%s9476_s2 + $0x594] sm:$0xf0]  ;;  %v4673_v32 = vor.u32 %v6120_v25, %v4672_v24  ;;  %v4656_v37 = vld [vmem:[%s9476_s2 + $0x468] sm:$0xf]  ;;  %v4293_v54 = vor.u32 %v6022_v44, %v4290_v45  ;;  %v5982_v63 = vld [vmem:[%s9476_s2 + $0x4c] sm:$0xf] }
  0x86   :  { %1461 = vmatmul.bf16.vlgmr.msrb.gmra.mxu3 %v6868_v9  ;;  %v4801_v36 = vor.u32 %v6152_v28, %v4800_v27  ;;  %v6116_v38 = vld [vmem:[%s9476_s2 + $0x474] sm:$0xf0]  ;;  %v4784_v41 = vld [vmem:[%s9476_s2 + $0x568] sm:$0xf]  ;;  %v4114_v13 = vld [vmem:[%s9476_s2 + $0x38] sm:$0xf0] }
  0x87   :  { %1505 = vmatpush.bf16.msra.mxu3 %v4849_v59  ;;  %1486 = vmatpush.bf16.msra.mxu2 %v4481_v0  ;;  %v6148_v42 = vld [vmem:[%s9476_s2 + $0x574] sm:$0xf0]  ;;  %v4657_v46 = vor.u32 %v6116_v38, %v4656_v37  ;;  %v4640_v51 = vld [vmem:[%s9476_s2 + $0x448] sm:$0xf]  ;;  %v6018_v59 = vld [vmem:[%s9476_s2 + $0x16c] sm:$0xf] }
  0x88   :  { %1474 = vmatmul.bf16.vlgmr.msra.gmra.mxu0 %v6827_v53  ;;  %v4785_v50 = vor.u32 %v6148_v42, %v4784_v41  ;;  %v6112_v52 = vld [vmem:[%s9476_s2 + $0x454] sm:$0xf0]  ;;  %v4768_v55 = vld [vmem:[%s9476_s2 + $0x548] sm:$0xf]  ;;  %v4130_v0 = vld [vmem:[%s9476_s2 + $0x58] sm:$0xf0] }
  0x89   :  { %1525 = vmatpush.bf16.msrb.mxu0 %v4865_v4  ;;  %1493 = vmatpush.bf16.msra.mxu1 %v4705_v7  ;;  %v6144_v56 = vld [vmem:[%s9476_s2 + $0x554] sm:$0xf0]  ;;  %v4641_v62 = vor.u32 %v6112_v52, %v4640_v51  ;;  %v4624_v2 = vld [vmem:[%s9476_s2 + $0x428] sm:$0xf]  ;;  %v4277_v4 = vor.u32 %v6018_v59, %v4274_v61  ;;  %v4133_v7 = vor.u32 %v5982_v63, %v4130_v0  ;;  %v4466_v21 = vld [vmem:[%s9476_s2 + $0x2f8] sm:$0xf0] }
  0x8a   :  { %1487 = vmatmul.bf16.vlgmr.msra.gmra.mxu2 %v6840_v60  ;;  %v4769_v1 = vor.u32 %v6144_v56, %v4768_v55  ;;  %v4752_v5 = vld [vmem:[%s9476_s2 + $0x528] sm:$0xf]  ;;  %v6140_v6 = vld [vmem:[%s9476_s2 + $0x534] sm:$0xf0]  ;;  %v6098_v22 = vld [vmem:[%s9476_s2 + $0x3ec] sm:$0xf] }
  0x8b   :  { %1531 = vmatpush.bf16.msrb.mxu2 %v4213_v3  ;;  %1506 = vmatpush.bf16.msra.mxu3 %v4833_v11  ;;  %v6108_v3 = vld [vmem:[%s9476_s2 + $0x434] sm:$0xf0]  ;;  %v4753_v15 = vor.u32 %v6140_v6, %v4752_v5  ;;  %v4594_v24 = vld [vmem:[%s9476_s2 + $0x3f8] sm:$0xf0]  ;;  %v6010_v25 = vld [vmem:[%s9476_s2 + $0x12c] sm:$0xf] }
  0x8c   :  { %v4625_v11 = vor.u32 %v6108_v3, %v4624_v2  ;;  %v6104_v16 = vld [vmem:[%s9476_s2 + $0x414] sm:$0xf0]  ;;  %v5974_v28 = vld [vmem:[%s9476_s2 + $0xc] sm:$0xf]  ;;  %v4722_v33 = vld [vmem:[%s9476_s2 + $0x4f8] sm:$0xf0]  ;;  %v4597_v35 = vor.u32 %v6098_v22, %v4594_v24 }
  0x8d   :  { %1544 = vmatpush.bf16.msra.mxu0 %v4341_v14  ;;  %1494 = vmatpush.bf16.msra.mxu1 %v4689_v20  ;;  %v4608_v14 = vld [vmem:[%s9476_s2 + $0x408] sm:$0xf]  ;;  %v6136_v18 = vld [vmem:[%s9476_s2 + $0x514] sm:$0xf0]  ;;  %v6066_v20 = vld [vmem:[%s9476_s2 + $0x2ec] sm:$0xf] }
  0x8e   :  { %v4609_v27 = vor.u32 %v6104_v16, %v4608_v14  ;;  %v4469_v31 = vor.u32 %v6066_v20, %v4466_v21  ;;  %v6062_v37 = vld [vmem:[%s9476_s2 + $0x2cc] sm:$0xf]  ;;  %v4450_v38 = vld [vmem:[%s9476_s2 + $0x2d8] sm:$0xf0] }
  0x8f   :  { %1532 = vmatpush.bf16.msrb.mxu2 %v4197_v17  ;;  %1507 = vmatpush.bf16.msra.mxu3 %v4817_v23  ;;  %v4736_v17 = vld [vmem:[%s9476_s2 + $0x508] sm:$0xf]  ;;  %v4117_v23 = vor.u32 %v5978_v12, %v4114_v13  ;;  %v4578_v42 = vld [vmem:[%s9476_s2 + $0x3d8] sm:$0xf0]  ;;  %v4453_v49 = vor.u32 %v6062_v37, %v4450_v38  ;;  %v6058_v55 = vld [vmem:[%s9476_s2 + $0x2ac] sm:$0xf] }
  0x90   :  { %v4737_v30 = vor.u32 %v6136_v18, %v4736_v17  ;;  %v4226_v44 = vld [vmem:[%s9476_s2 + $0x118] sm:$0xf0]  ;;  %v6090_v59 = vld [vmem:[%s9476_s2 + $0x3ac] sm:$0xf] }
  0x91   :  { %1545 = vmatpush.bf16.msra.mxu0 %v4325_v26  ;;  %1495 = vmatpush.bf16.msra.mxu1 %v4673_v32  ;;  %v4242_v26 = vld [vmem:[%s9476_s2 + $0x138] sm:$0xf0]  ;;  %v6130_v32 = vld [vmem:[%s9476_s2 + $0x4ec] sm:$0xf] }
  0x92   :  { %v4725_v45 = vor.u32 %v6130_v32, %v4722_v33  ;;  %v4850_v47 = vld [vmem:[%s9476_s2 + $0x5f8] sm:$0xf0]  ;;  %v6158_v63 = vld [vmem:[%s9476_s2 + $0x5cc] sm:$0xf] }
  0x93   :  { %1533 = vmatpush.bf16.msrb.mxu2 %v4181_v29  ;;  %1508 = vmatpush.bf16.msra.mxu3 %v4801_v36  ;;  %v4098_v29 = vld [vmem:[%s9476_s2 + $0x18] sm:$0xf0]  ;;  %v4245_v36 = vor.u32 %v6010_v25, %v4242_v26  ;;  %v6122_v2 = vld [vmem:[%s9476_s2 + $0x4ac] sm:$0xf] }
  0x94   :  { %v4101_v41 = vor.u32 %v5974_v28, %v4098_v29  ;;  %v4706_v51 = vld [vmem:[%s9476_s2 + $0x4d8] sm:$0xf0]  ;;  %v6054_v5 = vld [vmem:[%s9476_s2 + $0x28c] sm:$0xf] }
  0x95   :  { %1546 = vmatpush.bf16.msra.mxu0 %v4309_v40  ;;  %1496 = vmatpush.bf16.msra.mxu1 %v4657_v46  ;;  %v6094_v40 = vld [vmem:[%s9476_s2 + $0x3cc] sm:$0xf]  ;;  %v4434_v56 = vld [vmem:[%s9476_s2 + $0x2b8] sm:$0xf0] }
  0x96   :  { %v6162_v46 = vld [vmem:[%s9476_s2 + $0x5ec] sm:$0xf]  ;;  %v4581_v52 = vor.u32 %v6094_v40, %v4578_v42  ;;  %v4562_v61 = vld [vmem:[%s9476_s2 + $0x3b8] sm:$0xf0] }
  0x97   :  { %1534 = vmatpush.bf16.msrb.mxu2 %v4165_v43  ;;  %1509 = vmatpush.bf16.msra.mxu3 %v4785_v50  ;;  %v6006_v43 = vld [vmem:[%s9476_s2 + $0x10c] sm:$0xf]  ;;  %v4834_v0 = vld [vmem:[%s9476_s2 + $0x5d8] sm:$0xf0] }
  0x98   :  { %4872 = vmatmul.msk.bf16.vlgmr.msrb.gmra.mxu0 %vm1254_vm0, %v6947_v48  ;;  %v6126_v50 = vld [vmem:[%s9476_s2 + $0x4cc] sm:$0xf]  ;;  %v4690_v3 = vld [vmem:[%s9476_s2 + $0x4b8] sm:$0xf0] }
  0x99   :  { %1547 = vmatpush.bf16.msra.mxu0 %v4293_v54  ;;  %1497 = vmatpush.bf16.msra.mxu1 %v4641_v62  ;;  %v4229_v54 = vor.u32 %v6006_v43, %v4226_v44  ;;  %v4709_v62 = vor.u32 %v6126_v50, %v4706_v51  ;;  %v4418_v6 = vld [vmem:[%s9476_s2 + $0x298] sm:$0xf0]  ;;  %v6086_v8 = vld [vmem:[%s9476_s2 + $0x38c] sm:$0xf] }
  0x9a   :  { %v4546_v10 = vld [vmem:[%s9476_s2 + $0x398] sm:$0xf0]  ;;  %v6154_v12 = vld [vmem:[%s9476_s2 + $0x5ac] sm:$0xf]  ;;  %v4421_v14 = vor.u32 %v6054_v5, %v4418_v6 }
  0x9b   :  { %1535 = vmatpush.bf16.msrb.mxu2 %v4149_v58  ;;  %1510 = vmatpush.bf16.msra.mxu3 %v4769_v1  ;;  %v4853_v58 = vor.u32 %v6162_v46, %v4850_v47  ;;  %v4437_v1 = vor.u32 %v6058_v55, %v4434_v56  ;;  %v4818_v13 = vld [vmem:[%s9476_s2 + $0x5b8] sm:$0xf0]  ;;  %v4549_v16 = vor.u32 %v6086_v8, %v4546_v10  ;;  %v6050_v17 = vld [vmem:[%s9476_s2 + $0x26c] sm:$0xf] }
  0x9c   :  { %v4402_v18 = vld [vmem:[%s9476_s2 + $0x278] sm:$0xf0]  ;;  %v6082_v20 = vld [vmem:[%s9476_s2 + $0x36c] sm:$0xf] }
  0x9d   :  { %1548 = vmatpush.bf16.msra.mxu0 %v4277_v4  ;;  %1498 = vmatpush.bf16.msra.mxu1 %v4625_v11  ;;  %v4565_v4 = vor.u32 %v6090_v59, %v4562_v61  ;;  %v4693_v11 = vor.u32 %v6122_v2, %v4690_v3  ;;  %v4802_v24 = vld [vmem:[%s9476_s2 + $0x598] sm:$0xf0]  ;;  %v4405_v25 = vor.u32 %v6050_v17, %v4402_v18  ;;  %v6114_v26 = vld [vmem:[%s9476_s2 + $0x46c] sm:$0xf] }
  0x9e   :  { %v6046_v29 = vld [vmem:[%s9476_s2 + $0x24c] sm:$0xf]  ;;  %v4786_v38 = vld [vmem:[%s9476_s2 + $0x578] sm:$0xf0] }
  0x9f   :  { %1536 = vmatpush.bf16.msrb.mxu2 %v4133_v7  ;;  %1511 = vmatpush.bf16.msra.mxu3 %v4753_v15  ;;  %v4837_v7 = vor.u32 %v6158_v63, %v4834_v0  ;;  %v6118_v15 = vld [vmem:[%s9476_s2 + $0x48c] sm:$0xf]  ;;  %v4642_v43 = vld [vmem:[%s9476_s2 + $0x458] sm:$0xf0] }
  0xa0   :  { %v6078_v33 = vld [vmem:[%s9476_s2 + $0x34c] sm:$0xf]  ;;  %v4370_v47 = vld [vmem:[%s9476_s2 + $0x238] sm:$0xf0] }
  0xa1   :  { %1549 = vmatpush.bf16.msra.mxu0 %v4261_v19  ;;  %1499 = vmatpush.bf16.msra.mxu1 %v4609_v27  ;;  %v4821_v19 = vor.u32 %v6154_v12, %v4818_v13  ;;  %v4658_v27 = vld [vmem:[%s9476_s2 + $0x478] sm:$0xf0]  ;;  %v6146_v37 = vld [vmem:[%s9476_s2 + $0x56c] sm:$0xf] }
  0xa2   :  { %v6110_v42 = vld [vmem:[%s9476_s2 + $0x44c] sm:$0xf]  ;;  %v4498_v51 = vld [vmem:[%s9476_s2 + $0x338] sm:$0xf0] }
  0xa3   :  { %1537 = vmatpush.bf16.msrb.mxu2 %v4117_v23  ;;  %1512 = vmatpush.bf16.msra.mxu3 %v4737_v30  ;;  %v6150_v23 = vld [vmem:[%s9476_s2 + $0x58c] sm:$0xf]  ;;  %v4386_v30 = vld [vmem:[%s9476_s2 + $0x258] sm:$0xf0] }
  0xa4   :  { %1500 = vmatmul.bf16.vlgmr.msra.gmra.mxu1 %v7035_v34  ;;  %v6042_v46 = vld [vmem:[%s9476_s2 + $0x22c] sm:$0xf]  ;;  %v4770_v56 = vld [vmem:[%s9476_s2 + $0x558] sm:$0xf0] }
  0xa5   :  { %1557 = vmatpush.bf16.msrb.mxu1 %v4469_v31  ;;  %1550 = vmatpush.bf16.msra.mxu0 %v4245_v36  ;;  %v7722_v21 = vpop.f32.mrf.mxu0  ;;  %v4805_v31 = vor.u32 %v6150_v23, %v4802_v24  ;;  %v7742_v32 = vpop.f32.mrf.mxu1  ;;  %v4661_v36 = vor.u32 %v6114_v26, %v4658_v27  ;;  %v6074_v50 = vld [vmem:[%s9476_s2 + $0x32c] sm:$0xf]  ;;  %v4373_v59 = vor.u32 %v6042_v46, %v4370_v47  ;;  %v4738_v23 = vld [vmem:[%s9476_s2 + $0x518] sm:$0xf0]  ;;  %v6175_v26 = vld [vmem:[%s9478_s4 + $0x30] sm:$0xff] }
  0xa6   :  { %1513 = vmatmul.bf16.vlgmr.msra.gmra.mxu3 %v7046_v39  ;;  %v6142_v55 = vld [vmem:[%s9476_s2 + $0x54c] sm:$0xf]  ;;  %v4501_v63 = vor.u32 %v6074_v50, %v4498_v51  ;;  %v6184_v24 = vld [vmem:[%s9478_s4 + $0x78] sm:$0xff]  ;;  %v6169_v50 = vld [vmem:[%s9478_s4] sm:$0xff] }
  0xa7   :  { %1570 = vmatpush.bf16.msrb.mxu3 %v4597_v35  ;;  %1538 = vmatpush.bf16.msrb.mxu2 %v4101_v41  ;;  %v4514_v35 = vld [vmem:[%s9476_s2 + $0x358] sm:$0xf0]  ;;  %v4389_v41 = vor.u32 %v6046_v29, %v4386_v30  ;;  %v6106_v61 = vld [vmem:[%s9476_s2 + $0x42c] sm:$0xf]  ;;  %v4773_v3 = vor.u32 %v6142_v55, %v4770_v56 }
  0xa8   :  { %v7756_v40 = vpop.f32.mrf.mxu2  ;;  %v4517_v44 = vor.u32 %v6078_v33, %v4514_v35  ;;  %v6038_v0 = vld [vmem:[%s9476_s2 + $0x20c] sm:$0xf]  ;;  %v6181_v35 = vld [vmem:[%s9478_s4 + $0x60] sm:$0xff] }
  0xa9   :  { %1558 = vmatpush.bf16.msrb.mxu1 %v4453_v49  ;;  %1551 = vmatpush.bf16.msra.mxu0 %v4229_v54  ;;  %v4789_v49 = vor.u32 %v6146_v37, %v4786_v38  ;;  %v4645_v54 = vor.u32 %v6110_v42, %v4642_v43  ;;  %v6070_v2 = vld [vmem:[%s9476_s2 + $0x30c] sm:$0xf]  ;;  %v6180_v38 = vld [vmem:[%s9478_s4 + $0x58] sm:$0xff] }
  0xaa   :  { %1539 = vmatmul.bf16.vlgmr.msrb.gmra.mxu2 %v6838_v57  ;;  %v4674_v57 = vld [vmem:[%s9476_s2 + $0x498] sm:$0xf0]  ;;  %v6166_v6 = vld [vmem:[%s9476_s2 + $0x60c] sm:$0xf] }
  0xab   :  { %1583 = vmatpush.bf16.msra.mxu2 %v4725_v45  ;;  %1571 = vmatpush.bf16.msrb.mxu3 %v4581_v52  ;;  %v4677_v22 = vor.u32 %v6118_v15, %v4674_v57  ;;  %v7764_v45 = vpop.f32.mrf.mxu3  ;;  %v6138_v10 = vld [vmem:[%s9476_s2 + $0x52c] sm:$0xf]  ;;  %v4610_v15 = vld [vmem:[%s9476_s2 + $0x418] sm:$0xf0] }
  0xac   :  { %1552 = vmatmul.bf16.vlgmr.msra.gmra.mxu0 %v6868_v9  ;;  %v4530_v9 = vld [vmem:[%s9476_s2 + $0x378] sm:$0xf0]  ;;  %v6174_v30 = vld [vmem:[%s9478_s4 + $0x28] sm:$0xff] }
  0xad   :  { %1596 = vmatpush.bf16.msrb.mxu0 %v4853_v58  ;;  %1559 = vmatpush.bf16.msrb.mxu1 %v4437_v1  ;;  %v4533_v28 = vor.u32 %v6082_v20, %v4530_v9  ;;  %v1269_v52 = vpop.f32.mrf.mxu0  ;;  %v7787_v58 = vld [vmem:[%s9477_s3] sm:$0xf]  ;;  %v4354_v1 = vld [vmem:[%s9476_s2 + $0x218] sm:$0xf0]  ;;  %v1282_v5 = vpop.f32.mrf.mxu1  ;;  %v6170_v47 = vld [vmem:[%s9478_s4 + $0x8] sm:$0xff] }
  0xae   :  { %v4357_v13 = vor.u32 %v6038_v0, %v4354_v1  ;;  %v242_v57 = vperm.slane %v7787_v58, 0  ;;  %v243_v56 = vperm.slane %v7787_v58, 1  ;;  %v6192_v5 = vld [vmem:[%s9478_s4 + $0xb8] sm:$0xff] }
  0xaf   :  { %1584 = vmatpush.bf16.msra.mxu2 %v4709_v62  ;;  %1572 = vmatpush.bf16.msrb.mxu3 %v4565_v4  ;;  %v4626_v62 = vld [vmem:[%s9476_s2 + $0x438] sm:$0xf0] }
  0xb0   :  { %v4482_v4 = vld [vmem:[%s9476_s2 + $0x318] sm:$0xf0]  ;;  %v4629_v8 = vor.u32 %v6106_v61, %v4626_v62  ;;  %v1295_v12 = vpop.f32.mrf.mxu2 }
  0xb1   :  { %1597 = vmatpush.bf16.msrb.mxu0 %v4837_v7  ;;  %1560 = vmatpush.bf16.msrb.mxu1 %v4421_v14  ;;  %v4866_v7 = vld [vmem:[%s9476_s2 + $0x618] sm:$0xf0]  ;;  %v6102_v14 = vld [vmem:[%s9476_s2 + $0x40c] sm:$0xf] }
  0xb2   :  { %v4869_v17 = vor.u32 %v6166_v6, %v4866_v7  ;;  %v4613_v9 = vor.u32 %v6102_v14, %v4610_v15  ;;  %v6190_v12 = vld [vmem:[%s9478_s4 + $0xa8] sm:$0xff] }
  0xb3   :  { %1585 = vmatpush.bf16.msra.mxu2 %v4693_v11  ;;  %1573 = vmatpush.bf16.msrb.mxu3 %v4549_v16  ;;  %v4754_v11 = vld [vmem:[%s9476_s2 + $0x538] sm:$0xf0]  ;;  %v4485_v16 = vor.u32 %v6070_v2, %v4482_v4  ;;  %v1308_v18 = vpop.f32.mrf.mxu3 }
  0xb4   :  { %v4757_v20 = vor.u32 %v6138_v10, %v4754_v11 }
  0xb5   :  { %1598 = vmatpush.bf16.msrb.mxu0 %v4821_v19  ;;  %1561 = vmatpush.bf16.msrb.mxu1 %v4405_v25  ;;  %v6176_v19 = vld [vmem:[%s9478_s4 + $0x38] sm:$0xff]  ;;  %v1268_v25 = vadd.f32 %v7722_v21, %v242_v57  ;;  %v6183_v21 = vld [vmem:[%s9478_s4 + $0x70] sm:$0xff] }
  0xb7   :  { %1586 = vmatpush.bf16.msra.mxu2 %v4677_v22  ;;  %1574 = vmatpush.bf16.msrb.mxu3 %v4533_v28  ;;  %v6134_v22 = vld [vmem:[%s9476_s2 + $0x50c] sm:$0xf]  ;;  %v1281_v29 = vadd.f32 %v7742_v32, %v1268_v25 }
  0xb8   :  { %v4741_v27 = vor.u32 %v6134_v22, %v4738_v23 }
  0xb9   :  { %1599 = vmatpush.bf16.msrb.mxu0 %v4805_v31  ;;  %1562 = vmatpush.bf16.msrb.mxu1 %v4389_v41  ;;  %v1345_v28 = vpop.f32.mrf.mxu2  ;;  %v6173_v31 = vld [vmem:[%s9478_s4 + $0x20] sm:$0xff] }
  0xbb   :  { %1587 = vmatpush.bf16.msra.mxu2 %v4661_v36  ;;  %1575 = vmatpush.bf16.msrb.mxu3 %v4517_v44 }
  0xbd   :  { %1600 = vmatpush.bf16.msrb.mxu0 %v4789_v49  ;;  %1563 = vmatpush.bf16.msrb.mxu1 %v4373_v59 }
  0xbf   :  { %1588 = vmatpush.bf16.msra.mxu2 %v4645_v54  ;;  %1576 = vmatpush.bf16.msrb.mxu3 %v4501_v63  ;;  %v6177_v54 = vld [vmem:[%s9478_s4 + $0x40] sm:$0xff] }
  0xc1   :  { %1601 = vmatpush.bf16.msrb.mxu0 %v4773_v3  ;;  %1564 = vmatpush.bf16.msrb.mxu1 %v4357_v13  ;;  %v1332_v32 = vpop.f32.mrf.mxu1  ;;  %v1347_v33 = vpop.f32.mrf.mxu2 }
  0xc3   :  { %1589 = vmatpush.bf16.msra.mxu2 %v4629_v8  ;;  %1577 = vmatpush.bf16.msrb.mxu3 %v4485_v16  ;;  %v6191_v8 = vld [vmem:[%s9478_s4 + $0xb0] sm:$0xff]  ;;  %v6189_v16 = vld [vmem:[%s9478_s4 + $0xa0] sm:$0xff] }
  0xc4   :  { %1565 = vmatmul.bf16.vlgmr.msrb.gmra.mxu1 %v6827_v53  ;;  %v6182_v53 = vld [vmem:[%s9478_s4 + $0x68] sm:$0xff] }
  0xc5   :  { %1616 = vmatpush.bf16.msra.mxu1 %v4869_v17  ;;  %1602 = vmatpush.bf16.msrb.mxu0 %v4757_v20  ;;  %v6188_v20 = vld [vmem:[%s9478_s4 + $0x98] sm:$0xff] }
  0xc6   :  { %1578 = vmatmul.bf16.vlgmr.msrb.gmra.mxu3 %v6840_v60  ;;  %v1294_v60 = vadd.f32 %v7756_v40, %v1281_v29  ;;  %v6171_v40 = vld [vmem:[%s9478_s4 + $0x10] sm:$0xff]  ;;  %v6200_v29 = vld [vmem:[%s9478_s4 + $0xf8] sm:$0xff] }
  0xc7   :  { %1890 = vmatpush.bf16.msra.mxu3 %v6176_v19  ;;  %1590 = vmatpush.bf16.msra.mxu2 %v4613_v9  ;;  %v6187_v9 = vld [vmem:[%s9478_s4 + $0x90] sm:$0xff] }
  0xc8   :  { %v1307_v36 = vadd.f32 %v7764_v45, %v1294_v60  ;;  %v6179_v45 = vld [vmem:[%s9478_s4 + $0x50] sm:$0xff]  ;;  %v244_v60 = vperm.slane %v7787_v58, 2 }
  0xc9   :  { %1903 = vmatpush.bf16.msrb.mxu1 %v6184_v24  ;;  %1603 = vmatpush.bf16.msrb.mxu0 %v4741_v27  ;;  %v1358_v43 = vpop.f32.mrf.mxu3  ;;  %v1334_v44 = vpop.f32.mrf.mxu1  ;;  %v6186_v24 = vld [vmem:[%s9478_s4 + $0x88] sm:$0xff] }
  0xca   :  { %1591 = vmatmul.bf16.vlgmr.msra.gmra.mxu2 %v7035_v34  ;;  %v1319_v34 = vpop.f32.mrf.mxu0  ;;  %v1359_v61 = vadd.f32 %v1358_v43, %v243_v56  ;;  %v6193_v56 = vld [vmem:[%s9478_s4 + $0xc0] sm:$0xff] }
  0xcb   :  { %1891 = vmatpush.bf16.msra.mxu3 %v6175_v26  ;;  %v1320_v37 = vadd.f32 %v1319_v34, %v1307_v36  ;;  %1916 = vmatpush.bf16.msrb.mxu2 %v6192_v5  ;;  %v6185_v26 = vld [vmem:[%s9478_s4 + $0x80] sm:$0xff] }
  0xcc   :  { %1604 = vmatmul.bf16.vlgmr.msrb.gmra.mxu0 %v7046_v39  ;;  %v6172_v39 = vld [vmem:[%s9478_s4 + $0x18] sm:$0xff] }
  0xcd   :  { %1904 = vmatpush.bf16.msrb.mxu1 %v6183_v21  ;;  %v1333_v41 = vadd.f32 %v1332_v32, %v1320_v37  ;;  %v1371_v46 = vpop.f32.mrf.mxu2  ;;  %1929 = vmatpush.bf16.msra.mxu0 %v6200_v29  ;;  %v5060_v29 = vld [vmem:[%s9480_s6 + $0x68] sm:$0xf] }
  0xce   :  { %v1372_v62 = vadd.f32 %v1371_v46, %v1359_v61  ;;  %v245_v61 = vperm.slane %v7787_v58, 3 }
  0xcf   :  { %1892 = vmatpush.bf16.msra.mxu3 %v6174_v30  ;;  %v1346_v49 = vadd.f32 %v1345_v28, %v1333_v41  ;;  %1917 = vmatpush.bf16.msrb.mxu2 %v6191_v8  ;;  %v6199_v30 = vld [vmem:[%s9478_s4 + $0xf0] sm:$0xff]  ;;  %v6196_v41 = vld [vmem:[%s9478_s4 + $0xd8] sm:$0xff] }
  0xd1   :  { %1905 = vmatpush.bf16.msrb.mxu1 %v6182_v53  ;;  %v1622_v51 = vmax.f32 %v1346_v49, 0.0  ;;  %v1360_v52 = vpop.f32.mrf.mxu3  ;;  %1930 = vmatpush.bf16.msra.mxu0 %v6199_v30  ;;  %v6216_v30 = vld [vmem:[%s9480_s6 + $0x74] sm:$0xf0] }
  0xd2   :  { %v1321_v42 = vpop.f32.mrf.mxu0 }
  0xd3   :  { %1893 = vmatpush.bf16.msra.mxu3 %v6173_v31  ;;  %v1626_v59 = vpack.c.bf16 %v1622_v51, %v1622_v51  ;;  %1918 = vmatpush.bf16.msrb.mxu2 %v6190_v12  ;;  %v6194_v51 = vld [vmem:[%s9478_s4 + $0xc8] sm:$0xff] }
  0xd4   :  { %4873 = vmatmul.msk.bf16.vlgmr.msra.gmra.mxu1 %vm1254_vm0, %v6947_v48  ;;  %v6178_v48 = vld [vmem:[%s9478_s4 + $0x48] sm:$0xff] }
  0xd5   :  { %1906 = vmatpush.bf16.msrb.mxu1 %v6181_v35  ;;  %v1373_v55 = vpop.f32.mrf.mxu2  ;;  %v6198_v35 = vld [vmem:[%s9478_s4 + $0xe8] sm:$0xff] }
  0xd6   :  { %1931 = vmatpush.bf16.msra.mxu0 %v6198_v35  ;;  %v5038_v35 = vld [vmem:[%s9480_s6 + $0x50] sm:$0xf0] }
  0xd7   :  { %1894 = vmatpush.bf16.msra.mxu3 %v6172_v39  ;;  %1919 = vmatpush.bf16.msrb.mxu2 %v6189_v16  ;;  %v6197_v39 = vld [vmem:[%s9478_s4 + $0xe0] sm:$0xff] }
  0xd9   :  { %1907 = vmatpush.bf16.msrb.mxu1 %v6180_v38 }
  0xda   :  { %1932 = vmatpush.bf16.msra.mxu0 %v6197_v39  ;;  %v6212_v39 = vld [vmem:[%s9480_s6 + $0x54] sm:$0xf0] }
  0xdb   :  { %1895 = vmatpush.bf16.msra.mxu3 %v6171_v40  ;;  %1920 = vmatpush.bf16.msrb.mxu2 %v6188_v20 }
  0xdd   :  { %1908 = vmatpush.bf16.msrb.mxu1 %v6179_v45  ;;  %v6195_v45 = vld [vmem:[%s9478_s4 + $0xd0] sm:$0xff] }
  0xde   :  { %1933 = vmatpush.bf16.msra.mxu0 %v6196_v41 }
  0xdf   :  { %1896 = vmatpush.bf16.msra.mxu3 %v6170_v47  ;;  %1921 = vmatpush.bf16.msrb.mxu2 %v6187_v9 }
  0xe1   :  { %1909 = vmatpush.bf16.msrb.mxu1 %v6178_v48  ;;  %v1384_v63 = vpop.f32.mrf.mxu0  ;;  %v1397_v1 = vpop.f32.mrf.mxu1 }
  0xe2   :  { %v1385_v0 = vadd.f32 %v1384_v63, %v1372_v62  ;;  %1934 = vmatpush.bf16.msra.mxu0 %v6195_v45 }
  0xe3   :  { %1897 = vmatpush.bf16.msra.mxu3 %v6169_v50  ;;  %1922 = vmatpush.bf16.msrb.mxu2 %v6186_v24 }
  0xe4   :  { %v1398_v2 = vadd.f32 %v1397_v1, %v1385_v0 }
  0xe5   :  { %1910 = vmatpush.bf16.msrb.mxu1 %v6177_v54 }
  0xe6   :  { %1898 = vmatmul.bf16.vlgmr.msra.gmra.mxu3 %v1626_v59  ;;  %1935 = vmatpush.bf16.msra.mxu0 %v6194_v51  ;;  %v5022_v51 = vld [vmem:[%s9480_s6 + $0x30] sm:$0xf0] }
  0xe7   :  { %1923 = vmatpush.bf16.msrb.mxu2 %v6185_v26  ;;  %v6215_v26 = vld [vmem:[%s9480_s6 + $0x6c] sm:$0xf0] }
  0xe9   :  { %v1386_v3 = vpop.f32.mrf.mxu0  ;;  %v1410_v4 = vpop.f32.mrf.mxu3 }
  0xea   :  { %v1411_v6 = vadd.f32 %v1410_v4, %v1398_v2  ;;  %v1399_v10 = vpop.f32.mrf.mxu1  ;;  %1936 = vmatpush.bf16.msra.mxu0 %v6193_v56 }
  0xed   :  { %v1423_v7 = vpop.f32.mrf.mxu2 }
  0xee   :  { %v1424_v11 = vadd.f32 %v1423_v7, %v1411_v6 }
  0xf1   :  { %v1436_v13 = vpop.f32.mrf.mxu0  ;;  %v1412_v14 = vpop.f32.mrf.mxu3 }
  0xf2   :  { %v1437_v15 = vadd.f32 %v1436_v13, %v1424_v11 }
  0xf4   :  { %v1623_v17 = vmax.f32 %v1437_v15, 0.0 }
  0xf5   :  { %v1425_v57 = vpop.f32.mrf.mxu2 }
  0xf6   :  { %v1627_v18 = vpack.c.bf16 %v1623_v17, %v1623_v17 }
  0xf8   :  { %1911 = vmatmul.bf16.vlgmr.msrb.gmra.mxu1 %v1627_v18  ;;  %v6444_v18 = vld [vmem:[%s9479_s5] ss:$0 sm:$0xff] }
  0xf9   :  { %v1438_v19 = vpop.f32.mrf.mxu0 }
 0x101   :  { %v1449_v23 = vpop.f32.mrf.mxu1 }
 0x102   :  { %v1450_v32 = vadd.f32 %v1449_v23, %v244_v60  ;;  %v5061_v60 = vor.u32 %v6216_v30, %v5060_v29  ;;  %v6262_v29 = vld [vmem:[%s9482_s8 + $0x168] sm:$0xf0]  ;;  %v6311_v30 = vld [vmem:[%s9482_s8 + $0x2f0] sm:$0xf0] }
 0x104   :  { %2093 = vmatpush.bf16.msra.mxu2 %v5061_v60  ;;  %v5688_v60 = vld [vmem:[%s9482_s8 + $0x4d0] sm:$0xf] }
 0x105   :  { %v1475_v22 = vpop.f32.mrf.mxu0 }
 0x109   :  { %v1462_v25 = vpop.f32.mrf.mxu3  ;;  %v1451_v21 = vpop.f32.mrf.mxu1 }
 0x10a   :  { %v1463_v33 = vadd.f32 %v1462_v25, %v1450_v32  ;;  %v5052_v25 = vld [vmem:[%s9480_s6 + $0x60] sm:$0xf]  ;;  %v5054_v21 = vld [vmem:[%s9480_s6 + $0x70] sm:$0xf0]  ;;  %v6209_v32 = vld [vmem:[%s9480_s6 + $0x44] sm:$0xf] }
 0x10c   :  { %v1476_v37 = vadd.f32 %v1475_v22, %v1463_v33 }
 0x10d   :  { %v1477_v27 = vpop.f32.mrf.mxu0  ;;  %v1488_v28 = vpop.f32.mrf.mxu2 }
 0x10e   :  { %v1489_v40 = vadd.f32 %v1488_v28, %v1476_v37  ;;  %v6213_v27 = vld [vmem:[%s9480_s6 + $0x64] sm:$0xf]  ;;  %v5053_v28 = vor.u32 %v6215_v26, %v5052_v25  ;;  %v5041_v37 = vor.u32 %v6209_v32, %v5038_v35  ;;  %v5212_v32 = vld [vmem:[%s9482_s8 + $0x118] sm:$0xf] }
 0x10f   :  { %v6381_v25 = vld [vmem:[%s9482_s8 + $0x520] sm:$0xf0]  ;;  %v5660_v35 = vld [vmem:[%s9482_s8 + $0x498] sm:$0xf] }
 0x110   :  { %2067 = vmatpush.bf16.msrb.mxu3 %v5053_v28  ;;  %v5436_v28 = vld [vmem:[%s9482_s8 + $0x2d8] sm:$0xf] }
 0x111   :  { %v1464_v53 = vpop.f32.mrf.mxu3 }
 0x112   :  { %v5057_v53 = vor.u32 %v6213_v27, %v5054_v21  ;;  %v5240_v21 = vld [vmem:[%s9482_s8 + $0x150] sm:$0xf] }
 0x114   :  { %2080 = vmatpush.bf16.msra.mxu1 %v5057_v53  ;;  %v5241_v53 = vor.u32 %v6262_v29, %v5240_v21  ;;  %v5296_v21 = vld [vmem:[%s9482_s8 + $0x1c0] sm:$0xf]  ;;  %v6276_v29 = vld [vmem:[%s9482_s8 + $0x1d8] sm:$0xf0] }
 0x115   :  { %v1527_v31 = vpop.f32.mrf.mxu0  ;;  %v1490_v34 = vpop.f32.mrf.mxu2 }
 0x116   :  { %v6211_v34 = vld [vmem:[%s9480_s6 + $0x4c] sm:$0xf0] }
 0x118   :  { %2081 = vmatpush.bf16.msra.mxu1 %v5041_v37  ;;  %v5437_v37 = vor.u32 %v6311_v30, %v5436_v28  ;;  %v6416_v28 = vld [vmem:[%s9482_s8 + $0x638] sm:$0xf0]  ;;  %v6322_v30 = vld [vmem:[%s9482_s8 + $0x34c] sm:$0xf] }
 0x11d   :  { %v1529_v36 = vpop.f32.mrf.mxu0 }
 0x11e   :  { %v5044_v36 = vld [vmem:[%s9480_s6 + $0x48] sm:$0xf] }
 0x121   :  { %v1501_v38 = vpop.f32.mrf.mxu1 }
 0x122   :  { %v1502_v42 = vadd.f32 %v1501_v38, %v1489_v40  ;;  %v5045_v38 = vor.u32 %v6212_v39, %v5044_v36  ;;  %v6367_v36 = vld [vmem:[%s9482_s8 + $0x4b0] sm:$0xf0]  ;;  %v1945_v39 = vld [vmem:[%s9475_s1] sm:$0xff] }
 0x124   :  { %2094 = vmatpush.bf16.msra.mxu2 %v5045_v38  ;;  %v5408_v38 = vld [vmem:[%s9482_s8 + $0x2a0] sm:$0xf] }
 0x129   :  { %v1553_v43 = vpop.f32.mrf.mxu0  ;;  %v1514_v44 = vpop.f32.mrf.mxu3 }
 0x12a   :  { %v1515_v46 = vadd.f32 %v1514_v44, %v1502_v42  ;;  %v1503_v47 = vpop.f32.mrf.mxu1 }
 0x12b   :  { %v5020_v47 = vld [vmem:[%s9480_s6 + $0x20] sm:$0xf] }
 0x12c   :  { %v1528_v49 = vadd.f32 %v1527_v31, %v1515_v46  ;;  %v5036_v31 = vld [vmem:[%s9480_s6 + $0x40] sm:$0xf] }
 0x12d   :  { %v1540_v48 = vpop.f32.mrf.mxu2  ;;  %v5037_v33 = vor.u32 %v6211_v34, %v5036_v31  ;;  %v6374_v31 = vld [vmem:[%s9482_s8 + $0x4e8] sm:$0xf0] }
 0x12e   :  { %v1624_v50 = vmax.f32 %v1528_v49, 0.0  ;;  %v1541_v62 = vadd.f32 %v1540_v48, %v245_v61  ;;  %v6207_v49 = vld [vmem:[%s9480_s6 + $0x2c] sm:$0xf0]  ;;  %v6205_v48 = vld [vmem:[%s9480_s6 + $0x24] sm:$0xf]  ;;  %v5689_v34 = vor.u32 %v6374_v31, %v5688_v60 }
 0x12f   :  { %2068 = vmatpush.bf16.msrb.mxu3 %v5037_v33  ;;  %v6203_v61 = vld [vmem:[%s9480_s6 + $0xc] sm:$0xf0]  ;;  %v6255_v33 = vld [vmem:[%s9482_s8 + $0x130] sm:$0xf0]  ;;  %v5072_v31 = vld [vmem:[%s9482_s8] sm:$0xf] }
 0x130   :  { %v1628_v52 = vpack.c.bf16 %v1624_v50, %v1624_v50  ;;  %v1554_v0 = vadd.f32 %v1553_v43, %v1541_v62  ;;  %v5021_v50 = vor.u32 %v6207_v49, %v5020_v47  ;;  %v6201_v62 = vld [vmem:[%s9480_s6 + $0x4] sm:$0xf]  ;;  %v6248_v47 = vld [vmem:[%s9482_s8 + $0xf8] sm:$0xf0]  ;;  %v5632_v49 = vld [vmem:[%s9482_s8 + $0x460] sm:$0xf] }
 0x131   :  { %v1555_v54 = vpop.f32.mrf.mxu0  ;;  %v1516_v55 = vpop.f32.mrf.mxu3 }
 0x132   :  { %1924 = vmatmul.bf16.vlgmr.msrb.gmra.mxu2 %v1628_v52  ;;  %v5028_v52 = vld [vmem:[%s9480_s6 + $0x28] sm:$0xf]  ;;  %v6208_v54 = vld [vmem:[%s9480_s6 + $0x34] sm:$0xf0]  ;;  %v5025_v55 = vor.u32 %v6205_v48, %v5022_v51 }
 0x133   :  { %v5029_v56 = vor.u32 %v6208_v54, %v5028_v52  ;;  %2069 = vmatpush.bf16.msrb.mxu3 %v5021_v50  ;;  %v6360_v50 = vld [vmem:[%s9482_s8 + $0x478] sm:$0xf0]  ;;  %v5940_v51 = vld [vmem:[%s9482_s8 + $0x6c8] sm:$0xf]  ;;  %v6437_v52 = vld [vmem:[%s9482_s8 + $0x6e0] sm:$0xf0] }
 0x134   :  { %2082 = vmatpush.bf16.msra.mxu1 %v5025_v55  ;;  %v5380_v55 = vld [vmem:[%s9482_s8 + $0x268] sm:$0xf] }
 0x135   :  { %v1542_v59 = vpop.f32.mrf.mxu2  ;;  %2095 = vmatpush.bf16.msra.mxu2 %v5029_v56  ;;  %v6297_v56 = vld [vmem:[%s9482_s8 + $0x280] sm:$0xf0] }
 0x136   :  { %v5004_v59 = vld [vmem:[%s9480_s6] sm:$0xf] }
 0x141   :  { %v1566_v63 = vpop.f32.mrf.mxu1 }
 0x142   :  { %v1567_v1 = vadd.f32 %v1566_v63, %v1554_v0  ;;  %v5005_v63 = vor.u32 %v6203_v61, %v5004_v59  ;;  %v5006_v0 = vld [vmem:[%s9480_s6 + $0x10] sm:$0xf0] }
 0x144   :  { %2070 = vmatpush.bf16.msrb.mxu3 %v5005_v63  ;;  %v5156_v63 = vld [vmem:[%s9482_s8 + $0xa8] sm:$0xf] }
 0x149   :  { %v1579_v2 = vpop.f32.mrf.mxu3  ;;  %v1605_v3 = vpop.f32.mrf.mxu0 }
 0x14a   :  { %v1580_v4 = vadd.f32 %v1579_v2, %v1567_v1  ;;  %v1568_v5 = vpop.f32.mrf.mxu1  ;;  %v5012_v1 = vld [vmem:[%s9480_s6 + $0x8] sm:$0xf]  ;;  %v6204_v2 = vld [vmem:[%s9480_s6 + $0x14] sm:$0xf0] }
 0x14b   :  { %v6214_v5 = vld [vmem:[%s9480_s6 + $0x6c] sm:$0xf] }
 0x14d   :  { %v1592_v6 = vpop.f32.mrf.mxu2 }
 0x14e   :  { %v1593_v7 = vadd.f32 %v1592_v6, %v1580_v4  ;;  %v5013_v4 = vor.u32 %v6204_v2, %v5012_v1  ;;  %v5062_v6 = vld [vmem:[%s9480_s6 + $0x78] sm:$0xf0]  ;;  %v5941_v1 = vor.u32 %v6437_v52, %v5940_v51  ;;  %v5381_v2 = vor.u32 %v6297_v56, %v5380_v55  ;;  %v5242_v55 = vld [vmem:[%s9482_s8 + $0x16c] sm:$0xf0]  ;;  %v6371_v56 = vld [vmem:[%s9482_s8 + $0x4d4] sm:$0xf] }
 0x150   :  { %v1606_v11 = vadd.f32 %v1605_v3, %v1593_v7  ;;  %v5009_v3 = vor.u32 %v6201_v62, %v5006_v0  ;;  %2096 = vmatpush.bf16.msra.mxu2 %v5013_v4  ;;  %v5065_v7 = vor.u32 %v6214_v5, %v5062_v6  ;;  %v5633_v62 = vor.u32 %v6360_v50, %v5632_v49  ;;  %v5604_v0 = vld [vmem:[%s9482_s8 + $0x428] sm:$0xf]  ;;  %v5912_v4 = vld [vmem:[%s9482_s8 + $0x690] sm:$0xf]  ;;  %v6430_v5 = vld [vmem:[%s9482_s8 + $0x6a8] sm:$0xf0] }
 0x151   :  { %v1581_v8 = vpop.f32.mrf.mxu3  ;;  %v1607_v10 = vpop.f32.mrf.mxu0  ;;  %v5352_v6 = vld [vmem:[%s9482_s8 + $0x230] sm:$0xf] }
 0x152   :  { %v1618_v12 = vpop.f32.mrf.mxu1  ;;  %2083 = vmatpush.bf16.msra.mxu1 %v5009_v3  ;;  %v6210_v8 = vld [vmem:[%s9480_s6 + $0x4c] sm:$0xf]  ;;  %v5046_v10 = vld [vmem:[%s9480_s6 + $0x58] sm:$0xf0]  ;;  %2106 = vmatpush.bf16.msra.mxu3 %v5065_v7  ;;  %v6353_v3 = vld [vmem:[%s9482_s8 + $0x440] sm:$0xf0] }
 0x153   :  { %v1619_v13 = vadd.f32 %v1618_v12, %v1606_v11  ;;  %v5049_v11 = vor.u32 %v6210_v8, %v5046_v10  ;;  %v6206_v12 = vld [vmem:[%s9480_s6 + $0x2c] sm:$0xf]  ;;  %v5605_v10 = vor.u32 %v6353_v3, %v5604_v0  ;;  %v6308_v0 = vld [vmem:[%s9482_s8 + $0x2dc] sm:$0xf] }
 0x154   :  { %v6290_v7 = vld [vmem:[%s9482_s8 + $0x248] sm:$0xf0] }
 0x155   :  { %v1594_v14 = vpop.f32.mrf.mxu2  ;;  %v1625_v15 = vmax.f32 %v1619_v13, 0.0  ;;  %v5030_v13 = vld [vmem:[%s9480_s6 + $0x38] sm:$0xf0] }
 0x156   :  { %2107 = vmatpush.bf16.msra.mxu3 %v5049_v11  ;;  %v5033_v14 = vor.u32 %v6206_v12, %v5030_v13  ;;  %v5128_v11 = vld [vmem:[%s9482_s8 + $0x70] sm:$0xf]  ;;  %v6234_v12 = vld [vmem:[%s9482_s8 + $0x88] sm:$0xf0] }
 0x157   :  { %v1629_v57 = vpack.c.bf16 %v1625_v15, %v1625_v15  ;;  %v6202_v15 = vld [vmem:[%s9480_s6 + $0xc] sm:$0xf]  ;;  %v5576_v13 = vld [vmem:[%s9482_s8 + $0x3f0] sm:$0xf] }
 0x159   :  { %1937 = vmatmul.bf16.vlgmr.msra.gmra.mxu0 %v1629_v57  ;;  %v5014_v57 = vld [vmem:[%s9480_s6 + $0x18] sm:$0xf0] }
 0x15a   :  { %v1620_v58 = vpop.f32.mrf.mxu1  ;;  %2108 = vmatpush.bf16.msra.mxu3 %v5033_v14  ;;  %v5913_v14 = vor.u32 %v6430_v5, %v5912_v4  ;;  %v6252_v4 = vld [vmem:[%s9482_s8 + $0x11c] sm:$0xf]  ;;  %v5214_v5 = vld [vmem:[%s9482_s8 + $0x134] sm:$0xf0] }
 0x15b   :  { %v5017_v58 = vor.u32 %v6202_v15, %v5014_v57  ;;  %v5353_v15 = vor.u32 %v6290_v7, %v5352_v6  ;;  %v6346_v57 = vld [vmem:[%s9482_s8 + $0x408] sm:$0xf0]  ;;  %v6364_v6 = vld [vmem:[%s9482_s8 + $0x49c] sm:$0xf] }
 0x15e   :  { %2109 = vmatpush.bf16.msra.mxu3 %v5017_v58  ;;  %v5884_v58 = vld [vmem:[%s9482_s8 + $0x658] sm:$0xf] }
 0x169   :  { %v1899_v16 = vpop.f32.mrf.mxu3 }
 0x16a   :  { %v1900_v19 = vadd.f32 %v6444_v18, %v1899_v16  ;;  %v5492_v16 = vld [vmem:[%s9482_s8 + $0x348] sm:$0xf]  ;;  %v5464_v18 = vld [vmem:[%s9482_s8 + $0x310] sm:$0xf] }
 0x171   :  { %v1901_v17 = vpop.f32.mrf.mxu3 }
 0x172   :  { %v6325_v17 = vld [vmem:[%s9482_s8 + $0x360] sm:$0xf0] }
 0x175   :  { %v1912_v20 = vpop.f32.mrf.mxu1 }
 0x176   :  { %v1913_v9 = vadd.f32 %v1912_v20, %v1900_v19  ;;  %v5493_v19 = vor.u32 %v6325_v17, %v5492_v16  ;;  %v6318_v20 = vld [vmem:[%s9482_s8 + $0x328] sm:$0xf0]  ;;  %v6423_v16 = vld [vmem:[%s9482_s8 + $0x670] sm:$0xf0]  ;;  %v5324_v17 = vld [vmem:[%s9482_s8 + $0x1f8] sm:$0xf] }
 0x177   :  { %v5465_v26 = vor.u32 %v6318_v20, %v5464_v18  ;;  %v6283_v18 = vld [vmem:[%s9482_s8 + $0x210] sm:$0xf0]  ;;  %v5577_v20 = vor.u32 %v6346_v57, %v5576_v13  ;;  %v5410_v13 = vld [vmem:[%s9482_s8 + $0x2bc] sm:$0xf0] }
 0x178   :  { %3560 = vmatpush.bf16.msrb.mxu1 %v5493_v19  ;;  %v5129_v19 = vor.u32 %v6234_v12, %v5128_v11  ;;  %v6395_v11 = vld [vmem:[%s9482_s8 + $0x590] sm:$0xf0]  ;;  %v6301_v12 = vld [vmem:[%s9482_s8 + $0x2a4] sm:$0xf] }
 0x17c   :  { %3561 = vmatpush.bf16.msrb.mxu1 %v5465_v26  ;;  %v6339_v26 = vld [vmem:[%s9482_s8 + $0x3d0] sm:$0xf0] }
 0x17d   :  { %v1914_v22 = vpop.f32.mrf.mxu1 }
 0x17e   :  { %v6269_v22 = vld [vmem:[%s9482_s8 + $0x1a0] sm:$0xf0] }
 0x180   :  { %3562 = vmatpush.bf16.msrb.mxu1 %v5437_v37  ;;  %v6266_v37 = vld [vmem:[%s9482_s8 + $0x18c] sm:$0xf] }
 0x1b5   :  { %v1925_v23 = vpop.f32.mrf.mxu2 }
 0x1b6   :  { %v1926_v40 = vadd.f32 %v1925_v23, %v1913_v9  ;;  %v5268_v9 = vld [vmem:[%s9482_s8 + $0x188] sm:$0xf] }
 0x1b7   :  { %v5269_v23 = vor.u32 %v6269_v22, %v5268_v9  ;;  %v5100_v9 = vld [vmem:[%s9482_s8 + $0x38] sm:$0xf]  ;;  %v6227_v22 = vld [vmem:[%s9482_s8 + $0x50] sm:$0xf0] }
 0x1b8   :  { %v5101_v60 = vor.u32 %v6227_v22, %v5100_v9  ;;  %v6388_v9 = vld [vmem:[%s9482_s8 + $0x558] sm:$0xf0]  ;;  %v6294_v22 = vld [vmem:[%s9482_s8 + $0x26c] sm:$0xf] }
 0x1b9   :  { %3547 = vmatpush.bf16.msrb.mxu0 %v5269_v23  ;;  %v5548_v23 = vld [vmem:[%s9482_s8 + $0x3b8] sm:$0xf] }
 0x1bd   :  { %v1927_v24 = vpop.f32.mrf.mxu2  ;;  %3548 = vmatpush.bf16.msrb.mxu0 %v5241_v53  ;;  %v5494_v53 = vld [vmem:[%s9482_s8 + $0x364] sm:$0xf0] }
 0x1be   :  { %v5716_v24 = vld [vmem:[%s9482_s8 + $0x508] sm:$0xf] }
 0x1bf   :  { %v5717_v27 = vor.u32 %v6381_v25, %v5716_v24  ;;  %v5885_v24 = vor.u32 %v6423_v16, %v5884_v58  ;;  %v5325_v25 = vor.u32 %v6283_v18, %v5324_v17  ;;  %v6245_v58 = vld [vmem:[%s9482_s8 + $0xe4] sm:$0xf]  ;;  %v5186_v16 = vld [vmem:[%s9482_s8 + $0xfc] sm:$0xf0]  ;;  %v5413_v18 = vor.u32 %v6301_v12, %v5410_v13  ;;  %v5830_v12 = vld [vmem:[%s9482_s8 + $0x604] sm:$0xf0] }
 0x1c0   :  { %v6357_v17 = vld [vmem:[%s9482_s8 + $0x464] sm:$0xf] }
 0x1c1   :  { %3573 = vmatpush.bf16.msrb.mxu2 %v5717_v27  ;;  %v5856_v27 = vld [vmem:[%s9482_s8 + $0x620] sm:$0xf] }
 0x1c5   :  { %3574 = vmatpush.bf16.msrb.mxu2 %v5689_v34  ;;  %v5549_v34 = vor.u32 %v6339_v26, %v5548_v23  ;;  %v5382_v23 = vld [vmem:[%s9482_s8 + $0x284] sm:$0xf0] }
 0x1d6   :  { %v1938_v41 = vpop.f32.mrf.mxu0 }
 0x1d7   :  { %v7980_v42 = vadd.f32 %v1938_v41, %v1926_v40  ;;  %v6304_v40 = vld [vmem:[%s9482_s8 + $0x2b8] sm:$0xf0]  ;;  %v5213_v41 = vor.u32 %v6255_v33, %v5212_v32  ;;  %v5520_v33 = vld [vmem:[%s9482_s8 + $0x380] sm:$0xf] }
 0x1d8   :  { %v5409_v48 = vor.u32 %v6304_v40, %v5408_v38  ;;  %v6220_v32 = vld [vmem:[%s9482_s8 + $0x18] sm:$0xf0]  ;;  %v5270_v38 = vld [vmem:[%s9482_s8 + $0x1a4] sm:$0xf0]  ;;  %v6378_v40 = vld [vmem:[%s9482_s8 + $0x50c] sm:$0xf] }
 0x1d9   :  { %v1942_v43 = vmul.f32 0.5, %v7980_v42  ;;  %4053 = vst [vmem:[#allocation4] sm:$0xff] %v7980_v42  ;;  %3549 = vmatpush.bf16.msrb.mxu0 %v5213_v41  ;;  %v5497_v41 = vor.u32 %v6322_v30, %v5494_v53  ;;  %v5073_v49 = vor.u32 %v6220_v32, %v5072_v31  ;;  %v5273_v50 = vor.u32 %v6266_v37, %v5270_v38  ;;  %v6238_v30 = vld [vmem:[%s9482_s8 + $0xac] sm:$0xf]  ;;  %v5158_v53 = vld [vmem:[%s9482_s8 + $0xc4] sm:$0xf0] }
 0x1da   :  { %3563 = vmatpush.bf16.msrb.mxu1 %v5409_v48  ;;  %v5161_v31 = vor.u32 %v6238_v30, %v5158_v53  ;;  %v6434_v32 = vld [vmem:[%s9482_s8 + $0x6cc] sm:$0xf]  ;;  %v5326_v37 = vld [vmem:[%s9482_s8 + $0x214] sm:$0xf0] }
 0x1db   :  { %v1943_v44 = vmul.f32 1.442695, %v1942_v43  ;;  %v5472_v53 = vld [vmem:[%s9482_s8 + $0x318] sm:$0xf] }
 0x1dd   :  { %6445 = vpow2.f32 %v1943_v44  ;;  %v5661_v44 = vor.u32 %v6367_v36, %v5660_v35  ;;  %v6332_v35 = vld [vmem:[%s9482_s8 + $0x398] sm:$0xf0]  ;;  %v5857_v36 = vor.u32 %v6416_v28, %v5856_v27  ;;  %v5385_v27 = vor.u32 %v6294_v22, %v5382_v23  ;;  %v6287_v28 = vld [vmem:[%s9482_s8 + $0x234] sm:$0xf] }
 0x1de   :  { %v1940_v45 = vpop.f32.mrf.mxu0  ;;  %3564 = vmatpush.bf16.msrb.mxu1 %v5381_v2  ;;  %v5521_v48 = vor.u32 %v6332_v35, %v5520_v33  ;;  %v5942_v33 = vld [vmem:[%s9482_s8 + $0x6e4] sm:$0xf0] }
 0x1df   :  { %3575 = vmatpush.bf16.msrb.mxu2 %v5661_v44  ;;  %v5828_v44 = vld [vmem:[%s9482_s8 + $0x5e8] sm:$0xf] }
 0x1e2   :  { %3565 = vmatpush.bf16.msrb.mxu1 %v5353_v15 }
 0x1e3   :  { %v6446_v46 = vpop.eup %6445  ;;  %3576 = vmatpush.bf16.msrb.mxu2 %v5633_v62  ;;  %v5690_v62 = vld [vmem:[%s9482_s8 + $0x4ec] sm:$0xf0] }
 0x1e4   :  { %1947 = vrot.lane.b32.xlu0 %v6446_v46, %s6527_s22  ;;  %v5184_v46 = vld [vmem:[%s9482_s8 + $0xe0] sm:$0xf]  ;;  %v5693_v2 = vor.u32 %v6371_v56, %v5690_v62  ;;  %v5550_v62 = vld [vmem:[%s9482_s8 + $0x3d4] sm:$0xf0] }
 0x1e5   :  { %v5185_v59 = vor.u32 %v6248_v47, %v5184_v46  ;;  %v6315_v46 = vld [vmem:[%s9482_s8 + $0x314] sm:$0xf]  ;;  %v5466_v47 = vld [vmem:[%s9482_s8 + $0x32c] sm:$0xf0] }
 0x1e6   :  { %3566 = vmatpush.bf16.msrb.mxu1 %v5325_v25 }
 0x1e7   :  { %3550 = vmatpush.bf16.msrb.mxu0 %v5185_v59  ;;  %3577 = vmatpush.bf16.msrb.mxu2 %v5605_v10  ;;  %v5469_v59 = vor.u32 %v6315_v46, %v5466_v47  ;;  %v5772_v10 = vld [vmem:[%s9482_s8 + $0x578] sm:$0xf]  ;;  %v6427_v46 = vld [vmem:[%s9482_s8 + $0x694] sm:$0xf]  ;;  %v5914_v47 = vld [vmem:[%s9482_s8 + $0x6ac] sm:$0xf0] }
 0x1e8   :  { %v5773_v57 = vor.u32 %v6395_v11, %v5772_v10  ;;  %v6406_v11 = vld [vmem:[%s9482_s8 + $0x5ec] sm:$0xf] }
 0x1e9   :  { %v5833_v13 = vor.u32 %v6406_v11, %v5830_v12  ;;  %v5192_v11 = vld [vmem:[%s9482_s8 + $0xe8] sm:$0xf]  ;;  %v6249_v12 = vld [vmem:[%s9482_s8 + $0x100] sm:$0xf0] }
 0x1eb   :  { %3578 = vmatpush.bf16.msrb.mxu2 %v5577_v20  ;;  %v5744_v20 = vld [vmem:[%s9482_s8 + $0x540] sm:$0xf] }
 0x1ec   :  { %v5745_v26 = vor.u32 %v6388_v9, %v5744_v20  ;;  %v5746_v20 = vld [vmem:[%s9482_s8 + $0x55c] sm:$0xf0] }
 0x1ef   :  { %3579 = vmatpush.bf16.msrb.mxu2 %v5549_v34  ;;  %v5606_v34 = vld [vmem:[%s9482_s8 + $0x444] sm:$0xf0] }
 0x1f3   :  { %3580 = vmatpush.bf16.msrb.mxu2 %v5521_v48  ;;  %v5917_v48 = vor.u32 %v6427_v46, %v5914_v47 }
 0x256   :  { %v1948_v43 = vpop.permute.xlu0 %1947 }
 0x257   :  { %v1950_v45 = vmul.f32 %v1948_v43, %v1945_v39  ;;  %v5297_v39 = vor.u32 %v6276_v29, %v5296_v21  ;;  %v5718_v43 = vld [vmem:[%s9482_s8 + $0x524] sm:$0xf0]  ;;  %v5354_v21 = vld [vmem:[%s9482_s8 + $0x24c] sm:$0xf0] }
 0x258   :  { %v5721_v51 = vor.u32 %v6378_v40, %v5718_v43  ;;  %v5357_v29 = vor.u32 %v6287_v28, %v5354_v21  ;;  %v6231_v40 = vld [vmem:[%s9482_s8 + $0x74] sm:$0xf] }
 0x259   :  { %v1951_v54 = vadd.f32 %v1950_v45, %v7980_v42  ;;  %v6241_v42 = vld [vmem:[%s9482_s8 + $0xc0] sm:$0xf0]  ;;  %3567 = vmatpush.bf16.msrb.mxu1 %v5297_v39  ;;  %v6280_v39 = vld [vmem:[%s9482_s8 + $0x1fc] sm:$0xf]  ;;  %v6343_v43 = vld [vmem:[%s9482_s8 + $0x3f4] sm:$0xf] }
 0x25a   :  { %v5157_v8 = vor.u32 %v6241_v42, %v5156_v63  ;;  %v6409_v45 = vld [vmem:[%s9482_s8 + $0x600] sm:$0xf0]  ;;  %v5800_v63 = vld [vmem:[%s9482_s8 + $0x5b0] sm:$0xf]  ;;  %v6402_v42 = vld [vmem:[%s9482_s8 + $0x5c8] sm:$0xf0]  ;;  %v5329_v38 = vor.u32 %v6280_v39, %v5326_v37 }
 0x25b   :  { %v8132_v61 = vpack.c.bf16 %v1951_v54, %v1951_v54  ;;  %v5829_v52 = vor.u32 %v6409_v45, %v5828_v44  ;;  %v6259_v54 = vld [vmem:[%s9482_s8 + $0x154] sm:$0xf]  ;;  %v5801_v3 = vor.u32 %v6402_v42, %v5800_v63  ;;  %v5578_v45 = vld [vmem:[%s9482_s8 + $0x40c] sm:$0xf0]  ;;  %v6420_v63 = vld [vmem:[%s9482_s8 + $0x65c] sm:$0xf] }
 0x25c   :  { %3551 = vmatpush.bf16.msrb.mxu0 %v5157_v8  ;;  %v5662_v8 = vld [vmem:[%s9482_s8 + $0x4b4] sm:$0xf0] }
 0x25d   :  { %5066 = vmatmul.msk.bf16.vlgmr.msrb.gmra.mxu3 %vm2059_vm1, %v8132_v61  ;;  %5067 = vmatmul.msk.bf16.vlgmr.msra.gmra.mxu1 %vm2059_vm1, %v8132_v61  ;;  %v5665_v15 = vor.u32 %v6364_v6, %v5662_v8  ;;  %v6413_v6 = vld [vmem:[%s9482_s8 + $0x624] sm:$0xf] }
 0x25e   :  { %5068 = vmatmul.msk.bf16.vlgmr.msra.gmra.mxu2 %vm2059_vm1, %v8132_v61  ;;  %3586 = vmatpush.bf16.msrb.mxu3 %v5941_v1  ;;  %v5245_v1 = vor.u32 %v6259_v54, %v5242_v55  ;;  %v6224_v54 = vld [vmem:[%s9482_s8 + $0x3c] sm:$0xf]  ;;  %v5102_v55 = vld [vmem:[%s9482_s8 + $0x54] sm:$0xf0] }
 0x25f   :  { %3612 = vmatpush.bf16.msra.mxu1 %v5497_v41  ;;  %3625 = vmatpush.bf16.msra.mxu2 %v5721_v51  ;;  %v5130_v41 = vld [vmem:[%s9482_s8 + $0x8c] sm:$0xf0]  ;;  %v5298_v51 = vld [vmem:[%s9482_s8 + $0x1dc] sm:$0xf0]  ;;  %v5105_v56 = vor.u32 %v6224_v54, %v5102_v55  ;;  %v5696_v54 = vld [vmem:[%s9482_s8 + $0x4d8] sm:$0xf] }
 0x260   :  { %3552 = vmatpush.bf16.msrb.mxu0 %v5129_v19  ;;  %v5634_v19 = vld [vmem:[%s9482_s8 + $0x47c] sm:$0xf0]  ;;  %v5133_v44 = vor.u32 %v6231_v40, %v5130_v41  ;;  %v6382_v40 = vld [vmem:[%s9482_s8 + $0x528] sm:$0xf0]  ;;  %v6375_v55 = vld [vmem:[%s9482_s8 + $0x4f0] sm:$0xf0] }
 0x261   :  { %v5637_v25 = vor.u32 %v6357_v17, %v5634_v19  ;;  %v6385_v19 = vld [vmem:[%s9482_s8 + $0x544] sm:$0xf] }
 0x262   :  { %3587 = vmatpush.bf16.msrb.mxu3 %v5913_v14  ;;  %v5217_v14 = vor.u32 %v6252_v4, %v5214_v5  ;;  %v5522_v5 = vld [vmem:[%s9482_s8 + $0x39c] sm:$0xf0]  ;;  %v5749_v9 = vor.u32 %v6385_v19, %v5746_v20  ;;  %v5164_v20 = vld [vmem:[%s9482_s8 + $0xb0] sm:$0xf] }
 0x263   :  { %3613 = vmatpush.bf16.msra.mxu1 %v5469_v59  ;;  %3626 = vmatpush.bf16.msra.mxu2 %v5693_v2  ;;  %v6336_v59 = vld [vmem:[%s9482_s8 + $0x3bc] sm:$0xf]  ;;  %v5074_v2 = vld [vmem:[%s9482_s8 + $0x1c] sm:$0xf0] }
 0x264   :  { %3553 = vmatpush.bf16.msrb.mxu0 %v5101_v60  ;;  %v6350_v60 = vld [vmem:[%s9482_s8 + $0x42c] sm:$0xf]  ;;  %v5553_v42 = vor.u32 %v6336_v59, %v5550_v62  ;;  %v6305_v59 = vld [vmem:[%s9482_s8 + $0x2c0] sm:$0xf0] }
 0x265   :  { %v5609_v35 = vor.u32 %v6350_v60, %v5606_v34  ;;  %v6319_v60 = vld [vmem:[%s9482_s8 + $0x330] sm:$0xf0] }
 0x266   :  { %3588 = vmatpush.bf16.msrb.mxu3 %v5885_v24  ;;  %v5189_v24 = vor.u32 %v6245_v58, %v5186_v16  ;;  %v6392_v58 = vld [vmem:[%s9482_s8 + $0x57c] sm:$0xf]  ;;  %v5774_v16 = vld [vmem:[%s9482_s8 + $0x594] sm:$0xf0]  ;;  %v5473_v37 = vor.u32 %v6319_v60, %v5472_v53 }
 0x267   :  { %3627 = vmatpush.bf16.msra.mxu2 %v5665_v15  ;;  %v5802_v15 = vld [vmem:[%s9482_s8 + $0x5cc] sm:$0xf0]  ;;  %v5777_v17 = vor.u32 %v6392_v58, %v5774_v16  ;;  %v6291_v58 = vld [vmem:[%s9482_s8 + $0x250] sm:$0xf0] }
 0x268   :  { %3554 = vmatpush.bf16.msrb.mxu0 %v5073_v49  ;;  %v5581_v49 = vor.u32 %v6343_v43, %v5578_v45  ;;  %v5444_v43 = vld [vmem:[%s9482_s8 + $0x2e0] sm:$0xf] }
 0x26a   :  { %3589 = vmatpush.bf16.msrb.mxu3 %v5857_v36  ;;  %v5945_v36 = vor.u32 %v6434_v32, %v5942_v33  ;;  %v5276_v33 = vld [vmem:[%s9482_s8 + $0x190] sm:$0xf] }
 0x26b   :  { %3628 = vmatpush.bf16.msra.mxu2 %v5637_v25  ;;  %v5500_v25 = vld [vmem:[%s9482_s8 + $0x350] sm:$0xf] }
 0x26c   :  { %3599 = vmatpush.bf16.msra.mxu0 %v5273_v50  ;;  %v6273_v50 = vld [vmem:[%s9482_s8 + $0x1c4] sm:$0xf] }
 0x26d   :  { %5069 = vmatmul.msk.bf16.vlgmr.msra.gmra.mxu3 %vm2059_vm1, %v8132_v61  ;;  %v5438_v61 = vld [vmem:[%s9482_s8 + $0x2f4] sm:$0xf0] }
 0x26e   :  { %3590 = vmatpush.bf16.msrb.mxu3 %v5829_v52  ;;  %v5441_v7 = vor.u32 %v6308_v0, %v5438_v61  ;;  %v5301_v52 = vor.u32 %v6273_v50, %v5298_v51  ;;  %v5886_v0 = vld [vmem:[%s9482_s8 + $0x674] sm:$0xf0]  ;;  %v6263_v50 = vld [vmem:[%s9482_s8 + $0x170] sm:$0xf0] }
 0x26f   :  { %3629 = vmatpush.bf16.msra.mxu2 %v5609_v35  ;;  %v5889_v61 = vor.u32 %v6420_v63, %v5886_v0  ;;  %v6270_v35 = vld [vmem:[%s9482_s8 + $0x1a8] sm:$0xf0]  ;;  %v5697_v0 = vor.u32 %v6375_v55, %v5696_v54  ;;  %v6340_v55 = vld [vmem:[%s9482_s8 + $0x3d8] sm:$0xf0] }
 0x270   :  { %3600 = vmatpush.bf16.msra.mxu0 %v5245_v1  ;;  %3614 = vmatpush.bf16.msra.mxu1 %v5441_v7  ;;  %v6217_v1 = vld [vmem:[%s9482_s8 + $0x4] sm:$0xf]  ;;  %v5858_v7 = vld [vmem:[%s9482_s8 + $0x63c] sm:$0xf0]  ;;  %v5277_v46 = vor.u32 %v6270_v35, %v5276_v33  ;;  %v5584_v33 = vld [vmem:[%s9482_s8 + $0x3f8] sm:$0xf] }
 0x271   :  { %v5077_v4 = vor.u32 %v6217_v1, %v5074_v2  ;;  %v5861_v10 = vor.u32 %v6413_v6, %v5858_v7  ;;  %v6256_v1 = vld [vmem:[%s9482_s8 + $0x138] sm:$0xf0]  ;;  %v6298_v6 = vld [vmem:[%s9482_s8 + $0x288] sm:$0xf0] }
 0x272   :  { %3591 = vmatpush.bf16.msrb.mxu3 %v5801_v3  ;;  %v6329_v3 = vld [vmem:[%s9482_s8 + $0x384] sm:$0xf] }
 0x273   :  { %3630 = vmatpush.bf16.msra.mxu2 %v5581_v49  ;;  %v5525_v8 = vor.u32 %v6329_v3, %v5522_v5  ;;  %v5668_v3 = vld [vmem:[%s9482_s8 + $0x4a0] sm:$0xf]  ;;  %v5388_v5 = vld [vmem:[%s9482_s8 + $0x270] sm:$0xf] }
 0x274   :  { %3601 = vmatpush.bf16.msra.mxu0 %v5217_v14  ;;  %3615 = vmatpush.bf16.msra.mxu1 %v5413_v18  ;;  %v6399_v14 = vld [vmem:[%s9482_s8 + $0x5b4] sm:$0xf]  ;;  %v8439_v18 = vld [vmem:[%s9481_s7] sm:$0xf] }
 0x275   :  { %v1972_v22 = vperm.slane %v8439_v18, 1  ;;  %v1971_v28 = vperm.slane %v8439_v18, 0  ;;  %v1973_v21 = vperm.slane %v8439_v18, 2 }
 0x276   :  { %3592 = vmatpush.bf16.msrb.mxu3 %v5773_v57  ;;  %v5805_v57 = vor.u32 %v6399_v14, %v5802_v15  ;;  %v5640_v14 = vld [vmem:[%s9482_s8 + $0x468] sm:$0xf]  ;;  %v6361_v15 = vld [vmem:[%s9482_s8 + $0x480] sm:$0xf0] }
 0x277   :  { %3631 = vmatpush.bf16.msra.mxu2 %v5553_v42  ;;  %v5641_v19 = vor.u32 %v6361_v15, %v5640_v14  ;;  %v6309_v15 = vld [vmem:[%s9482_s8 + $0x2e4] sm:$0xf] }
 0x278   :  { %3602 = vmatpush.bf16.msra.mxu0 %v5189_v24  ;;  %3616 = vmatpush.bf16.msra.mxu1 %v5385_v27 }
 0x27a   :  { %3593 = vmatpush.bf16.msrb.mxu3 %v5745_v26  ;;  %v6326_v26 = vld [vmem:[%s9482_s8 + $0x368] sm:$0xf0] }
 0x27b   :  { %3632 = vmatpush.bf16.msra.mxu2 %v5525_v8 }
 0x27c   :  { %3617 = vmatpush.bf16.msra.mxu1 %v5357_v29  ;;  %3603 = vmatpush.bf16.msra.mxu0 %v5161_v31  ;;  %v5501_v29 = vor.u32 %v6326_v26, %v5500_v25  ;;  %v5948_v25 = vld [vmem:[%s9482_s8 + $0x6d0] sm:$0xf]  ;;  %v6438_v26 = vld [vmem:[%s9482_s8 + $0x6e8] sm:$0xf0] }
 0x27e   :  { %3638 = vmatpush.bf16.msra.mxu3 %v5945_v36 }
 0x280   :  { %3618 = vmatpush.bf16.msra.mxu1 %v5329_v38  ;;  %3604 = vmatpush.bf16.msra.mxu0 %v5133_v44  ;;  %v5724_v38 = vld [vmem:[%s9482_s8 + $0x510] sm:$0xf]  ;;  %v6312_v44 = vld [vmem:[%s9482_s8 + $0x2f8] sm:$0xf0] }
 0x281   :  { %v5725_v49 = vor.u32 %v6382_v40, %v5724_v38  ;;  %v5304_v38 = vld [vmem:[%s9482_s8 + $0x1c8] sm:$0xf]  ;;  %v6277_v40 = vld [vmem:[%s9482_s8 + $0x1e0] sm:$0xf0] }
 0x282   :  { %3639 = vmatpush.bf16.msra.mxu3 %v5917_v48  ;;  %v5248_v48 = vld [vmem:[%s9482_s8 + $0x158] sm:$0xf]  ;;  %v5305_v54 = vor.u32 %v6277_v40, %v5304_v38 }
 0x283   :  { %v5249_v63 = vor.u32 %v6263_v50, %v5248_v48  ;;  %v5108_v48 = vld [vmem:[%s9482_s8 + $0x40] sm:$0xf]  ;;  %v6228_v50 = vld [vmem:[%s9482_s8 + $0x58] sm:$0xf0] }
 0x284   :  { %3619 = vmatpush.bf16.msra.mxu1 %v5301_v52  ;;  %3605 = vmatpush.bf16.msra.mxu0 %v5105_v56  ;;  %v5445_v52 = vor.u32 %v6312_v44, %v5444_v43  ;;  %v5416_v56 = vld [vmem:[%s9482_s8 + $0x2a8] sm:$0xf]  ;;  %v6323_v44 = vld [vmem:[%s9482_s8 + $0x354] sm:$0xf] }
 0x285   :  { %v5417_v2 = vor.u32 %v6305_v59, %v5416_v56  ;;  %v5892_v56 = vld [vmem:[%s9482_s8 + $0x660] sm:$0xf]  ;;  %v6424_v59 = vld [vmem:[%s9482_s8 + $0x678] sm:$0xf0] }
 0x286   :  { %3640 = vmatpush.bf16.msra.mxu3 %v5889_v61  ;;  %v5220_v61 = vld [vmem:[%s9482_s8 + $0x120] sm:$0xf] }
 0x287   :  { %v5221_v7 = vor.u32 %v6256_v1, %v5220_v61  ;;  %v5080_v61 = vld [vmem:[%s9482_s8 + $0x8] sm:$0xf] }
 0x288   :  { %3606 = vmatpush.bf16.msra.mxu0 %v5077_v4  ;;  %v6368_v4 = vld [vmem:[%s9482_s8 + $0x4b8] sm:$0xf0] }
 0x289   :  { %v5669_v8 = vor.u32 %v6368_v4, %v5668_v3  ;;  %v6221_v3 = vld [vmem:[%s9482_s8 + $0x20] sm:$0xf0]  ;;  %v5528_v4 = vld [vmem:[%s9482_s8 + $0x388] sm:$0xf] }
 0x28a   :  { %3641 = vmatpush.bf16.msra.mxu3 %v5861_v10  ;;  %v1974_v10 = vperm.slane %v8439_v18, 3  ;;  %v5081_v14 = vor.u32 %v6221_v3, %v5080_v61  ;;  %v6435_v3 = vld [vmem:[%s9482_s8 + $0x6d4] sm:$0xf] }
 0x28e   :  { %3642 = vmatpush.bf16.msra.mxu3 %v5833_v13  ;;  %v5389_v13 = vor.u32 %v6298_v6, %v5388_v5  ;;  %v6333_v5 = vld [vmem:[%s9482_s8 + $0x3a0] sm:$0xf0]  ;;  %v5864_v6 = vld [vmem:[%s9482_s8 + $0x628] sm:$0xf] }
 0x292   :  { %3643 = vmatpush.bf16.msra.mxu3 %v5805_v57  ;;  %v5360_v57 = vld [vmem:[%s9482_s8 + $0x238] sm:$0xf] }
 0x296   :  { %3644 = vmatpush.bf16.msra.mxu3 %v5777_v17  ;;  %v5193_v17 = vor.u32 %v6249_v12, %v5192_v11  ;;  %v5278_v11 = vld [vmem:[%s9482_s8 + $0x1ac] sm:$0xf0]  ;;  %v6379_v12 = vld [vmem:[%s9482_s8 + $0x514] sm:$0xf] }
 0x29a   :  { %3645 = vmatpush.bf16.msra.mxu3 %v5749_v9  ;;  %v6242_v9 = vld [vmem:[%s9482_s8 + $0xc8] sm:$0xf0] }
 0x2da   :  { %v2085_v23 = vpop.f32.mrf.mxu1 }
 0x2db   :  { %v2086_v24 = vadd.f32 %v2085_v23, %v1972_v22  ;;  %v5612_v22 = vld [vmem:[%s9482_s8 + $0x430] sm:$0xf]  ;;  %v5361_v23 = vor.u32 %v6291_v58, %v5360_v57  ;;  %v5446_v57 = vld [vmem:[%s9482_s8 + $0x2fc] sm:$0xf0]  ;;  %v5529_v58 = vor.u32 %v6333_v5, %v5528_v4  ;;  %v6281_v5 = vld [vmem:[%s9482_s8 + $0x204] sm:$0xf] }
 0x2dc   :  { %v5950_v4 = vld [vmem:[%s9482_s8 + $0x6ec] sm:$0xf0] }
 0x2dd   :  { %v2116_v27 = vmax.f32 %v2086_v24, 0.0  ;;  %v6354_v24 = vld [vmem:[%s9482_s8 + $0x448] sm:$0xf0] }
 0x2de   :  { %v5613_v60 = vor.u32 %v6354_v24, %v5612_v22  ;;  %v5449_v22 = vor.u32 %v6309_v15, %v5446_v57  ;;  %v6372_v24 = vld [vmem:[%s9482_s8 + $0x4dc] sm:$0xf]  ;;  %v5586_v57 = vld [vmem:[%s9482_s8 + $0x414] sm:$0xf0] }
 0x2df   :  { %v8456_v30 = vpack.c.bf16 %v2116_v27, %v2116_v27  ;;  %v6344_v15 = vld [vmem:[%s9482_s8 + $0x3fc] sm:$0xf] }
 0x2e0   :  { %v2072_v31 = vpop.f32.mrf.mxu3 }
 0x2e1   :  { %v2073_v34 = vadd.f32 %v2072_v31, %v1971_v28  ;;  %v2098_v32 = vpop.f32.mrf.mxu2  ;;  %3568 = vmatmul.bf16.vlgmr.msrb.gmra.mxu1 %v8456_v30  ;;  %v5332_v28 = vld [vmem:[%s9482_s8 + $0x200] sm:$0xf]  ;;  %v5949_v31 = vor.u32 %v6438_v26, %v5948_v25  ;;  %v5698_v25 = vld [vmem:[%s9482_s8 + $0x4f4] sm:$0xf0]  ;;  %v6302_v26 = vld [vmem:[%s9482_s8 + $0x2ac] sm:$0xf] }
 0x2e2   :  { %v2099_v36 = vadd.f32 %v2098_v32, %v1973_v21  ;;  %3664 = vmatpush.bf16.msrb.mxu1 %v5501_v29  ;;  %v2087_v39 = vpop.f32.mrf.mxu1  ;;  %v6284_v21 = vld [vmem:[%s9482_s8 + $0x218] sm:$0xf0]  ;;  %v5165_v29 = vor.u32 %v6242_v9, %v5164_v20  ;;  %v6235_v32 = vld [vmem:[%s9482_s8 + $0x90] sm:$0xf0]  ;;  %v6410_v20 = vld [vmem:[%s9482_s8 + $0x608] sm:$0xf0] }
 0x2e3   :  { %v2115_v41 = vmax.f32 %v2073_v34, 0.0  ;;  %v5136_v34 = vld [vmem:[%s9482_s8 + $0x78] sm:$0xf]  ;;  %v5333_v35 = vor.u32 %v6284_v21, %v5332_v28  ;;  %v6260_v9 = vld [vmem:[%s9482_s8 + $0x15c] sm:$0xf] }
 0x2e4   :  { %v2117_v45 = vmax.f32 %v2099_v36, 0.0  ;;  %v6347_v36 = vld [vmem:[%s9482_s8 + $0x410] sm:$0xf0]  ;;  %v5920_v39 = vld [vmem:[%s9482_s8 + $0x698] sm:$0xf]  ;;  %v5137_v43 = vor.u32 %v6235_v32, %v5136_v34 }
 0x2e5   :  { %v8483_v47 = vpack.c.bf16 %v2115_v41, %v2115_v41  ;;  %v6253_v34 = vld [vmem:[%s9482_s8 + $0x124] sm:$0xf] }
 0x2e6   :  { %v8491_v51 = vpack.c.bf16 %v2117_v45, %v2117_v45  ;;  %3665 = vmatpush.bf16.msrb.mxu1 %v5473_v37  ;;  %v6431_v37 = vld [vmem:[%s9482_s8 + $0x6b0] sm:$0xf0]  ;;  %v5502_v45 = vld [vmem:[%s9482_s8 + $0x36c] sm:$0xf0] }
 0x2e7   :  { %3555 = vmatmul.bf16.vlgmr.msrb.gmra.mxu0 %v8483_v47 }
 0x2e8   :  { %3581 = vmatmul.bf16.vlgmr.msrb.gmra.mxu2 %v8491_v51  ;;  %3651 = vmatpush.bf16.msrb.mxu0 %v5277_v46  ;;  %v2074_v62 = vpop.f32.mrf.mxu3  ;;  %v5585_v46 = vor.u32 %v6347_v36, %v5584_v33  ;;  %v5222_v33 = vld [vmem:[%s9482_s8 + $0x13c] sm:$0xf0] }
 0x2e9   :  { %3677 = vmatpush.bf16.msrb.mxu2 %v5725_v49  ;;  %v2100_v42 = vpop.f32.mrf.mxu2  ;;  %v5921_v49 = vor.u32 %v6431_v37, %v5920_v39  ;;  %v5505_v62 = vor.u32 %v6323_v44, %v5502_v45  ;;  %v5670_v36 = vld [vmem:[%s9482_s8 + $0x4bc] sm:$0xf0]  ;;  %v6295_v39 = vld [vmem:[%s9482_s8 + $0x274] sm:$0xf]  ;;  %v5390_v37 = vld [vmem:[%s9482_s8 + $0x28c] sm:$0xf0]  ;;  %v5225_v40 = vor.u32 %v6253_v34, %v5222_v33 }
 0x2ea   :  { %3666 = vmatpush.bf16.msrb.mxu1 %v5445_v52  ;;  %v5556_v52 = vld [vmem:[%s9482_s8 + $0x3c0] sm:$0xf]  ;;  %v6316_v42 = vld [vmem:[%s9482_s8 + $0x31c] sm:$0xf]  ;;  %v6246_v45 = vld [vmem:[%s9482_s8 + $0xec] sm:$0xf] }
 0x2eb   :  { %v5557_v1 = vor.u32 %v6340_v55, %v5556_v52  ;;  %v6396_v44 = vld [vmem:[%s9482_s8 + $0x598] sm:$0xf0] }
 0x2ec   :  { %3652 = vmatpush.bf16.msrb.mxu0 %v5249_v63  ;;  %v5109_v63 = vor.u32 %v6228_v50, %v5108_v48  ;;  %v6358_v48 = vld [vmem:[%s9482_s8 + $0x46c] sm:$0xf]  ;;  %v5642_v50 = vld [vmem:[%s9482_s8 + $0x484] sm:$0xf0]  ;;  %v6288_v52 = vld [vmem:[%s9482_s8 + $0x23c] sm:$0xf] }
 0x2ed   :  { %3678 = vmatpush.bf16.msrb.mxu2 %v5697_v0  ;;  %v5474_v0 = vld [vmem:[%s9482_s8 + $0x334] sm:$0xf0]  ;;  %v6320_v34 = vld [vmem:[%s9482_s8 + $0x338] sm:$0xf0] }
 0x2ee   :  { %3667 = vmatpush.bf16.msrb.mxu1 %v5417_v2  ;;  %v5893_v2 = vor.u32 %v6424_v59, %v5892_v56  ;;  %v5752_v56 = vld [vmem:[%s9482_s8 + $0x548] sm:$0xf] }
 0x2f0   :  { %3653 = vmatpush.bf16.msrb.mxu0 %v5221_v7  ;;  %v2111_v16 = vpop.f32.mrf.mxu3  ;;  %v6417_v7 = vld [vmem:[%s9482_s8 + $0x640] sm:$0xf0] }
 0x2f1   :  { %3679 = vmatpush.bf16.msrb.mxu2 %v5669_v8  ;;  %v2112_v18 = vadd.f32 %v2111_v16, %v1974_v10  ;;  %3620 = vmatmul.bf16.vlgmr.msra.gmra.mxu1 %v8456_v30  ;;  %v6267_v8 = vld [vmem:[%s9482_s8 + $0x194] sm:$0xf]  ;;  %v5477_v10 = vor.u32 %v6316_v42, %v5474_v0  ;;  %v5865_v16 = vor.u32 %v6417_v7, %v5864_v6  ;;  %v5166_v0 = vld [vmem:[%s9482_s8 + $0xcc] sm:$0xf0]  ;;  %v5334_v6 = vld [vmem:[%s9482_s8 + $0x21c] sm:$0xf0] }
 0x2f2   :  { %3668 = vmatpush.bf16.msrb.mxu1 %v5389_v13  ;;  %v5726_v13 = vld [vmem:[%s9482_s8 + $0x52c] sm:$0xf0]  ;;  %v6239_v42 = vld [vmem:[%s9482_s8 + $0xb4] sm:$0xf] }
 0x2f3   :  { %v2118_v27 = vmax.f32 %v2112_v18, 0.0  ;;  %v5729_v18 = vor.u32 %v6379_v12, %v5726_v13  ;;  %v5138_v12 = vld [vmem:[%s9482_s8 + $0x94] sm:$0xf0]  ;;  %v5953_v13 = vor.u32 %v6435_v3, %v5950_v4  ;;  %v5424_v3 = vld [vmem:[%s9482_s8 + $0x2b0] sm:$0xf] }
 0x2f4   :  { %3654 = vmatpush.bf16.msrb.mxu0 %v5193_v17  ;;  %v5281_v17 = vor.u32 %v6267_v8, %v5278_v11  ;;  %v5169_v8 = vor.u32 %v6239_v42, %v5166_v0  ;;  %v6232_v11 = vld [vmem:[%s9482_s8 + $0x7c] sm:$0xf]  ;;  %v5256_v0 = vld [vmem:[%s9482_s8 + $0x160] sm:$0xf]  ;;  %v6306_v4 = vld [vmem:[%s9482_s8 + $0x2c8] sm:$0xf0] }
 0x2f5   :  { %v8569_v53 = vpack.c.bf16 %v2118_v27, %v2118_v27  ;;  %3680 = vmatpush.bf16.msrb.mxu2 %v5641_v19  ;;  %v5836_v19 = vld [vmem:[%s9482_s8 + $0x5f0] sm:$0xf]  ;;  %v5418_v27 = vld [vmem:[%s9482_s8 + $0x2c4] sm:$0xf0] }
 0x2f6   :  { %3669 = vmatpush.bf16.msrb.mxu1 %v5361_v23  ;;  %v5250_v23 = vld [vmem:[%s9482_s8 + $0x174] sm:$0xf0]  ;;  %v5837_v28 = vor.u32 %v6410_v20, %v5836_v19  ;;  %v5421_v32 = vor.u32 %v6302_v26, %v5418_v27  ;;  %v6327_v20 = vld [vmem:[%s9482_s8 + $0x370] sm:$0xf0]  ;;  %v5110_v26 = vld [vmem:[%s9482_s8 + $0x5c] sm:$0xf0] }
 0x2f7   :  { %3594 = vmatmul.bf16.vlgmr.msrb.gmra.mxu3 %v8569_v53  ;;  %3607 = vmatmul.bf16.vlgmr.msra.gmra.mxu0 %v8483_v47  ;;  %v5253_v21 = vor.u32 %v6260_v9, %v5250_v23  ;;  %v5508_v19 = vld [vmem:[%s9482_s8 + $0x358] sm:$0xf]  ;;  %v5141_v9 = vor.u32 %v6232_v11, %v5138_v12  ;;  %v6225_v23 = vld [vmem:[%s9482_s8 + $0x44] sm:$0xf]  ;;  %v5425_v11 = vor.u32 %v6306_v4, %v5424_v3  ;;  %v5228_v12 = vld [vmem:[%s9482_s8 + $0x128] sm:$0xf] }
 0x2f8   :  { %3633 = vmatmul.bf16.vlgmr.msra.gmra.mxu2 %v8491_v51  ;;  %3655 = vmatpush.bf16.msrb.mxu0 %v5165_v29  ;;  %v2113_v41 = vpop.f32.mrf.mxu3  ;;  %v5701_v29 = vor.u32 %v6372_v24, %v5698_v25  ;;  %v6337_v27 = vld [vmem:[%s9482_s8 + $0x3c4] sm:$0xf]  ;;  %v5564_v3 = vld [vmem:[%s9482_s8 + $0x3c8] sm:$0xf] }
 0x2f9   :  { %3681 = vmatpush.bf16.msrb.mxu2 %v5613_v60  ;;  %3690 = vmatpush.bf16.msrb.mxu3 %v5949_v31  ;;  %v5808_v60 = vld [vmem:[%s9482_s8 + $0x5b8] sm:$0xf]  ;;  %v6403_v31 = vld [vmem:[%s9482_s8 + $0x5d0] sm:$0xf0] }
 0x2fa   :  { %3670 = vmatpush.bf16.msrb.mxu1 %v5333_v35  ;;  %v6365_v35 = vld [vmem:[%s9482_s8 + $0x4a4] sm:$0xf]  ;;  %v5809_v38 = vor.u32 %v6403_v31, %v5808_v60  ;;  %v5894_v60 = vld [vmem:[%s9482_s8 + $0x67c] sm:$0xf0] }
 0x2fb   :  { %v5673_v41 = vor.u32 %v6365_v35, %v5670_v36  ;;  %v5480_v31 = vld [vmem:[%s9482_s8 + $0x320] sm:$0xf]  ;;  %v6218_v35 = vld [vmem:[%s9482_s8 + $0xc] sm:$0xf]  ;;  %v5082_v36 = vld [vmem:[%s9482_s8 + $0x24] sm:$0xf0] }
 0x2fc   :  { %3656 = vmatpush.bf16.msrb.mxu0 %v5137_v43  ;;  %v5780_v43 = vld [vmem:[%s9482_s8 + $0x580] sm:$0xf] }
 0x2fd   :  { %3682 = vmatpush.bf16.msrb.mxu2 %v5585_v46  ;;  %3691 = vmatpush.bf16.msrb.mxu3 %v5921_v49  ;;  %v5393_v46 = vor.u32 %v6295_v39, %v5390_v37  ;;  %v5194_v49 = vld [vmem:[%s9482_s8 + $0x104] sm:$0xf0]  ;;  %v5781_v55 = vor.u32 %v6396_v44, %v5780_v43  ;;  %v6330_v39 = vld [vmem:[%s9482_s8 + $0x38c] sm:$0xf]  ;;  %v5481_v43 = vor.u32 %v6320_v34, %v5480_v31  ;;  %v5284_v44 = vld [vmem:[%s9482_s8 + $0x198] sm:$0xf] }
 0x2fe   :  { %3671 = vmatpush.bf16.msrb.mxu1 %v5305_v54  ;;  %v5362_v54 = vld [vmem:[%s9482_s8 + $0x254] sm:$0xf0]  ;;  %v5197_v59 = vor.u32 %v6246_v45, %v5194_v49  ;;  %v6271_v45 = vld [vmem:[%s9482_s8 + $0x1b0] sm:$0xf0] }
 0x2ff   :  { %v5365_v61 = vor.u32 %v6288_v52, %v5362_v54  ;;  %v6383_v49 = vld [vmem:[%s9482_s8 + $0x530] sm:$0xf0]  ;;  %v5085_v52 = vor.u32 %v6218_v35, %v5082_v36  ;;  %v5620_v35 = vld [vmem:[%s9482_s8 + $0x438] sm:$0xf] }
 0x300   :  { %3657 = vmatpush.bf16.msrb.mxu0 %v5109_v63  ;;  %v6389_v63 = vld [vmem:[%s9482_s8 + $0x560] sm:$0xf0]  ;;  %v6355_v36 = vld [vmem:[%s9482_s8 + $0x450] sm:$0xf0] }
 0x301   :  { %3683 = vmatpush.bf16.msrb.mxu2 %v5557_v1  ;;  %3692 = vmatpush.bf16.msrb.mxu3 %v5893_v2  ;;  %v6351_v1 = vld [vmem:[%s9482_s8 + $0x434] sm:$0xf]  ;;  %v5614_v2 = vld [vmem:[%s9482_s8 + $0x44c] sm:$0xf0]  ;;  %v5753_v7 = vor.u32 %v6389_v63, %v5752_v56  ;;  %v5285_v56 = vor.u32 %v6271_v45, %v5284_v44  ;;  %v5621_v44 = vor.u32 %v6355_v36, %v5620_v35  ;;  %v6373_v35 = vld [vmem:[%s9482_s8 + $0x4e4] sm:$0xf] }
 0x302   :  { %3716 = vmatpush.bf16.msra.mxu1 %v5505_v62  ;;  %v5645_v62 = vor.u32 %v6358_v48, %v5642_v50  ;;  %v5452_v48 = vld [vmem:[%s9482_s8 + $0x2e8] sm:$0xf]  ;;  %v6313_v50 = vld [vmem:[%s9482_s8 + $0x300] sm:$0xf0]  ;;  %v5706_v36 = vld [vmem:[%s9482_s8 + $0x4fc] sm:$0xf0] }
 0x303   :  { %3672 = vmatmul.bf16.vlgmr.msrb.gmra.mxu1 %v8456_v30  ;;  %v5453_v42 = vor.u32 %v6313_v50, %v5452_v48  ;;  %v5592_v48 = vld [vmem:[%s9482_s8 + $0x400] sm:$0xf] }
 0x304   :  { %3658 = vmatpush.bf16.msrb.mxu0 %v5081_v14  ;;  %v5337_v14 = vor.u32 %v6281_v5, %v5334_v6 }
 0x305   :  { %3684 = vmatpush.bf16.msrb.mxu2 %v5529_v58  ;;  %3693 = vmatpush.bf16.msrb.mxu3 %v5865_v16  ;;  %v6428_v58 = vld [vmem:[%s9482_s8 + $0x69c] sm:$0xf]  ;;  %v5922_v16 = vld [vmem:[%s9482_s8 + $0x6b4] sm:$0xf0] }
 0x306   :  { %3717 = vmatpush.bf16.msra.mxu1 %v5477_v10  ;;  %v5617_v10 = vor.u32 %v6351_v1, %v5614_v2  ;;  %v5925_v24 = vor.u32 %v6428_v58, %v5922_v16  ;;  %v5704_v1 = vld [vmem:[%s9482_s8 + $0x4e0] sm:$0xf]  ;;  %v6376_v2 = vld [vmem:[%s9482_s8 + $0x4f8] sm:$0xf0]  ;;  %v6299_v58 = vld [vmem:[%s9482_s8 + $0x290] sm:$0xf0] }
 0x307   :  { %3646 = vmatmul.bf16.vlgmr.msra.gmra.mxu3 %v8569_v53  ;;  %3659 = vmatmul.bf16.vlgmr.msrb.gmra.mxu0 %v8483_v47 }
 0x308   :  { %3703 = vmatpush.bf16.msra.mxu0 %v5281_v17  ;;  %3685 = vmatmul.bf16.vlgmr.msrb.gmra.mxu2 %v8491_v51  ;;  %v6274_v17 = vld [vmem:[%s9482_s8 + $0x1cc] sm:$0xf] }
 0x309   :  { %3729 = vmatpush.bf16.msra.mxu2 %v5729_v18  ;;  %3694 = vmatpush.bf16.msrb.mxu3 %v5837_v28  ;;  %v5306_v18 = vld [vmem:[%s9482_s8 + $0x1e4] sm:$0xf0]  ;;  %v5558_v28 = vld [vmem:[%s9482_s8 + $0x3dc] sm:$0xf0] }
 0x30a   :  { %3718 = vmatpush.bf16.msra.mxu1 %v5449_v22  ;;  %v5589_v22 = vor.u32 %v6344_v15, %v5586_v57  ;;  %v5309_v25 = vor.u32 %v6274_v17, %v5306_v18  ;;  %v5561_v33 = vor.u32 %v6337_v27, %v5558_v28  ;;  %v6369_v15 = vld [vmem:[%s9482_s8 + $0x4c0] sm:$0xf0]  ;;  %v5396_v57 = vld [vmem:[%s9482_s8 + $0x278] sm:$0xf]  ;;  %v6292_v27 = vld [vmem:[%s9482_s8 + $0x258] sm:$0xf0] }
 0x30b   :  { %v6393_v18 = vld [vmem:[%s9482_s8 + $0x584] sm:$0xf] }
 0x30c   :  { %3704 = vmatpush.bf16.msra.mxu0 %v5253_v21  ;;  %v5509_v21 = vor.u32 %v6327_v20, %v5508_v19  ;;  %v5782_v19 = vld [vmem:[%s9482_s8 + $0x59c] sm:$0xf0] }
 0x30d   :  { %3730 = vmatpush.bf16.msra.mxu2 %v5701_v29  ;;  %3695 = vmatpush.bf16.msrb.mxu3 %v5809_v38  ;;  %v6421_v29 = vld [vmem:[%s9482_s8 + $0x664] sm:$0xf]  ;;  %v5530_v38 = vld [vmem:[%s9482_s8 + $0x3a4] sm:$0xf0]  ;;  %v5785_v28 = vor.u32 %v6393_v18, %v5782_v19  ;;  %v6418_v18 = vld [vmem:[%s9482_s8 + $0x648] sm:$0xf0] }
 0x30e   :  { %3719 = vmatpush.bf16.msra.mxu1 %v5421_v32  ;;  %v5113_v32 = vor.u32 %v6225_v23, %v5110_v26  ;;  %v5897_v37 = vor.u32 %v6421_v29, %v5894_v60  ;;  %v5533_v54 = vor.u32 %v6330_v39, %v5530_v38  ;;  %v6250_v23 = vld [vmem:[%s9482_s8 + $0x108] sm:$0xf0]  ;;  %v5368_v26 = vld [vmem:[%s9482_s8 + $0x240] sm:$0xf]  ;;  %v5754_v60 = vld [vmem:[%s9482_s8 + $0x564] sm:$0xf0] }
 0x30f   :  { %v6386_v29 = vld [vmem:[%s9482_s8 + $0x54c] sm:$0xf]  ;;  %v5369_v34 = vor.u32 %v6292_v27, %v5368_v26  ;;  %v5956_v39 = vld [vmem:[%s9482_s8 + $0x6d8] sm:$0xf]  ;;  %v5340_v38 = vld [vmem:[%s9482_s8 + $0x208] sm:$0xf] }
 0x310   :  { %3705 = vmatpush.bf16.msra.mxu0 %v5225_v40  ;;  %v6414_v40 = vld [vmem:[%s9482_s8 + $0x62c] sm:$0xf]  ;;  %v6268_v19 = vld [vmem:[%s9482_s8 + $0x19c] sm:$0xf]  ;;  %v5454_v26 = vld [vmem:[%s9482_s8 + $0x304] sm:$0xf0] }
 0x311   :  { %3731 = vmatpush.bf16.msra.mxu2 %v5673_v41  ;;  %3696 = vmatpush.bf16.msrb.mxu3 %v5781_v55  ;;  %v5866_v41 = vld [vmem:[%s9482_s8 + $0x644] sm:$0xf0] }
 0x312   :  { %3720 = vmatpush.bf16.msra.mxu1 %v5393_v46  ;;  %v5732_v46 = vld [vmem:[%s9482_s8 + $0x518] sm:$0xf]  ;;  %v5869_v55 = vor.u32 %v6414_v40, %v5866_v41  ;;  %v6285_v40 = vld [vmem:[%s9482_s8 + $0x220] sm:$0xf0]  ;;  %v5757_v41 = vor.u32 %v6386_v29, %v5754_v60 }
 0x313   :  { %v5733_v63 = vor.u32 %v6383_v49, %v5732_v46  ;;  %v5144_v46 = vld [vmem:[%s9482_s8 + $0x80] sm:$0xf]  ;;  %v6236_v49 = vld [vmem:[%s9482_s8 + $0x98] sm:$0xf0]  ;;  %v5341_v50 = vor.u32 %v6285_v40, %v5340_v38  ;;  %v5844_v60 = vld [vmem:[%s9482_s8 + $0x5f8] sm:$0xf] }
 0x314   :  { %3706 = vmatpush.bf16.msra.mxu0 %v5197_v59  ;;  %v6407_v59 = vld [vmem:[%s9482_s8 + $0x5f4] sm:$0xf] }
 0x315   :  { %3732 = vmatpush.bf16.msra.mxu2 %v5645_v62  ;;  %3697 = vmatpush.bf16.msrb.mxu3 %v5753_v7  ;;  %v5838_v62 = vld [vmem:[%s9482_s8 + $0x60c] sm:$0xf0]  ;;  %v6400_v7 = vld [vmem:[%s9482_s8 + $0x5bc] sm:$0xf] }
 0x316   :  { %3721 = vmatpush.bf16.msra.mxu1 %v5365_v61  ;;  %v6264_v61 = vld [vmem:[%s9482_s8 + $0x178] sm:$0xf0]  ;;  %v5841_v5 = vor.u32 %v6407_v59, %v5838_v62  ;;  %v6278_v59 = vld [vmem:[%s9482_s8 + $0x1e8] sm:$0xf0]  ;;  %v5145_v62 = vor.u32 %v6236_v49, %v5144_v46  ;;  %v5230_v49 = vld [vmem:[%s9482_s8 + $0x144] sm:$0xf0] }
 0x317   :  { %v5257_v6 = vor.u32 %v6264_v61, %v5256_v0 }
 0x318   :  { %3707 = vmatpush.bf16.msra.mxu0 %v5169_v8  ;;  %3698 = vmatmul.bf16.vlgmr.msrb.gmra.mxu3 %v8569_v53  ;;  %v5810_v8 = vld [vmem:[%s9482_s8 + $0x5d4] sm:$0xf0] }
 0x319   :  { %3733 = vmatpush.bf16.msra.mxu2 %v5617_v10  ;;  %3742 = vmatpush.bf16.msra.mxu3 %v5953_v13  ;;  %v5705_v10 = vor.u32 %v6376_v2, %v5704_v1  ;;  %v6257_v13 = vld [vmem:[%s9482_s8 + $0x140] sm:$0xf0]  ;;  %v5813_v16 = vor.u32 %v6400_v7, %v5810_v8  ;;  %v5116_v1 = vld [vmem:[%s9482_s8 + $0x48] sm:$0xf] }
 0x31a   :  { %3722 = vmatpush.bf16.msra.mxu1 %v5337_v14  ;;  %v5676_v14 = vld [vmem:[%s9482_s8 + $0x4a8] sm:$0xf]  ;;  %v5229_v17 = vor.u32 %v6257_v13, %v5228_v12  ;;  %v6229_v2 = vld [vmem:[%s9482_s8 + $0x60] sm:$0xf0]  ;;  %v5482_v12 = vld [vmem:[%s9482_s8 + $0x33c] sm:$0xf0] }
 0x31b   :  { %v5677_v20 = vor.u32 %v6369_v15, %v5676_v14  ;;  %v6425_v7 = vld [vmem:[%s9482_s8 + $0x680] sm:$0xf0]  ;;  %v5088_v13 = vld [vmem:[%s9482_s8 + $0x10] sm:$0xf] }
 0x31c   :  { %3708 = vmatpush.bf16.msra.mxu0 %v5141_v9  ;;  %v5397_v9 = vor.u32 %v6299_v58, %v5396_v57  ;;  %v6222_v57 = vld [vmem:[%s9482_s8 + $0x28] sm:$0xf0]  ;;  %v5536_v58 = vld [vmem:[%s9482_s8 + $0x390] sm:$0xf] }
 0x31d   :  { %3734 = vmatpush.bf16.msra.mxu2 %v5589_v22  ;;  %3743 = vmatpush.bf16.msra.mxu3 %v5925_v24  ;;  %v5200_v22 = vld [vmem:[%s9482_s8 + $0xf0] sm:$0xf] }
 0x31e   :  { %3723 = vmatpush.bf16.msra.mxu1 %v5309_v25  ;;  %v5648_v24 = vld [vmem:[%s9482_s8 + $0x470] sm:$0xf]  ;;  %v6362_v25 = vld [vmem:[%s9482_s8 + $0x488] sm:$0xf0] }
 0x31f   :  { %v5649_v31 = vor.u32 %v6362_v25, %v5648_v24  ;;  %v5089_v24 = vor.u32 %v6222_v57, %v5088_v13  ;;  %v6310_v25 = vld [vmem:[%s9482_s8 + $0x2ec] sm:$0xf]  ;;  %v6436_v57 = vld [vmem:[%s9482_s8 + $0x6dc] sm:$0xf] }
 0x320   :  { %3709 = vmatpush.bf16.msra.mxu0 %v5113_v32  ;;  %v5172_v32 = vld [vmem:[%s9482_s8 + $0xb8] sm:$0xf] }
 0x321   :  { %3735 = vmatpush.bf16.msra.mxu2 %v5561_v33  ;;  %3744 = vmatpush.bf16.msra.mxu3 %v5897_v37  ;;  %v6243_v33 = vld [vmem:[%s9482_s8 + $0xd0] sm:$0xf0] }
 0x322   :  { %3768 = vmatpush.bf16.msrb.mxu1 %v5509_v21  ;;  %v5201_v21 = vor.u32 %v6250_v23, %v5200_v22  ;;  %v6439_v37 = vld [vmem:[%s9482_s8 + $0x6f0] sm:$0xf0]  ;;  %v6380_v22 = vld [vmem:[%s9482_s8 + $0x51c] sm:$0xf]  ;;  %v5734_v23 = vld [vmem:[%s9482_s8 + $0x534] sm:$0xf0] }
 0x323   :  { %3724 = vmatmul.bf16.vlgmr.msra.gmra.mxu1 %v8456_v30  ;;  %v5957_v45 = vor.u32 %v6439_v37, %v5956_v39  ;;  %v5737_v29 = vor.u32 %v6380_v22, %v5734_v23  ;;  %v6303_v39 = vld [vmem:[%s9482_s8 + $0x2b4] sm:$0xf]  ;;  %v5426_v37 = vld [vmem:[%s9482_s8 + $0x2cc] sm:$0xf0]  ;;  %v5146_v22 = vld [vmem:[%s9482_s8 + $0x9c] sm:$0xf0] }
 0x324   :  { %3710 = vmatpush.bf16.msra.mxu0 %v5085_v52  ;;  %v6348_v52 = vld [vmem:[%s9482_s8 + $0x418] sm:$0xf0]  ;;  %v5429_v46 = vor.u32 %v6303_v39, %v5426_v37  ;;  %v5118_v39 = vld [vmem:[%s9482_s8 + $0x64] sm:$0xf0]  ;;  %v6338_v37 = vld [vmem:[%s9482_s8 + $0x3cc] sm:$0xf] }
 0x325   :  { %3736 = vmatpush.bf16.msra.mxu2 %v5533_v54  ;;  %3745 = vmatpush.bf16.msra.mxu3 %v5869_v55  ;;  %v5928_v54 = vld [vmem:[%s9482_s8 + $0x6a0] sm:$0xf]  ;;  %v6432_v55 = vld [vmem:[%s9482_s8 + $0x6b8] sm:$0xf0]  ;;  %v5593_v0 = vor.u32 %v6348_v52, %v5592_v48  ;;  %v6366_v48 = vld [vmem:[%s9482_s8 + $0x4ac] sm:$0xf] }
 0x326   :  { %3769 = vmatpush.bf16.msrb.mxu1 %v5481_v43  ;;  %v5173_v43 = vor.u32 %v6243_v33, %v5172_v32  ;;  %v5929_v61 = vor.u32 %v6432_v55, %v5928_v54  ;;  %v5457_v32 = vor.u32 %v6310_v25, %v5454_v26  ;;  %v5258_v33 = vld [vmem:[%s9482_s8 + $0x17c] sm:$0xf0]  ;;  %v6296_v52 = vld [vmem:[%s9482_s8 + $0x27c] sm:$0xf]  ;;  %v5398_v54 = vld [vmem:[%s9482_s8 + $0x294] sm:$0xf0] }
 0x327   :  { %3711 = vmatmul.bf16.vlgmr.msra.gmra.mxu0 %v8483_v47  ;;  %v6345_v25 = vld [vmem:[%s9482_s8 + $0x404] sm:$0xf]  ;;  %v5594_v26 = vld [vmem:[%s9482_s8 + $0x41c] sm:$0xf0] }
 0x328   :  { %3755 = vmatpush.bf16.msrb.mxu0 %v5285_v56  ;;  %3737 = vmatmul.bf16.vlgmr.msra.gmra.mxu2 %v8491_v51  ;;  %v5312_v56 = vld [vmem:[%s9482_s8 + $0x1d0] sm:$0xf] }
 0x329   :  { %3781 = vmatpush.bf16.msrb.mxu2 %v5733_v63  ;;  %3746 = vmatpush.bf16.msra.mxu3 %v5841_v5  ;;  %v6324_v63 = vld [vmem:[%s9482_s8 + $0x35c] sm:$0xf]  ;;  %v5313_v4 = vor.u32 %v6278_v59, %v5312_v56  ;;  %v6341_v5 = vld [vmem:[%s9482_s8 + $0x3e0] sm:$0xf0] }
 0x32a   :  { %3770 = vmatpush.bf16.msrb.mxu1 %v5453_v42  ;;  %v5510_v42 = vld [vmem:[%s9482_s8 + $0x374] sm:$0xf0]  ;;  %v5565_v14 = vor.u32 %v6341_v5, %v5564_v3  ;;  %v6289_v3 = vld [vmem:[%s9482_s8 + $0x244] sm:$0xf] }
 0x32b   :  { %v5513_v8 = vor.u32 %v6324_v63, %v5510_v42  ;;  %v6397_v63 = vld [vmem:[%s9482_s8 + $0x5a0] sm:$0xf0]  ;;  %v6247_v42 = vld [vmem:[%s9482_s8 + $0xf4] sm:$0xf] }
 0x32c   :  { %3756 = vmatpush.bf16.msrb.mxu0 %v5257_v6  ;;  %v5900_v6 = vld [vmem:[%s9482_s8 + $0x668] sm:$0xf] }
 0x32d   :  { %3782 = vmatpush.bf16.msrb.mxu2 %v5705_v10  ;;  %3747 = vmatpush.bf16.msra.mxu3 %v5813_v16  ;;  %v5117_v10 = vor.u32 %v6229_v2, %v5116_v1  ;;  %v5901_v15 = vor.u32 %v6425_v7, %v5900_v6  ;;  %v6334_v16 = vld [vmem:[%s9482_s8 + $0x3a8] sm:$0xf0]  ;;  %v6359_v1 = vld [vmem:[%s9482_s8 + $0x474] sm:$0xf]  ;;  %v5650_v2 = vld [vmem:[%s9482_s8 + $0x48c] sm:$0xf0] }
 0x32e   :  { %3771 = vmatpush.bf16.msrb.mxu1 %v5425_v11  ;;  %v6317_v11 = vld [vmem:[%s9482_s8 + $0x324] sm:$0xf]  ;;  %v5537_v27 = vor.u32 %v6334_v16, %v5536_v58  ;;  %v5760_v6 = vld [vmem:[%s9482_s8 + $0x550] sm:$0xf]  ;;  %v5958_v58 = vld [vmem:[%s9482_s8 + $0x6f4] sm:$0xf0] }
 0x32f   :  { %v6282_v16 = vld [vmem:[%s9482_s8 + $0x20c] sm:$0xf]  ;;  %v5961_v23 = vor.u32 %v6436_v57, %v5958_v58  ;;  %v5432_v57 = vld [vmem:[%s9482_s8 + $0x2b8] sm:$0xf]  ;;  %v6307_v58 = vld [vmem:[%s9482_s8 + $0x2d0] sm:$0xf0] }
 0x330   :  { %3757 = vmatpush.bf16.msrb.mxu0 %v5229_v17  ;;  %v5872_v17 = vld [vmem:[%s9482_s8 + $0x630] sm:$0xf] }
 0x331   :  { %3783 = vmatpush.bf16.msrb.mxu2 %v5677_v20  ;;  %3748 = vmatpush.bf16.msra.mxu3 %v5785_v28  ;;  %v5485_v20 = vor.u32 %v6317_v11, %v5482_v12  ;;  %v5873_v28 = vor.u32 %v6418_v18, %v5872_v17  ;;  %v6240_v11 = vld [vmem:[%s9482_s8 + $0xbc] sm:$0xf]  ;;  %v5174_v12 = vld [vmem:[%s9482_s8 + $0xd4] sm:$0xf0]  ;;  %v5342_v17 = vld [vmem:[%s9482_s8 + $0x224] sm:$0xf0] }
 0x332   :  { %3772 = vmatpush.bf16.msrb.mxu1 %v5397_v9  ;;  %v5286_v9 = vld [vmem:[%s9482_s8 + $0x1b4] sm:$0xf0] }
 0x334   :  { %3758 = vmatpush.bf16.msrb.mxu0 %v5201_v21  ;;  %v5289_v21 = vor.u32 %v6268_v19, %v5286_v9  ;;  %v5177_v19 = vor.u32 %v6240_v11, %v5174_v12  ;;  %v6233_v9 = vld [vmem:[%s9482_s8 + $0x84] sm:$0xf]  ;;  %v5264_v12 = vld [vmem:[%s9482_s8 + $0x168] sm:$0xf] }
 0x335   :  { %3784 = vmatpush.bf16.msrb.mxu2 %v5649_v31  ;;  %3749 = vmatpush.bf16.msra.mxu3 %v5757_v41  ;;  %v6411_v31 = vld [vmem:[%s9482_s8 + $0x610] sm:$0xf0]  ;;  %v5709_v41 = vor.u32 %v6373_v35, %v5706_v36 }
 0x336   :  { %3773 = vmatpush.bf16.msrb.mxu1 %v5369_v34  ;;  %v6261_v34 = vld [vmem:[%s9482_s8 + $0x164] sm:$0xf]  ;;  %v5845_v38 = vor.u32 %v6411_v31, %v5844_v60  ;;  %v5516_v60 = vld [vmem:[%s9482_s8 + $0x360] sm:$0xf]  ;;  %v6328_v31 = vld [vmem:[%s9482_s8 + $0x378] sm:$0xf0] }
 0x337   :  { %v5261_v40 = vor.u32 %v6261_v34, %v5258_v33  ;;  %v5149_v34 = vor.u32 %v6233_v9, %v5146_v22  ;;  %v6226_v33 = vld [vmem:[%s9482_s8 + $0x4c] sm:$0xf]  ;;  %v5433_v22 = vor.u32 %v6307_v58, %v5432_v57 }
 0x338   :  { %3759 = vmatpush.bf16.msrb.mxu0 %v5173_v43  ;;  %3750 = vmatmul.bf16.vlgmr.msra.gmra.mxu3 %v8569_v53  ;;  %v5816_v43 = vld [vmem:[%s9482_s8 + $0x5c0] sm:$0xf] }
 0x339   :  { %3785 = vmatpush.bf16.msrb.mxu2 %v5621_v44  ;;  %3794 = vmatpush.bf16.msrb.mxu3 %v5957_v45  ;;  %v6404_v44 = vld [vmem:[%s9482_s8 + $0x5d8] sm:$0xf0]  ;;  %v6254_v45 = vld [vmem:[%s9482_s8 + $0x12c] sm:$0xf] }
 0x33a   :  { %3774 = vmatpush.bf16.msrb.mxu1 %v5341_v50  ;;  %v5678_v50 = vld [vmem:[%s9482_s8 + $0x4c4] sm:$0xf0]  ;;  %v5817_v55 = vor.u32 %v6404_v44, %v5816_v43  ;;  %v5233_v56 = vor.u32 %v6254_v45, %v5230_v49  ;;  %v6321_v45 = vld [vmem:[%s9482_s8 + $0x340] sm:$0xf0] }
 0x33b   :  { %v5681_v59 = vor.u32 %v6366_v48, %v5678_v50  ;;  %v5902_v43 = vld [vmem:[%s9482_s8 + $0x684] sm:$0xf0]  ;;  %v6219_v48 = vld [vmem:[%s9482_s8 + $0x14] sm:$0xf]  ;;  %v5090_v50 = vld [vmem:[%s9482_s8 + $0x2c] sm:$0xf0] }
 0x33c   :  { %3760 = vmatpush.bf16.msrb.mxu0 %v5145_v62  ;;  %v5788_v62 = vld [vmem:[%s9482_s8 + $0x588] sm:$0xf] }
 0x33d   :  { %3786 = vmatpush.bf16.msrb.mxu2 %v5593_v0  ;;  %3795 = vmatpush.bf16.msrb.mxu3 %v5929_v61  ;;  %v5401_v0 = vor.u32 %v6296_v52, %v5398_v54  ;;  %v5202_v61 = vld [vmem:[%s9482_s8 + $0x10c] sm:$0xf0]  ;;  %v5789_v5 = vor.u32 %v6397_v63, %v5788_v62  ;;  %v5488_v44 = vld [vmem:[%s9482_s8 + $0x328] sm:$0xf]  ;;  %v6331_v52 = vld [vmem:[%s9482_s8 + $0x394] sm:$0xf] }
 0x33e   :  { %3775 = vmatpush.bf16.msrb.mxu1 %v5313_v4  ;;  %v5370_v4 = vld [vmem:[%s9482_s8 + $0x25c] sm:$0xf0]  ;;  %v5205_v7 = vor.u32 %v6247_v42, %v5202_v61  ;;  %v5489_v62 = vor.u32 %v6321_v45, %v5488_v44  ;;  %v6272_v42 = vld [vmem:[%s9482_s8 + $0x1b8] sm:$0xf0]  ;;  %v6387_v45 = vld [vmem:[%s9482_s8 + $0x554] sm:$0xf] }
 0x33f   :  { %v5373_v13 = vor.u32 %v6289_v3, %v5370_v4  ;;  %v5292_v63 = vld [vmem:[%s9482_s8 + $0x1a0] sm:$0xf]  ;;  %v6384_v61 = vld [vmem:[%s9482_s8 + $0x538] sm:$0xf0]  ;;  %v5093_v3 = vor.u32 %v6219_v48, %v5090_v50 }
 0x340   :  { %3761 = vmatpush.bf16.msrb.mxu0 %v5117_v10  ;;  %v6390_v10 = vld [vmem:[%s9482_s8 + $0x568] sm:$0xf0]  ;;  %v5180_v50 = vld [vmem:[%s9482_s8 + $0xc0] sm:$0xf] }
 0x341   :  { %3787 = vmatpush.bf16.msrb.mxu2 %v5565_v14  ;;  %3796 = vmatpush.bf16.msrb.mxu3 %v5901_v15  ;;  %v6352_v14 = vld [vmem:[%s9482_s8 + $0x43c] sm:$0xf]  ;;  %v5622_v15 = vld [vmem:[%s9482_s8 + $0x454] sm:$0xf0]  ;;  %v5761_v18 = vor.u32 %v6390_v10, %v5760_v6  ;;  %v5293_v6 = vor.u32 %v6272_v42, %v5292_v63  ;;  %v6286_v63 = vld [vmem:[%s9482_s8 + $0x228] sm:$0xf0] }
 0x342   :  { %3820 = vmatpush.bf16.msra.mxu1 %v5513_v8  ;;  %v5653_v8 = vor.u32 %v6359_v1, %v5650_v2  ;;  %v5460_v1 = vld [vmem:[%s9482_s8 + $0x2f0] sm:$0xf]  ;;  %v6314_v2 = vld [vmem:[%s9482_s8 + $0x308] sm:$0xf0]  ;;  %v9365_v42 = vld [vmem:[%s9483_s9] sm:$0x7f] }
 0x343   :  { %3776 = vmatmul.bf16.vlgmr.msrb.gmra.mxu1 %v8456_v30  ;;  %v5461_v11 = vor.u32 %v6314_v2, %v5460_v1 }
 0x344   :  { %3762 = vmatpush.bf16.msrb.mxu0 %v5089_v24  ;;  %v5345_v24 = vor.u32 %v6282_v16, %v5342_v17 }
 0x345   :  { %3788 = vmatpush.bf16.msrb.mxu2 %v5537_v27  ;;  %3797 = vmatpush.bf16.msrb.mxu3 %v5873_v28  ;;  %v6429_v27 = vld [vmem:[%s9482_s8 + $0x6a4] sm:$0xf]  ;;  %v5930_v28 = vld [vmem:[%s9482_s8 + $0x6bc] sm:$0xf0] }
 0x346   :  { %3821 = vmatpush.bf16.msra.mxu1 %v5485_v20  ;;  %v5625_v20 = vor.u32 %v6352_v14, %v5622_v15  ;;  %v5933_v35 = vor.u32 %v6429_v27, %v5930_v28  ;;  %v5712_v14 = vld [vmem:[%s9482_s8 + $0x4e8] sm:$0xf]  ;;  %v6377_v15 = vld [vmem:[%s9482_s8 + $0x500] sm:$0xf0]  ;;  %v5404_v27 = vld [vmem:[%s9482_s8 + $0x280] sm:$0xf] }
 0x347   :  { %3763 = vmatmul.bf16.vlgmr.msrb.gmra.mxu0 %v8483_v47  ;;  %v5713_v9 = vor.u32 %v6377_v15, %v5712_v14  ;;  %v6300_v28 = vld [vmem:[%s9482_s8 + $0x298] sm:$0xf0]  ;;  %v6279_v14 = vld [vmem:[%s9482_s8 + $0x1f0] sm:$0xf0]  ;;  %v2381_v15 = vperm.slane %v9365_v42, 0 }
 0x348   :  { %3807 = vmatpush.bf16.msra.mxu0 %v5289_v21  ;;  %3789 = vmatmul.bf16.vlgmr.msrb.gmra.mxu2 %v8491_v51  ;;  %v6275_v21 = vld [vmem:[%s9482_s8 + $0x1d4] sm:$0xf] }
 0x349   :  { %3833 = vmatpush.bf16.msra.mxu2 %v5737_v29  ;;  %3798 = vmatpush.bf16.msrb.mxu3 %v5845_v38  ;;  %v5314_v29 = vld [vmem:[%s9482_s8 + $0x1ec] sm:$0xf0]  ;;  %v5566_v38 = vld [vmem:[%s9482_s8 + $0x3e4] sm:$0xf0] }
 0x34a   :  { %3822 = vmatpush.bf16.msra.mxu1 %v5457_v32  ;;  %v5597_v32 = vor.u32 %v6345_v25, %v5594_v26  ;;  %v5317_v36 = vor.u32 %v6275_v21, %v5314_v29  ;;  %v5569_v49 = vor.u32 %v6338_v37, %v5566_v38  ;;  %v5684_v25 = vld [vmem:[%s9482_s8 + $0x4b0] sm:$0xf]  ;;  %v6370_v26 = vld [vmem:[%s9482_s8 + $0x4c8] sm:$0xf0]  ;;  %v6363_v37 = vld [vmem:[%s9482_s8 + $0x490] sm:$0xf0] }
 0x34b   :  { %v5376_v38 = vld [vmem:[%s9482_s8 + $0x248] sm:$0xf] }
 0x34c   :  { %3808 = vmatpush.bf16.msra.mxu0 %v5261_v40  ;;  %v5517_v40 = vor.u32 %v6328_v31, %v5516_v60  ;;  %v6394_v60 = vld [vmem:[%s9482_s8 + $0x58c] sm:$0xf]  ;;  %v5790_v31 = vld [vmem:[%s9482_s8 + $0x5a4] sm:$0xf0] }
 0x34d   :  { %3834 = vmatpush.bf16.msra.mxu2 %v5709_v41  ;;  %3799 = vmatpush.bf16.msrb.mxu3 %v5817_v55  ;;  %v6422_v41 = vld [vmem:[%s9482_s8 + $0x66c] sm:$0xf]  ;;  %v5538_v55 = vld [vmem:[%s9482_s8 + $0x3ac] sm:$0xf0] }
 0x34e   :  { %3823 = vmatpush.bf16.msra.mxu1 %v5429_v46  ;;  %v5121_v46 = vor.u32 %v6226_v33, %v5118_v39  ;;  %v5905_v54 = vor.u32 %v6422_v41, %v5902_v43  ;;  %v5541_v4 = vor.u32 %v6331_v52, %v5538_v55  ;;  %v5208_v33 = vld [vmem:[%s9482_s8 + $0xf8] sm:$0xf]  ;;  %v5793_v43 = vor.u32 %v6394_v60, %v5790_v31  ;;  %v6244_v52 = vld [vmem:[%s9482_s8 + $0xd8] sm:$0xf0]  ;;  %v6223_v31 = vld [vmem:[%s9482_s8 + $0x30] sm:$0xf0] }
 0x34f   :  { %v6356_v55 = vld [vmem:[%s9482_s8 + $0x458] sm:$0xf0]  ;;  %v5096_v60 = vld [vmem:[%s9482_s8 + $0x18] sm:$0xf] }
 0x350   :  { %3809 = vmatpush.bf16.msra.mxu0 %v5233_v56  ;;  %v6415_v56 = vld [vmem:[%s9482_s8 + $0x634] sm:$0xf] }
 0x351   :  { %3835 = vmatpush.bf16.msra.mxu2 %v5681_v59  ;;  %3800 = vmatpush.bf16.msrb.mxu3 %v5789_v5  ;;  %v5874_v59 = vld [vmem:[%s9482_s8 + $0x64c] sm:$0xf0] }
 0x352   :  { %3824 = vmatpush.bf16.msra.mxu1 %v5401_v0  ;;  %v5740_v0 = vld [vmem:[%s9482_s8 + $0x520] sm:$0xf]  ;;  %v5877_v5 = vor.u32 %v6415_v56, %v5874_v59  ;;  %v6440_v59 = vld [vmem:[%s9482_s8 + $0x6f8] sm:$0xf0] }
 0x353   :  { %v5741_v10 = vor.u32 %v6384_v61, %v5740_v0  ;;  %v5964_v56 = vld [vmem:[%s9482_s8 + $0x6e0] sm:$0xf]  ;;  %v5181_v61 = vor.u32 %v6244_v52, %v5180_v50  ;;  %v6405_v52 = vld [vmem:[%s9482_s8 + $0x5e0] sm:$0xf0] }
 0x354   :  { %3810 = vmatpush.bf16.msra.mxu0 %v5205_v7  ;;  %v6408_v7 = vld [vmem:[%s9482_s8 + $0x5fc] sm:$0xf] }
 0x355   :  { %3836 = vmatpush.bf16.msra.mxu2 %v5653_v8  ;;  %3801 = vmatpush.bf16.msrb.mxu3 %v5761_v18  ;;  %v5846_v8 = vld [vmem:[%s9482_s8 + $0x614] sm:$0xf0] }
 0x356   :  { %3825 = vmatpush.bf16.msra.mxu1 %v5373_v13  ;;  %v6265_v13 = vld [vmem:[%s9482_s8 + $0x180] sm:$0xf0]  ;;  %v5849_v17 = vor.u32 %v6408_v7, %v5846_v8 }
 0x357   :  { %v5265_v18 = vor.u32 %v6265_v13, %v5264_v12  ;;  %v6433_v12 = vld [vmem:[%s9482_s8 + $0x6c0] sm:$0xf0]  ;;  %v5320_v13 = vld [vmem:[%s9482_s8 + $0x1d8] sm:$0xf] }
 0x358   :  { %3811 = vmatpush.bf16.msra.mxu0 %v5177_v19  ;;  %3802 = vmatmul.bf16.vlgmr.msrb.gmra.mxu3 %v8569_v53  ;;  %v6401_v19 = vld [vmem:[%s9482_s8 + $0x5c4] sm:$0xf] }
 0x359   :  { %3837 = vmatpush.bf16.msra.mxu2 %v5625_v20  ;;  %3846 = vmatpush.bf16.msra.mxu3 %v5961_v23  ;;  %v5818_v20 = vld [vmem:[%s9482_s8 + $0x5dc] sm:$0xf0]  ;;  %v5236_v23 = vld [vmem:[%s9482_s8 + $0x130] sm:$0xf] }
 0x35a   :  { %3826 = vmatpush.bf16.msra.mxu1 %v5345_v24  ;;  %v6258_v24 = vld [vmem:[%s9482_s8 + $0x148] sm:$0xf0]  ;;  %v5821_v21 = vor.u32 %v6401_v19, %v5818_v20  ;;  %v5124_v19 = vld [vmem:[%s9482_s8 + $0x50] sm:$0xf] }
 0x35b   :  { %v5237_v29 = vor.u32 %v6258_v24, %v5236_v23  ;;  %v6230_v20 = vld [vmem:[%s9482_s8 + $0x68] sm:$0xf0]  ;;  %v5908_v24 = vld [vmem:[%s9482_s8 + $0x670] sm:$0xf] }
 0x35c   :  { %3812 = vmatpush.bf16.msra.mxu0 %v5149_v34  ;;  %v5685_v34 = vor.u32 %v6370_v26, %v5684_v25  ;;  %v6342_v23 = vld [vmem:[%s9482_s8 + $0x3e8] sm:$0xf0]  ;;  %v5125_v26 = vor.u32 %v6230_v20, %v5124_v19 }
 0x35d   :  { %3838 = vmatpush.bf16.msra.mxu2 %v5597_v32  ;;  %3847 = vmatpush.bf16.msra.mxu3 %v5933_v35  ;;  %v5405_v32 = vor.u32 %v6300_v28, %v5404_v27  ;;  %v6251_v35 = vld [vmem:[%s9482_s8 + $0x110] sm:$0xf0]  ;;  %v6426_v25 = vld [vmem:[%s9482_s8 + $0x688] sm:$0xf0] }
 0x35e   :  { %3827 = vmatpush.bf16.msra.mxu1 %v5317_v36  ;;  %v9278_v16 = vpop.f32.mrf.mxu1  ;;  %v5656_v36 = vld [vmem:[%s9482_s8 + $0x478] sm:$0xf]  ;;  %v5209_v44 = vor.u32 %v6251_v35, %v5208_v33  ;;  %v6335_v33 = vld [vmem:[%s9482_s8 + $0x3b0] sm:$0xf0] }
 0x35f   :  { %v5880_v35 = vld [vmem:[%s9482_s8 + $0x638] sm:$0xf] }
 0x360   :  { %3813 = vmatpush.bf16.msra.mxu0 %v5121_v46  ;;  %v5762_v46 = vld [vmem:[%s9482_s8 + $0x56c] sm:$0xf0] }
 0x361   :  { %3839 = vmatpush.bf16.msra.mxu2 %v5569_v49  ;;  %3848 = vmatpush.bf16.msra.mxu3 %v5905_v54  ;;  %v5657_v49 = vor.u32 %v6363_v37, %v5656_v36  ;;  %v5628_v54 = vld [vmem:[%s9482_s8 + $0x440] sm:$0xf]  ;;  %v5765_v0 = vor.u32 %v6387_v45, %v5762_v46  ;;  %v6419_v36 = vld [vmem:[%s9482_s8 + $0x650] sm:$0xf0]  ;;  %v5097_v37 = vor.u32 %v6223_v31, %v5096_v60 }
 0x362   :  { %3872 = vmatpush.bf16.msrb.mxu1 %v5517_v40  ;;  %v6293_v40 = vld [vmem:[%s9482_s8 + $0x260] sm:$0xf0]  ;;  %v5629_v2 = vor.u32 %v6356_v55, %v5628_v54  ;;  %v2382_v55 = vperm.slane %v9365_v42, 1 }
 0x363   :  { %3828 = vmatmul.bf16.vlgmr.msra.gmra.mxu1 %v8456_v30  ;;  %v5377_v48 = vor.u32 %v6293_v40, %v5376_v38 }
 0x364   :  { %3814 = vmatpush.bf16.msra.mxu0 %v5093_v3  ;;  %v9321_v39 = vpop.f32.mrf.mxu0  ;;  %v5965_v3 = vor.u32 %v6440_v59, %v5964_v56 }
 0x365   :  { %3840 = vmatpush.bf16.msra.mxu2 %v5541_v4  ;;  %3849 = vmatpush.bf16.msra.mxu3 %v5877_v5  ;;  %v5152_v4 = vld [vmem:[%s9482_s8 + $0x88] sm:$0xf]  ;;  %v6237_v5 = vld [vmem:[%s9482_s8 + $0xa0] sm:$0xf0]  ;;  %v3557_v27 = vadd.f32 %v9321_v39, %v2381_v15 }
 0x366   :  { %3873 = vmatpush.bf16.msrb.mxu1 %v5489_v62  ;;  %v3571_v41 = vpop.f32.mrf.mxu1  ;;  %v5348_v62 = vld [vmem:[%s9482_s8 + $0x210] sm:$0xf]  ;;  %v5153_v58 = vor.u32 %v6237_v5, %v5152_v4 }
 0x367   :  { %3815 = vmatmul.bf16.vlgmr.msra.gmra.mxu0 %v8483_v47  ;;  %v5349_v8 = vor.u32 %v6286_v63, %v5348_v62  ;;  %v3570_v38 = vadd.f32 %v9278_v16, %v3557_v27  ;;  %v5881_v41 = vor.u32 %v6419_v36, %v5880_v35  ;;  %v5796_v62 = vld [vmem:[%s9482_s8 + $0x590] sm:$0xf]  ;;  %v6398_v63 = vld [vmem:[%s9482_s8 + $0x5a8] sm:$0xf0] }
 0x368   :  { %3859 = vmatpush.bf16.msrb.mxu0 %v5293_v6  ;;  %3841 = vmatmul.bf16.vlgmr.msra.gmra.mxu2 %v8491_v51  ;;  %v5600_v6 = vld [vmem:[%s9482_s8 + $0x408] sm:$0xf] }
 0x369   :  { %3885 = vmatpush.bf16.msrb.mxu2 %v5741_v10  ;;  %3850 = vmatpush.bf16.msra.mxu3 %v5849_v17  ;;  %v6349_v10 = vld [vmem:[%s9482_s8 + $0x420] sm:$0xf0] }
 0x36a   :  { %3874 = vmatpush.bf16.msrb.mxu1 %v5461_v11  ;;  %v5936_v11 = vld [vmem:[%s9482_s8 + $0x6a8] sm:$0xf]  ;;  %v5601_v17 = vor.u32 %v6349_v10, %v5600_v6 }
 0x36b   :  { %v3582_v1 = vpop.f32.mrf.mxu2 }
 0x36c   :  { %3860 = vmatpush.bf16.msrb.mxu0 %v5265_v18  ;;  %v3558_v7 = vpop.f32.mrf.mxu0  ;;  %v5937_v18 = vor.u32 %v6433_v12, %v5936_v11  ;;  %v3583_v45 = vadd.f32 %v3582_v1, %v3570_v38  ;;  %v5797_v1 = vor.u32 %v6398_v63, %v5796_v62 }
 0x36d   :  { %3886 = vmatpush.bf16.msrb.mxu2 %v5713_v9  ;;  %3851 = vmatpush.bf16.msra.mxu3 %v5821_v21  ;;  %v5572_v9 = vld [vmem:[%s9482_s8 + $0x3d0] sm:$0xf] }
 0x36e   :  { %3875 = vmatpush.bf16.msrb.mxu1 %v5433_v22  ;;  %v9392_v57 = vpop.f32.mrf.mxu1  ;;  %v5321_v22 = vor.u32 %v6279_v14, %v5320_v13  ;;  %v5573_v21 = vor.u32 %v6342_v23, %v5572_v9 }
 0x370   :  { %3861 = vmatpush.bf16.msrb.mxu0 %v5237_v29  ;;  %v5909_v29 = vor.u32 %v6426_v25, %v5908_v24 }
 0x371   :  { %3887 = vmatpush.bf16.msrb.mxu2 %v5685_v34  ;;  %3852 = vmatpush.bf16.msra.mxu3 %v5793_v43  ;;  %v5544_v34 = vld [vmem:[%s9482_s8 + $0x398] sm:$0xf]  ;;  %v5852_v43 = vld [vmem:[%s9482_s8 + $0x600] sm:$0xf] }
 0x372   :  { %3876 = vmatpush.bf16.msrb.mxu1 %v5405_v32  ;;  %v5545_v40 = vor.u32 %v6335_v33, %v5544_v34 }
 0x373   :  { %v3584_v28 = vpop.f32.mrf.mxu2 }
 0x374   :  { %3862 = vmatpush.bf16.msrb.mxu0 %v5209_v44  ;;  %v3608_v32 = vpop.f32.mrf.mxu0  ;;  %v6412_v44 = vld [vmem:[%s9482_s8 + $0x618] sm:$0xf0] }
 0x375   :  { %3888 = vmatpush.bf16.msrb.mxu2 %v5657_v49  ;;  %3853 = vmatpush.bf16.msra.mxu3 %v5765_v0 }
 0x376   :  { %3877 = vmatpush.bf16.msrb.mxu1 %v5377_v48  ;;  %v3623_v39 = vpop.f32.mrf.mxu1  ;;  %v5853_v48 = vor.u32 %v6412_v44, %v5852_v43 }
 0x378   :  { %3863 = vmatpush.bf16.msrb.mxu0 %v5181_v61  ;;  %3854 = vmatmul.bf16.vlgmr.msra.gmra.mxu3 %v8569_v53  ;;  %v3609_v61 = vadd.f32 %v3608_v32, %v2382_v55 }
 0x379   :  { %3889 = vmatpush.bf16.msrb.mxu2 %v5629_v2  ;;  %3898 = vmatpush.bf16.msrb.mxu3 %v5965_v3  ;;  %v6391_v2 = vld [vmem:[%s9482_s8 + $0x570] sm:$0xf0] }
 0x37a   :  { %3878 = vmatpush.bf16.msrb.mxu1 %v5349_v8  ;;  %v3595_v46 = vpop.f32.mrf.mxu3  ;;  %v3622_v5 = vadd.f32 %v9392_v57, %v3609_v61 }
 0x37b   :  { %v3596_v16 = vadd.f32 %v3595_v46, %v3583_v45  ;;  %v3634_v49 = vpop.f32.mrf.mxu2 }
 0x37c   :  { %3864 = vmatpush.bf16.msrb.mxu0 %v5153_v58  ;;  %v3610_v50 = vpop.f32.mrf.mxu0  ;;  %v3635_v10 = vadd.f32 %v3634_v49, %v3622_v5 }
 0x37d   :  { %3890 = vmatpush.bf16.msrb.mxu2 %v5601_v17  ;;  %3899 = vmatpush.bf16.msrb.mxu3 %v5937_v18  ;;  %v5966_v54 = vmul.f32 -1.442695, %v3596_v16 }
 0x37e   :  { %3879 = vmatpush.bf16.msrb.mxu1 %v5321_v22  ;;  %v2383_v22 = vperm.slane %v9365_v42, 2 }
 0x37f   :  { %6447 = vpow2.f32 %v5966_v54 }
 0x380   :  { %3865 = vmatpush.bf16.msrb.mxu0 %v5125_v26  ;;  %v3673_v56 = vpop.f32.mrf.mxu1 }
 0x381   :  { %3891 = vmatpush.bf16.msrb.mxu2 %v5573_v21  ;;  %3900 = vmatpush.bf16.msrb.mxu3 %v5909_v29 }
 0x382   :  { %3880 = vmatmul.bf16.vlgmr.msrb.gmra.mxu1 %v8456_v30  ;;  %v5824_v30 = vld [vmem:[%s9482_s8 + $0x5c8] sm:$0xf]  ;;  %v3597_v0 = vpop.f32.mrf.mxu3 }
 0x383   :  { %v5825_v59 = vor.u32 %v6405_v52, %v5824_v30  ;;  %v2384_v52 = vperm.slane %v9365_v42, 3 }
 0x384   :  { %3866 = vmatpush.bf16.msrb.mxu0 %v5097_v37  ;;  %v3660_v3 = vpop.f32.mrf.mxu0 }
 0x385   :  { %3892 = vmatpush.bf16.msrb.mxu2 %v5545_v40  ;;  %3901 = vmatpush.bf16.msrb.mxu3 %v5881_v41  ;;  %v6448_v4 = vpop.eup %6447  ;;  %v3661_v27 = vadd.f32 %v3660_v3, %v2383_v22 }
 0x386   :  { %v3932_v8 = vadd.f32 1.0, %v6448_v4 }
 0x387   :  { %3867 = vmatmul.bf16.vlgmr.msrb.gmra.mxu0 %v8483_v47  ;;  %v3636_v47 = vpop.f32.mrf.mxu2  ;;  %v3674_v29 = vadd.f32 %v3673_v56, %v3661_v27 }
 0x388   :  { %3893 = vmatmul.bf16.vlgmr.msrb.gmra.mxu2 %v8491_v51  ;;  %v5768_v51 = vld [vmem:[%s9482_s8 + $0x558] sm:$0xf]  ;;  %v3675_v6 = vpop.f32.mrf.mxu1  ;;  %6449 = vrcp.f32 %v3932_v8  ;;  %v3950_v33 = vand.u32 2147483648, %v3932_v8  ;;  %vm3944_vm4 = vweird.f32 %v3932_v8  ;;  %v3948_v37 = vand.u32 2147483647, %v3932_v8  ;;  %s6528_s8 = smov [#allocation4]  }
 0x389   :  { %3902 = vmatpush.bf16.msrb.mxu3 %v5853_v48  ;;  %v5769_v7 = vor.u32 %v6391_v2, %v5768_v51  ;;  %s4070_s1 = sshll.u32 %s6528_s8, 4  ;;  %s4071_s1 = int_to_ptr.vmem [resolvable:$true] %s4070_s1 }
 0x38a   :  { %v3647_v11 = vpop.f32.mrf.mxu3  ;;  %v3951_v44 = vor.u32 1.1754944e-38, %v3950_v33  ;;  %vm3949_vm9 = vcmp.eq.f32.partialorder %v3948_v37, 8.507059e+37  ;;  %4075 = dma.vmem_to_hbm [thread:$0]  %s4071_s1, 128, %s4073_s0, [#allocation5]  }
 0x38b   :  { %v3648_v12 = vadd.f32 %v3647_v11, %v3635_v10 }
 0x38c   :  { %v3662_v15 = vpop.f32.mrf.mxu0 }
 0x38d   :  { %3903 = vmatpush.bf16.msrb.mxu3 %v5825_v59  ;;  %v5967_v14 = vmul.f32 -1.442695, %v3648_v12 }
 0x38e   :  { %v6450_v17 = vpop.eup %6449 }
 0x38f   :  { %v3686_v13 = vpop.f32.mrf.mxu2  ;;  %6451 = vpow2.f32 %v5967_v14  ;;  %v3940_v57 = vmul.f32 %v6450_v17, %v3932_v8  ;;  %vm3945_vm2 = vweird.f32 %v6450_v17 }
 0x390   :  { %v3687_v36 = vadd.f32 %v3686_v13, %v3674_v29  ;;  %vm3946_vm5 = vmor %vm3944_vm4, %vm3945_vm2 }
 0x391   :  { %3904 = vmatpush.bf16.msrb.mxu3 %v5797_v1  ;;  %v3941_v9 = vsub.f32 1.0, %v3940_v57 }
 0x392   :  { %v3649_v58 = vpop.f32.mrf.mxu3 }
 0x393   :  { %v3942_v26 = vmul.f32 %v6450_v17, %v3941_v9 }
 0x395   :  { %3905 = vmatpush.bf16.msrb.mxu3 %v5769_v7  ;;  %v6452_v19 = vpop.eup %6451  ;;  %v3943_v60 = vadd.f32 %v6450_v17, %v3942_v26 }
 0x396   :  { %v3933_v20 = vadd.f32 1.0, %v6452_v19 }
 0x397   :  { %v3688_v18 = vpop.f32.mrf.mxu2  ;;  %v3947_v41 = vsel %vm3946_vm5, %v6450_v17, %v3943_v60 }
 0x398   :  { %3906 = vmatmul.bf16.vlgmr.msrb.gmra.mxu3 %v8569_v53  ;;  %6453 = vrcp.f32 %v3933_v20  ;;  %v3965_v31 = vand.u32 2147483648, %v3933_v20  ;;  %v3963_v35 = vand.u32 2147483647, %v3933_v20  ;;  %vm3959_vm6 = vweird.f32 %v3933_v20 }
 0x399   :  { %v3952_v49 = vsel %vm3949_vm9, %v3951_v44, %v3947_v41  ;;  %v2386_v41 = vperm.slane %v9365_v42, 5 }
 0x39a   :  { %v3966_v43 = vor.u32 1.1754944e-38, %v3965_v31  ;;  %vm3964_vm8 = vcmp.eq.f32.partialorder %v3963_v35, 8.507059e+37 }
 0x39b   :  { %v3699_v23 = vpop.f32.mrf.mxu3 }
 0x39c   :  { %v3700_v40 = vadd.f32 %v3699_v23, %v3687_v36 }
 0x39e   :  { %v6454_v25 = vpop.eup %6453  ;;  %v5968_v48 = vmul.f32 -1.442695, %v3700_v40 }
 0x39f   :  { %v3955_v28 = vmul.f32 %v6454_v25, %v3933_v20  ;;  %vm3960_vm3 = vweird.f32 %v6454_v25 }
 0x3a0   :  { %v3725_v24 = vpop.f32.mrf.mxu1  ;;  %vm3961_vm7 = vmor %vm3959_vm6, %vm3960_vm3  ;;  %6455 = vpow2.f32 %v5968_v48 }
 0x3a1   :  { %v3956_v21 = vsub.f32 1.0, %v3955_v28 }
 0x3a3   :  { %v3957_v34 = vmul.f32 %v6454_v25, %v3956_v21  ;;  %v3701_v32 = vpop.f32.mrf.mxu3 }
 0x3a4   :  { %v3712_v53 = vpop.f32.mrf.mxu0 }
 0x3a5   :  { %v3958_v38 = vadd.f32 %v6454_v25, %v3957_v34  ;;  %v3713_v55 = vadd.f32 %v3712_v53, %v2384_v52 }
 0x3a6   :  { %v6456_v56 = vpop.eup %6455 }
 0x3a7   :  { %v3962_v45 = vsel %vm3961_vm7, %v6454_v25, %v3958_v38  ;;  %v3726_v59 = vadd.f32 %v3725_v24, %v3713_v55  ;;  %v3934_v62 = vadd.f32 1.0, %v6456_v56  ;;  %v2385_v24 = vperm.slane %v9365_v42, 4 }
 0x3a8   :  { %v3727_v39 = vpop.f32.mrf.mxu1  ;;  %v3967_v16 = vsel %vm3964_vm8, %v3966_v43, %v3962_v45 }
 0x3a9   :  { %v4044_v30 = vpack.c.bf16 %v3967_v16, %v3952_v49  ;;  %6457 = vrcp.f32 %v3934_v62  ;;  %vm3974_vm11 = vweird.f32 %v3934_v62  ;;  %v3980_v18 = vand.u32 2147483648, %v3934_v62 }
 0x3aa   :  { %v3978_v20 = vand.u32 2147483647, %v3934_v62 }
 0x3ab   :  { %v3738_v46 = vpop.f32.mrf.mxu2  ;;  %4048 = vst [vmem:[#allocation2] sm:$0xff] %v4044_v30  ;;  %v3981_v25 = vor.u32 1.1754944e-38, %v3980_v18 }
 0x3ac   :  { %v3714_v50 = vpop.f32.mrf.mxu0  ;;  %v3739_v63 = vadd.f32 %v3738_v46, %v3726_v59  ;;  %vm3979_vm0 = vcmp.eq.f32.partialorder %v3978_v20, 8.507059e+37 }
 0x3af   :  { %v6458_v2 = vpop.eup %6457 }
 0x3b0   :  { %v3970_v6 = vmul.f32 %v6458_v2, %v3934_v62  ;;  %vm3975_vm10 = vweird.f32 %v6458_v2 }
 0x3b1   :  { %vm3976_vm13 = vmor %vm3974_vm11, %vm3975_vm10 }
 0x3b2   :  { %v3971_v11 = vsub.f32 1.0, %v3970_v6 }
 0x3b3   :  { %v3740_v54 = vpop.f32.mrf.mxu2 }
 0x3b4   :  { %v3972_v12 = vmul.f32 %v6458_v2, %v3971_v11 }
 0x3b6   :  { %v3973_v17 = vadd.f32 %v6458_v2, %v3972_v12 }
 0x3b8   :  { %v3977_v22 = vsel %vm3976_vm13, %v6458_v2, %v3973_v17 }
 0x3b9   :  { %v3982_v29 = vsel %vm3979_vm0, %v3981_v25, %v3977_v22 }
 0x3bb   :  { %v3751_v0 = vpop.f32.mrf.mxu3 }
 0x3bc   :  { %v3752_v61 = vadd.f32 %v3751_v0, %v3739_v63 }
 0x3be   :  { %v5969_v1 = vmul.f32 -1.442695, %v3752_v61 }
 0x3c0   :  { %v3777_v47 = vpop.f32.mrf.mxu1  ;;  %6459 = vpow2.f32 %v5969_v1 }
 0x3c3   :  { %v3753_v3 = vpop.f32.mrf.mxu3 }
 0x3c4   :  { %v3764_v51 = vpop.f32.mrf.mxu0 }
 0x3c5   :  { %v3765_v31 = vadd.f32 %v3764_v51, %v2385_v24  ;;  %v2387_v51 = vperm.slane %v9365_v42, 6 }
 0x3c6   :  { %v6460_v5 = vpop.eup %6459 }
 0x3c7   :  { %v3935_v7 = vadd.f32 1.0, %v6460_v5  ;;  %v3778_v34 = vadd.f32 %v3777_v47, %v3765_v31 }
 0x3c8   :  { %v3779_v4 = vpop.f32.mrf.mxu1 }
 0x3c9   :  { %6461 = vrcp.f32 %v3935_v7  ;;  %v3995_v19 = vand.u32 2147483648, %v3935_v7  ;;  %v3993_v9 = vand.u32 2147483647, %v3935_v7  ;;  %vm3989_vm14 = vweird.f32 %v3935_v7 }
 0x3cb   :  { %v3790_v8 = vpop.f32.mrf.mxu2  ;;  %v3996_v26 = vor.u32 1.1754944e-38, %v3995_v19  ;;  %vm3994_vm1 = vcmp.eq.f32.partialorder %v3993_v9, 8.507059e+37 }
 0x3cc   :  { %v3766_v10 = vpop.f32.mrf.mxu0  ;;  %v3791_v35 = vadd.f32 %v3790_v8, %v3778_v34 }
 0x3cf   :  { %v6462_v13 = vpop.eup %6461 }
 0x3d0   :  { %v3985_v14 = vmul.f32 %v6462_v13, %v3935_v7  ;;  %vm3990_vm12 = vweird.f32 %v6462_v13 }
 0x3d1   :  { %vm3991_vm15 = vmor %vm3989_vm14, %vm3990_vm12  ;;  %vm4051_vm14 = vcmask 125952  }
 0x3d2   :  { %v3986_v58 = vsub.f32 1.0, %v3985_v14 }
 0x3d3   :  { %v3792_v15 = vpop.f32.mrf.mxu2 }
 0x3d4   :  { %v3987_v57 = vmul.f32 %v6462_v13, %v3986_v58 }
 0x3d6   :  { %v3988_v23 = vadd.f32 %v6462_v13, %v3987_v57 }
 0x3d8   :  { %v3992_v28 = vsel %vm3991_vm15, %v6462_v13, %v3988_v23 }
 0x3d9   :  { %v3997_v53 = vsel %vm3994_vm1, %v3996_v26, %v3992_v28 }
 0x3da   :  { %v4045_v60 = vpack.c.bf16 %v3997_v53, %v3982_v29 }
 0x3db   :  { %v3803_v27 = vpop.f32.mrf.mxu3 }
 0x3dc   :  { %4049 = vst [vmem:[#allocation2 + $0x8] sm:$0xff] %v4045_v60  ;;  %v3804_v39 = vadd.f32 %v3803_v27, %v3791_v35 }
 0x3de   :  { %v5970_v38 = vmul.f32 -1.442695, %v3804_v39 }
 0x3e0   :  { %v3829_v21 = vpop.f32.mrf.mxu1  ;;  %6463 = vpow2.f32 %v5970_v38 }
 0x3e3   :  { %v3805_v33 = vpop.f32.mrf.mxu3 }
 0x3e4   :  { %v3816_v32 = vpop.f32.mrf.mxu0 }
 0x3e5   :  { %v3817_v44 = vadd.f32 %v3816_v32, %v2386_v41 }
 0x3e6   :  { %v6464_v45 = vpop.eup %6463 }
 0x3e7   :  { %v3830_v46 = vadd.f32 %v3829_v21, %v3817_v44  ;;  %v3936_v16 = vadd.f32 1.0, %v6464_v45 }
 0x3e8   :  { %v3831_v36 = vpop.f32.mrf.mxu1 }
 0x3e9   :  { %6465 = vrcp.f32 %v3936_v16  ;;  %vm4004_vm3 = vweird.f32 %v3936_v16  ;;  %v4010_v10 = vand.u32 2147483648, %v3936_v16  ;;  %v4008_v13 = vand.u32 2147483647, %v3936_v16 }
 0x3eb   :  { %v3842_v37 = vpop.f32.mrf.mxu2  ;;  %v4011_v18 = vor.u32 1.1754944e-38, %v4010_v10  ;;  %vm4009_vm8 = vcmp.eq.f32.partialorder %v4008_v13, 8.507059e+37 }
 0x3ec   :  { %v3818_v40 = vpop.f32.mrf.mxu0  ;;  %v3843_v49 = vadd.f32 %v3842_v37, %v3830_v46 }
 0x3ef   :  { %v6466_v55 = vpop.eup %6465 }
 0x3f0   :  { %v4000_v63 = vmul.f32 %v6466_v55, %v3936_v16  ;;  %vm4005_vm2 = vweird.f32 %v6466_v55 }
 0x3f1   :  { %vm4006_vm5 = vmor %vm4004_vm3, %vm4005_vm2 }
 0x3f2   :  { %v4001_v1 = vsub.f32 1.0, %v4000_v63 }
 0x3f3   :  { %v3844_v43 = vpop.f32.mrf.mxu2 }
 0x3f4   :  { %v4002_v2 = vmul.f32 %v6466_v55, %v4001_v1 }
 0x3f6   :  { %v4003_v8 = vadd.f32 %v6466_v55, %v4002_v2 }
 0x3f8   :  { %v4007_v58 = vsel %vm4006_vm5, %v6466_v55, %v4003_v8 }
 0x3f9   :  { %v4012_v22 = vsel %vm4009_vm8, %v4011_v18, %v4007_v58 }
 0x3fb   :  { %v3855_v48 = vpop.f32.mrf.mxu3 }
 0x3fc   :  { %v3856_v50 = vadd.f32 %v3855_v48, %v3843_v49 }
 0x3fe   :  { %v5971_v52 = vmul.f32 -1.442695, %v3856_v50 }
 0x3ff   :  { %v3881_v30 = vpop.f32.mrf.mxu1 }
 0x400   :  { %6467 = vpow2.f32 %v5971_v52 }
 0x403   :  { %v3857_v56 = vpop.f32.mrf.mxu3 }
 0x404   :  { %v3868_v54 = vpop.f32.mrf.mxu0 }
 0x405   :  { %v3869_v6 = vadd.f32 %v3868_v54, %v2387_v51 }
 0x406   :  { %v6468_v62 = vpop.eup %6467 }
 0x407   :  { %v3883_v59 = vpop.f32.mrf.mxu1  ;;  %v3937_v0 = vadd.f32 1.0, %v6468_v62  ;;  %v3882_v15 = vadd.f32 %v3881_v30, %v3869_v6 }
 0x409   :  { %6469 = vrcp.f32 %v3937_v0  ;;  %v4025_v11 = vand.u32 2147483648, %v3937_v0  ;;  %v4023_v14 = vand.u32 2147483647, %v3937_v0  ;;  %vm4019_vm6 = vweird.f32 %v3937_v0 }
 0x40b   :  { %v3894_v61 = vpop.f32.mrf.mxu2  ;;  %v4026_v19 = vor.u32 1.1754944e-38, %v4025_v11  ;;  %vm4024_vm9 = vcmp.eq.f32.partialorder %v4023_v14, 8.507059e+37 }
 0x40c   :  { %v3870_v47 = vpop.f32.mrf.mxu0  ;;  %v3895_v42 = vadd.f32 %v3894_v61, %v3882_v15 }
 0x40f   :  { %v6470_v3 = vpop.eup %6469 }
 0x410   :  { %v4015_v4 = vmul.f32 %v6470_v3, %v3937_v0  ;;  %vm4020_vm4 = vweird.f32 %v6470_v3 }
 0x411   :  { %vm4021_vm7 = vmor %vm4019_vm6, %vm4020_vm4 }
 0x412   :  { %v4016_v7 = vsub.f32 1.0, %v4015_v4 }
 0x413   :  { %v3896_v5 = vpop.f32.mrf.mxu2 }
 0x414   :  { %v4017_v12 = vmul.f32 %v6470_v3, %v4016_v7 }
 0x416   :  { %v4018_v17 = vadd.f32 %v6470_v3, %v4017_v12 }
 0x418   :  { %v4022_v20 = vsel %vm4021_vm7, %v6470_v3, %v4018_v17 }
 0x419   :  { %v4027_v23 = vsel %vm4024_vm9, %v4026_v19, %v4022_v20 }
 0x41a   :  { %v4046_v24 = vpack.c.bf16 %v4027_v23, %v4012_v22 }
 0x41b   :  { %v3907_v57 = vpop.f32.mrf.mxu3 }
 0x41c   :  { %v3908_v9 = vadd.f32 %v3907_v57, %v3895_v42  ;;  %4050 = vst [vmem:[#allocation2 + $0x10] sm:$0xff] %v4046_v24 }
 0x41e   :  { %v5972_v25 = vmul.f32 -1.442695, %v3908_v9 }
 0x420   :  { %6471 = vpow2.f32 %v5972_v25 }
 0x423   :  { %v3909_v26 = vpop.f32.mrf.mxu3 }
 0x426   :  { %v6472_v27 = vpop.eup %6471 }
 0x427   :  { %v3938_v28 = vadd.f32 1.0, %v6472_v27 }
 0x429   :  { %6473 = vrcp.f32 %v3938_v28  ;;  %v4040_v60 = vand.u32 2147483648, %v3938_v28  ;;  %v4038_v34 = vand.u32 2147483647, %v3938_v28  ;;  %vm4034_vm11 = vweird.f32 %v3938_v28 }
 0x42b   :  { %v4041_v33 = vor.u32 1.1754944e-38, %v4040_v60  ;;  %vm4039_vm13 = vcmp.eq.f32.partialorder %v4038_v34, 8.507059e+37 }
 0x42f   :  { %v6474_v21 = vpop.eup %6473 }
 0x430   :  { %v4030_v29 = vmul.f32 %v6474_v21, %v3938_v28  ;;  %vm4035_vm10 = vweird.f32 %v6474_v21 }
 0x431   :  { %vm4036_vm12 = vmor %vm4034_vm11, %vm4035_vm10 }
 0x432   :  { %v4031_v53 = vsub.f32 1.0, %v4030_v29 }
 0x434   :  { %v4032_v31 = vmul.f32 %v6474_v21, %v4031_v53 }
 0x436   :  { %v4033_v32 = vadd.f32 %v6474_v21, %v4032_v31 }
 0x438   :  { %v4037_v35 = vsel %vm4036_vm12, %v6474_v21, %v4033_v32 }
 0x439   :  { %v4042_v36 = vsel %vm4039_vm13, %v4041_v33, %v4037_v35 }
 0x43a   :  { %v4047_v39 = vpack.c.bf16 %v4042_v36, %v4042_v36 }
 0x43c   :  { %4052 = vst.msk [vmem:[#allocation2 + $0x18] sm:$0xf] %vm4051_vm14, %v4047_v39 }
 0x43d   :  { %4064 = dma.vmem_to_hbm [thread:$0]  %s4060_s13, 448, %s4062_s15, [#allocation3]  }
 0x43e   :  { %6523 = dma.done.wait [#allocation3], 448  }
 0x43f   :  { %6524 = vsyncadd [#allocation3], 4294966848 }
 0x440   :  { %6525 = dma.done.wait [#allocation5], 128  }
 0x441   :  { %6526 = vsyncadd [#allocation5], 4294967168 }
 0x442   :  { %4084 = vsyncpa [#allocation3], 1 }
 0x443   :  { %4085 = vsyncpa [#allocation5], 1 }

</bundles_post_ra>
